<compile_context>
chip_gen: v7x
topology: tpu7x:2x2x1
jax: 0.10.0
libtpu: 0.0.40
codegen_flags: <defaults>
</compile_context>

<pallas_src>
import functools

import jax
import jax.numpy as jnp
from jax import lax
from jax.experimental import pallas as pl
from jax.experimental.pallas import tpu as pltpu

EPS = 1e-5
LANE = 128   # lane-dense channel padding target


def _round_up(x, m):
    return (x + m - 1) // m * m


def _pad_to(a, shape):
    pads = [(0, t - s) for s, t in zip(a.shape, shape)]
    return jnp.pad(a, pads)


# ----------------------------- fused Pallas kernel ---------------------------

def _bottleneck_kernel(x_ref, s1_ref, t1_ref, w1_ref, b1_ref,
                       w2_ref, b2_ref, w3_ref, b3_ref,
                       o_ref, hpad_ref, *, H, W):
    HW = H * W
    PAD = 2 * W                      # zero bands above/below h in the scratch
    Pp = w1_ref.shape[1]

    # ---- BN1 -> ReLU -> conv1 (1x1, BN2 folded into weights) -> ReLU ---------
    x = x_ref[0]                                              # (HW, Cp) f32
    h = jnp.maximum(x * s1_ref[0] + t1_ref[0], 0.0)
    h = jnp.dot(h.astype(jnp.bfloat16), w1_ref[...],
                preferred_element_type=jnp.float32) + b1_ref[0]
    h = jnp.maximum(h, 0.0)                                   # (HW, Pp) f32

    # ---- conv2 (3x3, pad=1, BN3 folded) as 9 shifted matmuls in f32 ----------
    # h never leaves VMEM: written into a zero-padded scratch; each tap is a
    # shifted (HW, Pp) slice.  Vertical out-of-bounds lands in the zero bands,
    # horizontal out-of-bounds (row wrap) is masked per column.
    zero_band = jnp.zeros((PAD, Pp), jnp.float32)
    hpad_ref[0:PAD, :] = zero_band
    hpad_ref[PAD + HW:, :] = zero_band
    hpad_ref[PAD:PAD + HW, :] = h

    col = lax.broadcasted_iota(jnp.int32, (HW, 1), 0) % W
    mask_l = (col >= 1).astype(jnp.float32)                   # reading x-1 valid
    mask_r = (col < W - 1).astype(jnp.float32)                # reading x+1 valid

    acc = jnp.zeros((HW, Pp), jnp.float32)
    for dy in (-1, 0, 1):
        for dx in (-1, 0, 1):
            tap = (dy + 1) * 3 + (dx + 1)                     # ky*3 + kx
            start = PAD + dy * W + dx
            sh = hpad_ref[start:start + HW, :]
            if dx == -1:
                sh = sh * mask_l
            elif dx == 1:
                sh = sh * mask_r
            acc = acc + jnp.dot(sh.astype(jnp.bfloat16), w2_ref[tap],
                                preferred_element_type=jnp.float32)

    # ---- ReLU -> conv3 (1x1) -> + residual ------------------------------------
    h = jnp.maximum(acc + b2_ref[0], 0.0)
    out = jnp.dot(h.astype(jnp.bfloat16), w3_ref[...],
                  preferred_element_type=jnp.float32) + b3_ref[0]
    o_ref[0] = out + x


@functools.lru_cache(maxsize=None)
def _fused_bottleneck_call(N, H, W, Cp, Pp):
    HW = H * W
    PAD = 2 * W

    def c2(shape):
        return pl.BlockSpec(shape, lambda n: (0, 0))

    def c3(shape):
        return pl.BlockSpec(shape, lambda n: (0, 0, 0))

    kernel = functools.partial(_bottleneck_kernel, H=H, W=W)
    # TODO(synk): for production resolutions (e.g. planes=128, 64x64 maps) add a
    # halo-tiled HW grid axis so per-step blocks fit v7x's 64 MiB VMEM; at these
    # shapes one image per grid step fits comfortably.
    return pl.pallas_call(
        kernel,
        out_shape=jax.ShapeDtypeStruct((N, HW, Cp), jnp.float32),
        grid=(N,),
        in_specs=[pl.BlockSpec((1, HW, Cp), lambda n: (n, 0, 0)),
                  c2((1, Cp)), c2((1, Cp)),          # s1, t1
                  c2((Cp, Pp)), c2((1, Pp)),         # w1 (BN2 folded), b1
                  c3((9, Pp, Pp)), c2((1, Pp)),      # w2 taps (BN3 folded), b2
                  c2((Pp, Cp)), c2((1, Cp))],        # w3, b3
        out_specs=pl.BlockSpec((1, HW, Cp), lambda n: (n, 0, 0)),
        scratch_shapes=[pltpu.VMEM((HW + 2 * PAD, Pp), jnp.float32)],
        compiler_params=pltpu.CompilerParams(
            dimension_semantics=("parallel",),
            vmem_limit_bytes=32 * 1024 * 1024),
    )


# ------------------------------ Bottleneck -----------------------------------

def _bottleneck(x, p):
    # x: (N, H, W, Cp) channels-last, lane-padded
    N, H, W, Cp = x.shape
    Pp = p['w1p'].shape[1]
    out = _fused_bottleneck_call(N, H, W, Cp, Pp)(
        x.reshape(N, H * W, Cp),
        p['s1p'], p['t1p'], p['w1p'], p['b1p'],
        p['w2p'], p['b2p'], p['w3p'], p['b3p'])
    return out.reshape(N, H, W, Cp)


def _bottleneck_ref(x, p):
    # Pure-JAX f32 reference (unpadded channels, unfolded BN) for correctness.
    h = jnp.maximum(x * p['s1'][0] + p['t1'][0], 0.0)
    h = jnp.einsum('nhwc,cp->nhwp', h, p['w1'],
                   precision=lax.Precision.HIGHEST) + p['cb1'][0]
    h = jnp.maximum(h * p['s2'][0] + p['t2'][0], 0.0)
    h = lax.conv_general_dilated(h, p['w2_hwio'], (1, 1), ((1, 1), (1, 1)),
                                 dimension_numbers=('NHWC', 'HWIO', 'NHWC'),
                                 precision=lax.Precision.HIGHEST) + p['cb2'][0]
    h = jnp.maximum(h * p['s3'][0] + p['t3'][0], 0.0)
    h = jnp.einsum('nhwp,pq->nhwq', h, p['w3'],
                   precision=lax.Precision.HIGHEST) + p['cb3'][0]
    return h + x


# --------------------------- Hourglass recursion -----------------------------

def _maxpool2x2(x):
    N, H, W, C = x.shape
    return x.reshape(N, H // 2, 2, W // 2, 2, C).max(axis=(2, 4))


def _upsample2x(x):  # F.interpolate(scale_factor=2), default mode='nearest'
    return jnp.repeat(jnp.repeat(x, 2, axis=1), 2, axis=2)


def _residual_seq(x, seq_params, block_fn):
    for p in seq_params:
        x = block_fn(x, p)
    return x


def _hourglass(params, x, n, block_fn):
    lvl = params[n - 1]
    up1 = _residual_seq(x, lvl[0], block_fn)
    low1 = _maxpool2x2(x)
    low1 = _residual_seq(low1, lvl[1], block_fn)
    if n > 1:
        low2 = _hourglass(params, low1, n - 1, block_fn)
    else:
        low2 = _residual_seq(low1, lvl[3], block_fn)
    low3 = _residual_seq(low2, lvl[2], block_fn)
    up2 = _upsample2x(low3)
    return up1 + up2


def hourglass_apply(params, x_nchw, depth):
    # Public entry point: NCHW in, NCHW out (matches PyTorch Hourglass.forward).
    x = jnp.transpose(x_nchw, (0, 2, 3, 1))                  # NHWC
    N, H, W, C = x.shape
    Cp = _round_up(C, LANE)
    x = _pad_to(x, (N, H, W, Cp))                            # pad channels ONCE
    y = _hourglass(params, x, depth, _bottleneck)
    return jnp.transpose(y[..., :C], (0, 3, 1, 2))


def hourglass_ref(params, x_nchw, depth):
    x = jnp.transpose(x_nchw, (0, 2, 3, 1))
    y = _hourglass(params, x, depth, _bottleneck_ref)
    return jnp.transpose(y, (0, 3, 1, 2))


# ----------------------------- parameter init --------------------------------

def _init_bn(key, C):
    k1, k2, k3, k4 = jax.random.split(key, 4)
    gamma = 1.0 + 0.1 * jax.random.normal(k1, (C,), jnp.float32)
    beta = 0.1 * jax.random.normal(k2, (C,), jnp.float32)
    mean = 0.1 * jax.random.normal(k3, (C,), jnp.float32)
    var = 1.0 + 0.1 * jax.random.uniform(k4, (C,), jnp.float32)
    scale = gamma / jnp.sqrt(var + EPS)          # eval-mode BN folded to scale/shift
    shift = beta - mean * scale
    return scale.reshape(1, C), shift.reshape(1, C)


def _init_bottleneck(key, planes):
    in_c = 2 * planes                            # Bottleneck.expansion == 2
    Pp = _round_up(planes, LANE)
    Cp = _round_up(in_c, LANE)
    ks = jax.random.split(key, 9)
    s1, t1 = _init_bn(ks[0], in_c)
    s2, t2 = _init_bn(ks[1], planes)
    s3, t3 = _init_bn(ks[2], planes)
    w1 = 0.1 * jax.random.normal(ks[3], (in_c, planes), jnp.float32)     # 1x1 (in,out)
    cb1 = 0.05 * jax.random.normal(ks[4], (1, planes), jnp.float32)
    w2_oihw = 0.1 * jax.random.normal(ks[5], (planes, planes, 3, 3), jnp.float32)
    cb2 = 0.05 * jax.random.normal(ks[6], (1, planes), jnp.float32)
    w3 = 0.1 * jax.random.normal(ks[7], (planes, 2 * planes), jnp.float32)
    cb3 = 0.05 * jax.random.normal(ks[8], (1, 2 * planes), jnp.float32)
    w2_hwio = jnp.transpose(w2_oihw, (2, 3, 1, 0))          # (ky, kx, in, out)

    p = dict(s1=s1, t1=t1, w1=w1, cb1=cb1, s2=s2, t2=t2,
             w2_hwio=w2_hwio, cb2=cb2, s3=s3, t3=t3, w3=w3, cb3=cb3)

    # ---- kernel-ready params: BN2 folded into conv1, BN3 folded into conv2 ---
    #   relu((h@w1 + cb1)*s2 + t2)   == relu(h @ (w1*s2) + (cb1*s2 + t2))
    #   relu((conv(h,w2)+cb2)*s3+t3) == relu(conv(h, w2*s3) + (cb2*s3 + t3))
    # (exact for eval-mode BN). Padded channels stay exactly 0 throughout.
    w1f = w1 * s2                                       # (in, planes) * (1, planes)
    b1f = cb1 * s2 + t2
    w2f = w2_hwio * s3[0]                               # scale output channels
    b2f = cb2 * s3 + t3
    p.update(
        s1p=_pad_to(s1, (1, Cp)), t1p=_pad_to(t1, (1, Cp)),
        w1p=_pad_to(w1f, (Cp, Pp)).astype(jnp.bfloat16),
        b1p=_pad_to(b1f, (1, Pp)),
        w2p=_pad_to(w2f, (3, 3, Pp, Pp)).reshape(9, Pp, Pp).astype(jnp.bfloat16),
        b2p=_pad_to(b2f, (1, Pp)),
        w3p=_pad_to(w3, (Pp, Cp)).astype(jnp.bfloat16),
        b3p=_pad_to(cb3, (1, Cp)),
    )
    return p


def init_hourglass(key, num_blocks, planes, depth):
    # Mirrors Hourglass._make_hour_glass: hg[i] has 3 residual sequences,
    # plus a 4th at i == 0; each sequence is `num_blocks` Bottlenecks.
    params = []
    for i in range(depth):
        level = []
        for _ in range(4 if i == 0 else 3):
            seq = []
            for _ in range(num_blocks):
                key, sub = jax.random.split(key)
                seq.append(_init_bottleneck(sub, planes))
            level.append(seq)
        params.append(level)
    return params


# --------------------------------- main ---------------------------------------

if __name__ == "__main__":
    depth = 2
    num_blocks = 1
    planes = 4                       # Hourglass `planes`; feature channels = 2*planes
    N, H, W = 2, 16, 16
    C = 2 * planes

    key = jax.random.PRNGKey(0)
    kx_, kp_ = jax.random.split(key)
    x = jax.random.normal(kx_, (N, C, H, W), jnp.float32)   # NCHW, like PyTorch
    params = init_hourglass(kp_, num_blocks, planes, depth)

    fwd = jax.jit(functools.partial(hourglass_apply, depth=depth))
    out = jax.block_until_ready(fwd(params, x))

    ref = hourglass_ref(params, x, depth)
    assert out.shape == (N, C, H, W), out.shape
    assert bool(jnp.isfinite(out).all())
    max_ref = float(jnp.max(jnp.abs(ref)))
    max_err = float(jnp.max(jnp.abs(out - ref)))
    assert max_err <= 5e-2 * max(1.0, max_ref), (max_err, max_ref)
    print("KERNEL_OK")
</pallas_src>

<mosaic_0001>
module attributes {stable_mosaic.version = 11 : i64} {
  func.func @_bottleneck_kernel(%arg0: i32, %arg1: memref<1x64x128xf32, #tpu.memory_space<vmem>>, %arg2: memref<1x128xf32, #tpu.memory_space<vmem>>, %arg3: memref<1x128xf32, #tpu.memory_space<vmem>>, %arg4: memref<128x128xbf16, #tpu.memory_space<vmem>>, %arg5: memref<1x128xf32, #tpu.memory_space<vmem>>, %arg6: memref<9x128x128xbf16, #tpu.memory_space<vmem>>, %arg7: memref<1x128xf32, #tpu.memory_space<vmem>>, %arg8: memref<128x128xbf16, #tpu.memory_space<vmem>>, %arg9: memref<1x128xf32, #tpu.memory_space<vmem>>, %arg10: memref<1x64x128xf32, #tpu.memory_space<vmem>>, %arg11: memref<96x128xf32, #tpu.memory_space<vmem>>) attributes {dimension_semantics = [#tpu.dimension_semantics<parallel>], iteration_bounds = array<i64: 2>, scalar_prefetch = 0 : i64, scratch_operands = 1 : i64, tpu.core_type = #tpu.core_type<tc>, window_params = [{transform_indices = @transform_0, window_bounds = array<i64: 1, 64, 128>}, {pipeline_mode = #tpu.pipeline_mode<synchronous>, transform_indices = @transform_1, window_bounds = array<i64: 1, 128>}, {pipeline_mode = #tpu.pipeline_mode<synchronous>, transform_indices = @transform_2, window_bounds = array<i64: 1, 128>}, {pipeline_mode = #tpu.pipeline_mode<synchronous>, transform_indices = @transform_3, window_bounds = array<i64: 128, 128>}, {pipeline_mode = #tpu.pipeline_mode<synchronous>, transform_indices = @transform_4, window_bounds = array<i64: 1, 128>}, {pipeline_mode = #tpu.pipeline_mode<synchronous>, transform_indices = @transform_5, window_bounds = array<i64: 9, 128, 128>}, {pipeline_mode = #tpu.pipeline_mode<synchronous>, transform_indices = @transform_6, window_bounds = array<i64: 1, 128>}, {pipeline_mode = #tpu.pipeline_mode<synchronous>, transform_indices = @transform_7, window_bounds = array<i64: 128, 128>}, {pipeline_mode = #tpu.pipeline_mode<synchronous>, transform_indices = @transform_8, window_bounds = array<i64: 1, 128>}, {transform_indices = @transform_9, window_bounds = array<i64: 1, 64, 128>}]} {
    %c0 = arith.constant 0 : index
    %c0_0 = arith.constant 0 : index
    %c0_1 = arith.constant 0 : index
    %0 = vector.load %arg1[%c0, %c0_0, %c0_1] : memref<1x64x128xf32, #tpu.memory_space<vmem>>, vector<1x64x128xf32>
    %1 = vector.shape_cast %0 : vector<1x64x128xf32> to vector<64x128xf32>
    %c0_2 = arith.constant 0 : index
    %c0_3 = arith.constant 0 : index
    %2 = vector.load %arg2[%c0_2, %c0_3] : memref<1x128xf32, #tpu.memory_space<vmem>>, vector<1x128xf32>
    %3 = vector.shape_cast %2 : vector<1x128xf32> to vector<128xf32>
    %4 = vector.shape_cast %3 : vector<128xf32> to vector<1x128xf32>
    %5 = vector.broadcast %4 : vector<1x128xf32> to vector<64x128xf32>
    %6 = arith.mulf %1, %5 : vector<64x128xf32>
    %c0_4 = arith.constant 0 : index
    %c0_5 = arith.constant 0 : index
    %7 = vector.load %arg3[%c0_4, %c0_5] : memref<1x128xf32, #tpu.memory_space<vmem>>, vector<1x128xf32>
    %8 = vector.shape_cast %7 : vector<1x128xf32> to vector<128xf32>
    %9 = vector.shape_cast %8 : vector<128xf32> to vector<1x128xf32>
    %10 = vector.broadcast %9 : vector<1x128xf32> to vector<64x128xf32>
    %11 = arith.addf %6, %10 : vector<64x128xf32>
    %cst = arith.constant 0.000000e+00 : f32
    %12 = vector.broadcast %cst : f32 to vector<64x128xf32>
    %13 = arith.maximumf %11, %12 : vector<64x128xf32>
    %14 = arith.truncf %13 : vector<64x128xf32> to vector<64x128xbf16>
    %c0_6 = arith.constant 0 : index
    %c0_7 = arith.constant 0 : index
    %15 = vector.load %arg4[%c0_6, %c0_7] : memref<128x128xbf16, #tpu.memory_space<vmem>>, vector<128x128xbf16>
    %cst_8 = arith.constant dense<0.000000e+00> : vector<64x128xf32>
    %16 = tpu.matmul %14, %15, %cst_8 {dimension_numbers = #tpu.dot_dimension_numbers<[1], [0], [0], [1], [0, 0, 1, 1], [], []>} : vector<64x128xbf16>, vector<128x128xbf16>, vector<64x128xf32> -> vector<64x128xf32>
    %c0_9 = arith.constant 0 : index
    %c0_10 = arith.constant 0 : index
    %17 = vector.load %arg5[%c0_9, %c0_10] : memref<1x128xf32, #tpu.memory_space<vmem>>, vector<1x128xf32>
    %18 = vector.shape_cast %17 : vector<1x128xf32> to vector<128xf32>
    %19 = vector.shape_cast %18 : vector<128xf32> to vector<1x128xf32>
    %20 = vector.broadcast %19 : vector<1x128xf32> to vector<64x128xf32>
    %21 = arith.addf %16, %20 : vector<64x128xf32>
    %cst_11 = arith.constant 0.000000e+00 : f32
    %22 = vector.broadcast %cst_11 : f32 to vector<64x128xf32>
    %23 = arith.maximumf %21, %22 : vector<64x128xf32>
    %cst_12 = arith.constant 0.000000e+00 : f32
    %24 = vector.broadcast %cst_12 : f32 to vector<16x128xf32>
    %c0_13 = arith.constant 0 : index
    %c0_14 = arith.constant 0 : index
    %25 = vector.load %arg11[%c0_13, %c0_14] : memref<96x128xf32, #tpu.memory_space<vmem>>, vector<16x128xf32>
    tpu.vector_store %arg11[%c0_13, %c0_14], %24 {strides = array<i32>} : memref<96x128xf32, #tpu.memory_space<vmem>>, vector<16x128xf32>,
    %c80 = arith.constant 80 : index
    %c0_15 = arith.constant 0 : index
    %26 = vector.load %arg11[%c80, %c0_15] : memref<96x128xf32, #tpu.memory_space<vmem>>, vector<16x128xf32>
    tpu.vector_store %arg11[%c80, %c0_15], %24 {strides = array<i32>} : memref<96x128xf32, #tpu.memory_space<vmem>>, vector<16x128xf32>,
    %c16 = arith.constant 16 : index
    %c0_16 = arith.constant 0 : index
    %27 = vector.load %arg11[%c16, %c0_16] : memref<96x128xf32, #tpu.memory_space<vmem>>, vector<64x128xf32>
    tpu.vector_store %arg11[%c16, %c0_16], %23 {strides = array<i32>} : memref<96x128xf32, #tpu.memory_space<vmem>>, vector<64x128xf32>,
    %28 = tpu.iota {dimensions = array<i32: 0>} : vector<64x1xi32>
    %c8_i32 = arith.constant 8 : i32
    %c0_i32 = arith.constant 0 : i32
    %29 = arith.cmpi eq, %c8_i32, %c0_i32 : i32
    %c1_i32 = arith.constant 1 : i32
    %30 = arith.select %29, %c1_i32, %c8_i32 : i32
    %31 = vector.broadcast %30 : i32 to vector<64x1xi32>
    %32 = arith.remsi %28, %31 : vector<64x1xi32>
    %c0_i32_17 = arith.constant 0 : i32
    %33 = vector.broadcast %c0_i32_17 : i32 to vector<64x1xi32>
    %34 = arith.cmpi ne, %32, %33 : vector<64x1xi32>
    %c0_i32_18 = arith.constant 0 : i32
    %35 = vector.broadcast %c0_i32_18 : i32 to vector<64x1xi32>
    %36 = arith.cmpi slt, %32, %35 : vector<64x1xi32>
    %c0_i32_19 = arith.constant 0 : i32
    %37 = arith.cmpi slt, %30, %c0_i32_19 : i32
    %38 = vector.broadcast %37 : i1 to vector<64x1xi1>
    %39 = vector.broadcast %38 : vector<64x1xi1> to vector<64x1xi1>
    %40 = arith.xori %36, %39 : vector<64x1xi1>
    %41 = arith.andi %40, %34 : vector<64x1xi1>
    %42 = vector.broadcast %30 : i32 to vector<64x1xi32>
    %43 = arith.addi %32, %42 : vector<64x1xi32>
    %44 = arith.select %41, %43, %32 : vector<64x1xi1>, vector<64x1xi32>
    %c1_i32_20 = arith.constant 1 : i32
    %45 = vector.broadcast %c1_i32_20 : i32 to vector<64x1xi32>
    %46 = arith.cmpi sge, %44, %45 : vector<64x1xi32>
    %47 = arith.extui %46 : vector<64x1xi1> to vector<64x1xi32>
    %48 = arith.sitofp %47 : vector<64x1xi32> to vector<64x1xf32>
    %c7_i32 = arith.constant 7 : i32
    %49 = vector.broadcast %c7_i32 : i32 to vector<64x1xi32>
    %50 = arith.cmpi slt, %44, %49 : vector<64x1xi32>
    %51 = arith.extui %50 : vector<64x1xi1> to vector<64x1xi32>
    %52 = arith.sitofp %51 : vector<64x1xi32> to vector<64x1xf32>
    %cst_21 = arith.constant 0.000000e+00 : f32
    %53 = vector.broadcast %cst_21 : f32 to vector<64x128xf32>
    %c7 = arith.constant 7 : index
    %c0_22 = arith.constant 0 : index
    %54 = vector.load %arg11[%c7, %c0_22] : memref<96x128xf32, #tpu.memory_space<vmem>>, vector<64x128xf32>
    %55 = vector.broadcast %48 : vector<64x1xf32> to vector<64x128xf32>
    %56 = arith.mulf %54, %55 : vector<64x128xf32>
    %57 = arith.truncf %56 : vector<64x128xf32> to vector<64x128xbf16>
    %c0_23 = arith.constant 0 : index
    %c0_24 = arith.constant 0 : index
    %c0_25 = arith.constant 0 : index
    %58 = vector.load %arg6[%c0_23, %c0_24, %c0_25] : memref<9x128x128xbf16, #tpu.memory_space<vmem>>, vector<1x128x128xbf16>
    %59 = vector.shape_cast %58 : vector<1x128x128xbf16> to vector<128x128xbf16>
    %cst_26 = arith.constant dense<0.000000e+00> : vector<64x128xf32>
    %60 = tpu.matmul %57, %59, %cst_26 {dimension_numbers = #tpu.dot_dimension_numbers<[1], [0], [0], [1], [0, 0, 1, 1], [], []>} : vector<64x128xbf16>, vector<128x128xbf16>, vector<64x128xf32> -> vector<64x128xf32>
    %61 = arith.addf %53, %60 : vector<64x128xf32>
    %c8 = arith.constant 8 : index
    %c0_27 = arith.constant 0 : index
    %62 = vector.load %arg11[%c8, %c0_27] : memref<96x128xf32, #tpu.memory_space<vmem>>, vector<64x128xf32>
    %63 = arith.truncf %62 : vector<64x128xf32> to vector<64x128xbf16>
    %c1 = arith.constant 1 : index
    %c0_28 = arith.constant 0 : index
    %c0_29 = arith.constant 0 : index
    %64 = vector.load %arg6[%c1, %c0_28, %c0_29] : memref<9x128x128xbf16, #tpu.memory_space<vmem>>, vector<1x128x128xbf16>
    %65 = vector.shape_cast %64 : vector<1x128x128xbf16> to vector<128x128xbf16>
    %cst_30 = arith.constant dense<0.000000e+00> : vector<64x128xf32>
    %66 = tpu.matmul %63, %65, %cst_30 {dimension_numbers = #tpu.dot_dimension_numbers<[1], [0], [0], [1], [0, 0, 1, 1], [], []>} : vector<64x128xbf16>, vector<128x128xbf16>, vector<64x128xf32> -> vector<64x128xf32>
    %67 = arith.addf %61, %66 : vector<64x128xf32>
    %c9 = arith.constant 9 : index
    %c0_31 = arith.constant 0 : index
    %68 = vector.load %arg11[%c9, %c0_31] : memref<96x128xf32, #tpu.memory_space<vmem>>, vector<64x128xf32>
    %69 = vector.broadcast %52 : vector<64x1xf32> to vector<64x128xf32>
    %70 = arith.mulf %68, %69 : vector<64x128xf32>
    %71 = arith.truncf %70 : vector<64x128xf32> to vector<64x128xbf16>
    %c2 = arith.constant 2 : index
    %c0_32 = arith.constant 0 : index
    %c0_33 = arith.constant 0 : index
    %72 = vector.load %arg6[%c2, %c0_32, %c0_33] : memref<9x128x128xbf16, #tpu.memory_space<vmem>>, vector<1x128x128xbf16>
    %73 = vector.shape_cast %72 : vector<1x128x128xbf16> to vector<128x128xbf16>
    %cst_34 = arith.constant dense<0.000000e+00> : vector<64x128xf32>
    %74 = tpu.matmul %71, %73, %cst_34 {dimension_numbers = #tpu.dot_dimension_numbers<[1], [0], [0], [1], [0, 0, 1, 1], [], []>} : vector<64x128xbf16>, vector<128x128xbf16>, vector<64x128xf32> -> vector<64x128xf32>
    %75 = arith.addf %67, %74 : vector<64x128xf32>
    %c15 = arith.constant 15 : index
    %c0_35 = arith.constant 0 : index
    %76 = vector.load %arg11[%c15, %c0_35] : memref<96x128xf32, #tpu.memory_space<vmem>>, vector<64x128xf32>
    %77 = vector.broadcast %48 : vector<64x1xf32> to vector<64x128xf32>
    %78 = arith.mulf %76, %77 : vector<64x128xf32>
    %79 = arith.truncf %78 : vector<64x128xf32> to vector<64x128xbf16>
    %c3 = arith.constant 3 : index
    %c0_36 = arith.constant 0 : index
    %c0_37 = arith.constant 0 : index
    %80 = vector.load %arg6[%c3, %c0_36, %c0_37] : memref<9x128x128xbf16, #tpu.memory_space<vmem>>, vector<1x128x128xbf16>
    %81 = vector.shape_cast %80 : vector<1x128x128xbf16> to vector<128x128xbf16>
    %cst_38 = arith.constant dense<0.000000e+00> : vector<64x128xf32>
    %82 = tpu.matmul %79, %81, %cst_38 {dimension_numbers = #tpu.dot_dimension_numbers<[1], [0], [0], [1], [0, 0, 1, 1], [], []>} : vector<64x128xbf16>, vector<128x128xbf16>, vector<64x128xf32> -> vector<64x128xf32>
    %83 = arith.addf %75, %82 : vector<64x128xf32>
    %c16_39 = arith.constant 16 : index
    %c0_40 = arith.constant 0 : index
    %84 = vector.load %arg11[%c16_39, %c0_40] : memref<96x128xf32, #tpu.memory_space<vmem>>, vector<64x128xf32>
    %85 = arith.truncf %84 : vector<64x128xf32> to vector<64x128xbf16>
    %c4 = arith.constant 4 : index
    %c0_41 = arith.constant 0 : index
    %c0_42 = arith.constant 0 : index
    %86 = vector.load %arg6[%c4, %c0_41, %c0_42] : memref<9x128x128xbf16, #tpu.memory_space<vmem>>, vector<1x128x128xbf16>
    %87 = vector.shape_cast %86 : vector<1x128x128xbf16> to vector<128x128xbf16>
    %cst_43 = arith.constant dense<0.000000e+00> : vector<64x128xf32>
    %88 = tpu.matmul %85, %87, %cst_43 {dimension_numbers = #tpu.dot_dimension_numbers<[1], [0], [0], [1], [0, 0, 1, 1], [], []>} : vector<64x128xbf16>, vector<128x128xbf16>, vector<64x128xf32> -> vector<64x128xf32>
    %89 = arith.addf %83, %88 : vector<64x128xf32>
    %c17 = arith.constant 17 : index
    %c0_44 = arith.constant 0 : index
    %90 = vector.load %arg11[%c17, %c0_44] : memref<96x128xf32, #tpu.memory_space<vmem>>, vector<64x128xf32>
    %91 = vector.broadcast %52 : vector<64x1xf32> to vector<64x128xf32>
    %92 = arith.mulf %90, %91 : vector<64x128xf32>
    %93 = arith.truncf %92 : vector<64x128xf32> to vector<64x128xbf16>
    %c5 = arith.constant 5 : index
    %c0_45 = arith.constant 0 : index
    %c0_46 = arith.constant 0 : index
    %94 = vector.load %arg6[%c5, %c0_45, %c0_46] : memref<9x128x128xbf16, #tpu.memory_space<vmem>>, vector<1x128x128xbf16>
    %95 = vector.shape_cast %94 : vector<1x128x128xbf16> to vector<128x128xbf16>
    %cst_47 = arith.constant dense<0.000000e+00> : vector<64x128xf32>
    %96 = tpu.matmul %93, %95, %cst_47 {dimension_numbers = #tpu.dot_dimension_numbers<[1], [0], [0], [1], [0, 0, 1, 1], [], []>} : vector<64x128xbf16>, vector<128x128xbf16>, vector<64x128xf32> -> vector<64x128xf32>
    %97 = arith.addf %89, %96 : vector<64x128xf32>
    %c23 = arith.constant 23 : index
    %c0_48 = arith.constant 0 : index
    %98 = vector.load %arg11[%c23, %c0_48] : memref<96x128xf32, #tpu.memory_space<vmem>>, vector<64x128xf32>
    %99 = vector.broadcast %48 : vector<64x1xf32> to vector<64x128xf32>
    %100 = arith.mulf %98, %99 : vector<64x128xf32>
    %101 = arith.truncf %100 : vector<64x128xf32> to vector<64x128xbf16>
    %c6 = arith.constant 6 : index
    %c0_49 = arith.constant 0 : index
    %c0_50 = arith.constant 0 : index
    %102 = vector.load %arg6[%c6, %c0_49, %c0_50] : memref<9x128x128xbf16, #tpu.memory_space<vmem>>, vector<1x128x128xbf16>
    %103 = vector.shape_cast %102 : vector<1x128x128xbf16> to vector<128x128xbf16>
    %cst_51 = arith.constant dense<0.000000e+00> : vector<64x128xf32>
    %104 = tpu.matmul %101, %103, %cst_51 {dimension_numbers = #tpu.dot_dimension_numbers<[1], [0], [0], [1], [0, 0, 1, 1], [], []>} : vector<64x128xbf16>, vector<128x128xbf16>, vector<64x128xf32> -> vector<64x128xf32>
    %105 = arith.addf %97, %104 : vector<64x128xf32>
    %c24 = arith.constant 24 : index
    %c0_52 = arith.constant 0 : index
    %106 = vector.load %arg11[%c24, %c0_52] : memref<96x128xf32, #tpu.memory_space<vmem>>, vector<64x128xf32>
    %107 = arith.truncf %106 : vector<64x128xf32> to vector<64x128xbf16>
    %c7_53 = arith.constant 7 : index
    %c0_54 = arith.constant 0 : index
    %c0_55 = arith.constant 0 : index
    %108 = vector.load %arg6[%c7_53, %c0_54, %c0_55] : memref<9x128x128xbf16, #tpu.memory_space<vmem>>, vector<1x128x128xbf16>
    %109 = vector.shape_cast %108 : vector<1x128x128xbf16> to vector<128x128xbf16>
    %cst_56 = arith.constant dense<0.000000e+00> : vector<64x128xf32>
    %110 = tpu.matmul %107, %109, %cst_56 {dimension_numbers = #tpu.dot_dimension_numbers<[1], [0], [0], [1], [0, 0, 1, 1], [], []>} : vector<64x128xbf16>, vector<128x128xbf16>, vector<64x128xf32> -> vector<64x128xf32>
    %111 = arith.addf %105, %110 : vector<64x128xf32>
    %c25 = arith.constant 25 : index
    %c0_57 = arith.constant 0 : index
    %112 = vector.load %arg11[%c25, %c0_57] : memref<96x128xf32, #tpu.memory_space<vmem>>, vector<64x128xf32>
    %113 = vector.broadcast %52 : vector<64x1xf32> to vector<64x128xf32>
    %114 = arith.mulf %112, %113 : vector<64x128xf32>
    %115 = arith.truncf %114 : vector<64x128xf32> to vector<64x128xbf16>
    %c8_58 = arith.constant 8 : index
    %c0_59 = arith.constant 0 : index
    %c0_60 = arith.constant 0 : index
    %116 = vector.load %arg6[%c8_58, %c0_59, %c0_60] : memref<9x128x128xbf16, #tpu.memory_space<vmem>>, vector<1x128x128xbf16>
    %117 = vector.shape_cast %116 : vector<1x128x128xbf16> to vector<128x128xbf16>
    %cst_61 = arith.constant dense<0.000000e+00> : vector<64x128xf32>
    %118 = tpu.matmul %115, %117, %cst_61 {dimension_numbers = #tpu.dot_dimension_numbers<[1], [0], [0], [1], [0, 0, 1, 1], [], []>} : vector<64x128xbf16>, vector<128x128xbf16>, vector<64x128xf32> -> vector<64x128xf32>
    %119 = arith.addf %111, %118 : vector<64x128xf32>
    %c0_62 = arith.constant 0 : index
    %c0_63 = arith.constant 0 : index
    %120 = vector.load %arg7[%c0_62, %c0_63] : memref<1x128xf32, #tpu.memory_space<vmem>>, vector<1x128xf32>
    %121 = vector.shape_cast %120 : vector<1x128xf32> to vector<128xf32>
    %122 = vector.shape_cast %121 : vector<128xf32> to vector<1x128xf32>
    %123 = vector.broadcast %122 : vector<1x128xf32> to vector<64x128xf32>
    %124 = arith.addf %119, %123 : vector<64x128xf32>
    %cst_64 = arith.constant 0.000000e+00 : f32
    %125 = vector.broadcast %cst_64 : f32 to vector<64x128xf32>
    %126 = arith.maximumf %124, %125 : vector<64x128xf32>
    %127 = arith.truncf %126 : vector<64x128xf32> to vector<64x128xbf16>
    %c0_65 = arith.constant 0 : index
    %c0_66 = arith.constant 0 : index
    %128 = vector.load %arg8[%c0_65, %c0_66] : memref<128x128xbf16, #tpu.memory_space<vmem>>, vector<128x128xbf16>
    %cst_67 = arith.constant dense<0.000000e+00> : vector<64x128xf32>
    %129 = tpu.matmul %127, %128, %cst_67 {dimension_numbers = #tpu.dot_dimension_numbers<[1], [0], [0], [1], [0, 0, 1, 1], [], []>} : vector<64x128xbf16>, vector<128x128xbf16>, vector<64x128xf32> -> vector<64x128xf32>
    %c0_68 = arith.constant 0 : index
    %c0_69 = arith.constant 0 : index
    %130 = vector.load %arg9[%c0_68, %c0_69] : memref<1x128xf32, #tpu.memory_space<vmem>>, vector<1x128xf32>
    %131 = vector.shape_cast %130 : vector<1x128xf32> to vector<128xf32>
    %132 = vector.shape_cast %131 : vector<128xf32> to vector<1x128xf32>
    %133 = vector.broadcast %132 : vector<1x128xf32> to vector<64x128xf32>
    %134 = arith.addf %129, %133 : vector<64x128xf32>
    %135 = arith.addf %134, %1 : vector<64x128xf32>
    %c0_70 = arith.constant 0 : index
    %c0_71 = arith.constant 0 : index
    %c0_72 = arith.constant 0 : index
    %136 = vector.load %arg10[%c0_70, %c0_71, %c0_72] : memref<1x64x128xf32, #tpu.memory_space<vmem>>, vector<1x64x128xf32>
    %137 = vector.shape_cast %136 : vector<1x64x128xf32> to vector<64x128xf32>
    %138 = vector.shape_cast %135 : vector<64x128xf32> to vector<1x64x128xf32>
    tpu.vector_store %arg10[%c0_70, %c0_71, %c0_72], %138 {strides = array<i32>} : memref<1x64x128xf32, #tpu.memory_space<vmem>>, vector<1x64x128xf32>,
    return
  }
  func.func @transform_0(%arg0: i32) -> (i32, i32, i32) {
    %c0_i32 = arith.constant 0 : i32
    %c0_i32_0 = arith.constant 0 : i32
    %c0_i32_1 = arith.constant 0 : i32
    return %arg0, %c0_i32, %c0_i32_0 : i32, i32, i32
  }
  func.func @transform_1(%arg0: i32) -> (i32, i32) {
    %c0_i32 = arith.constant 0 : i32
    %c0_i32_0 = arith.constant 0 : i32
    %c0_i32_1 = arith.constant 0 : i32
    return %c0_i32, %c0_i32_0 : i32, i32
  }
  func.func @transform_2(%arg0: i32) -> (i32, i32) {
    %c0_i32 = arith.constant 0 : i32
    %c0_i32_0 = arith.constant 0 : i32
    %c0_i32_1 = arith.constant 0 : i32
    return %c0_i32, %c0_i32_0 : i32, i32
  }
  func.func @transform_3(%arg0: i32) -> (i32, i32) {
    %c0_i32 = arith.constant 0 : i32
    %c0_i32_0 = arith.constant 0 : i32
    %c0_i32_1 = arith.constant 0 : i32
    return %c0_i32, %c0_i32_0 : i32, i32
  }
  func.func @transform_4(%arg0: i32) -> (i32, i32) {
    %c0_i32 = arith.constant 0 : i32
    %c0_i32_0 = arith.constant 0 : i32
    %c0_i32_1 = arith.constant 0 : i32
    return %c0_i32, %c0_i32_0 : i32, i32
  }
  func.func @transform_5(%arg0: i32) -> (i32, i32, i32) {
    %c0_i32 = arith.constant 0 : i32
    %c0_i32_0 = arith.constant 0 : i32
    %c0_i32_1 = arith.constant 0 : i32
    %c0_i32_2 = arith.constant 0 : i32
    return %c0_i32, %c0_i32_0, %c0_i32_1 : i32, i32, i32
  }
  func.func @transform_6(%arg0: i32) -> (i32, i32) {
    %c0_i32 = arith.constant 0 : i32
    %c0_i32_0 = arith.constant 0 : i32
    %c0_i32_1 = arith.constant 0 : i32
    return %c0_i32, %c0_i32_0 : i32, i32
  }
  func.func @transform_7(%arg0: i32) -> (i32, i32) {
    %c0_i32 = arith.constant 0 : i32
    %c0_i32_0 = arith.constant 0 : i32
    %c0_i32_1 = arith.constant 0 : i32
    return %c0_i32, %c0_i32_0 : i32, i32
  }
  func.func @transform_8(%arg0: i32) -> (i32, i32) {
    %c0_i32 = arith.constant 0 : i32
    %c0_i32_0 = arith.constant 0 : i32
    %c0_i32_1 = arith.constant 0 : i32
    return %c0_i32, %c0_i32_0 : i32, i32
  }
  func.func @transform_9(%arg0: i32) -> (i32, i32, i32) {
    %c0_i32 = arith.constant 0 : i32
    %c0_i32_0 = arith.constant 0 : i32
    %c0_i32_1 = arith.constant 0 : i32
    return %arg0, %c0_i32, %c0_i32_0 : i32, i32, i32
  }
}

module attributes {stable_mosaic.version = 11 : i64} {
  func.func @_bottleneck_kernel(%arg0: i32, %arg1: memref<1x16x128xf32, #tpu.memory_space<vmem>>, %arg2: memref<1x128xf32, #tpu.memory_space<vmem>>, %arg3: memref<1x128xf32, #tpu.memory_space<vmem>>, %arg4: memref<128x128xbf16, #tpu.memory_space<vmem>>, %arg5: memref<1x128xf32, #tpu.memory_space<vmem>>, %arg6: memref<9x128x128xbf16, #tpu.memory_space<vmem>>, %arg7: memref<1x128xf32, #tpu.memory_space<vmem>>, %arg8: memref<128x128xbf16, #tpu.memory_space<vmem>>, %arg9: memref<1x128xf32, #tpu.memory_space<vmem>>, %arg10: memref<1x16x128xf32, #tpu.memory_space<vmem>>, %arg11: memref<32x128xf32, #tpu.memory_space<vmem>>) attributes {dimension_semantics = [#tpu.dimension_semantics<parallel>], iteration_bounds = array<i64: 2>, scalar_prefetch = 0 : i64, scratch_operands = 1 : i64, tpu.core_type = #tpu.core_type<tc>, window_params = [{transform_indices = @transform_0, window_bounds = array<i64: 1, 16, 128>}, {pipeline_mode = #tpu.pipeline_mode<synchronous>, transform_indices = @transform_1, window_bounds = array<i64: 1, 128>}, {pipeline_mode = #tpu.pipeline_mode<synchronous>, transform_indices = @transform_2, window_bounds = array<i64: 1, 128>}, {pipeline_mode = #tpu.pipeline_mode<synchronous>, transform_indices = @transform_3, window_bounds = array<i64: 128, 128>}, {pipeline_mode = #tpu.pipeline_mode<synchronous>, transform_indices = @transform_4, window_bounds = array<i64: 1, 128>}, {pipeline_mode = #tpu.pipeline_mode<synchronous>, transform_indices = @transform_5, window_bounds = array<i64: 9, 128, 128>}, {pipeline_mode = #tpu.pipeline_mode<synchronous>, transform_indices = @transform_6, window_bounds = array<i64: 1, 128>}, {pipeline_mode = #tpu.pipeline_mode<synchronous>, transform_indices = @transform_7, window_bounds = array<i64: 128, 128>}, {pipeline_mode = #tpu.pipeline_mode<synchronous>, transform_indices = @transform_8, window_bounds = array<i64: 1, 128>}, {transform_indices = @transform_9, window_bounds = array<i64: 1, 16, 128>}]} {
    %c0 = arith.constant 0 : index
    %c0_0 = arith.constant 0 : index
    %c0_1 = arith.constant 0 : index
    %0 = vector.load %arg1[%c0, %c0_0, %c0_1] : memref<1x16x128xf32, #tpu.memory_space<vmem>>, vector<1x16x128xf32>
    %1 = vector.shape_cast %0 : vector<1x16x128xf32> to vector<16x128xf32>
    %c0_2 = arith.constant 0 : index
    %c0_3 = arith.constant 0 : index
    %2 = vector.load %arg2[%c0_2, %c0_3] : memref<1x128xf32, #tpu.memory_space<vmem>>, vector<1x128xf32>
    %3 = vector.shape_cast %2 : vector<1x128xf32> to vector<128xf32>
    %4 = vector.shape_cast %3 : vector<128xf32> to vector<1x128xf32>
    %5 = vector.broadcast %4 : vector<1x128xf32> to vector<16x128xf32>
    %6 = arith.mulf %1, %5 : vector<16x128xf32>
    %c0_4 = arith.constant 0 : index
    %c0_5 = arith.constant 0 : index
    %7 = vector.load %arg3[%c0_4, %c0_5] : memref<1x128xf32, #tpu.memory_space<vmem>>, vector<1x128xf32>
    %8 = vector.shape_cast %7 : vector<1x128xf32> to vector<128xf32>
    %9 = vector.shape_cast %8 : vector<128xf32> to vector<1x128xf32>
    %10 = vector.broadcast %9 : vector<1x128xf32> to vector<16x128xf32>
    %11 = arith.addf %6, %10 : vector<16x128xf32>
    %cst = arith.constant 0.000000e+00 : f32
    %12 = vector.broadcast %cst : f32 to vector<16x128xf32>
    %13 = arith.maximumf %11, %12 : vector<16x128xf32>
    %14 = arith.truncf %13 : vector<16x128xf32> to vector<16x128xbf16>
    %c0_6 = arith.constant 0 : index
    %c0_7 = arith.constant 0 : index
    %15 = vector.load %arg4[%c0_6, %c0_7] : memref<128x128xbf16, #tpu.memory_space<vmem>>, vector<128x128xbf16>
    %cst_8 = arith.constant dense<0.000000e+00> : vector<16x128xf32>
    %16 = tpu.matmul %14, %15, %cst_8 {dimension_numbers = #tpu.dot_dimension_numbers<[1], [0], [0], [1], [0, 0, 1, 1], [], []>} : vector<16x128xbf16>, vector<128x128xbf16>, vector<16x128xf32> -> vector<16x128xf32>
    %c0_9 = arith.constant 0 : index
    %c0_10 = arith.constant 0 : index
    %17 = vector.load %arg5[%c0_9, %c0_10] : memref<1x128xf32, #tpu.memory_space<vmem>>, vector<1x128xf32>
    %18 = vector.shape_cast %17 : vector<1x128xf32> to vector<128xf32>
    %19 = vector.shape_cast %18 : vector<128xf32> to vector<1x128xf32>
    %20 = vector.broadcast %19 : vector<1x128xf32> to vector<16x128xf32>
    %21 = arith.addf %16, %20 : vector<16x128xf32>
    %cst_11 = arith.constant 0.000000e+00 : f32
    %22 = vector.broadcast %cst_11 : f32 to vector<16x128xf32>
    %23 = arith.maximumf %21, %22 : vector<16x128xf32>
    %cst_12 = arith.constant 0.000000e+00 : f32
    %24 = vector.broadcast %cst_12 : f32 to vector<8x128xf32>
    %c0_13 = arith.constant 0 : index
    %c0_14 = arith.constant 0 : index
    %25 = vector.load %arg11[%c0_13, %c0_14] : memref<32x128xf32, #tpu.memory_space<vmem>>, vector<8x128xf32>
    tpu.vector_store %arg11[%c0_13, %c0_14], %24 {strides = array<i32>} : memref<32x128xf32, #tpu.memory_space<vmem>>, vector<8x128xf32>,
    %c24 = arith.constant 24 : index
    %c0_15 = arith.constant 0 : index
    %26 = vector.load %arg11[%c24, %c0_15] : memref<32x128xf32, #tpu.memory_space<vmem>>, vector<8x128xf32>
    tpu.vector_store %arg11[%c24, %c0_15], %24 {strides = array<i32>} : memref<32x128xf32, #tpu.memory_space<vmem>>, vector<8x128xf32>,
    %c8 = arith.constant 8 : index
    %c0_16 = arith.constant 0 : index
    %27 = vector.load %arg11[%c8, %c0_16] : memref<32x128xf32, #tpu.memory_space<vmem>>, vector<16x128xf32>
    tpu.vector_store %arg11[%c8, %c0_16], %23 {strides = array<i32>} : memref<32x128xf32, #tpu.memory_space<vmem>>, vector<16x128xf32>,
    %28 = tpu.iota {dimensions = array<i32: 0>} : vector<16x1xi32>
    %c4_i32 = arith.constant 4 : i32
    %c0_i32 = arith.constant 0 : i32
    %29 = arith.cmpi eq, %c4_i32, %c0_i32 : i32
    %c1_i32 = arith.constant 1 : i32
    %30 = arith.select %29, %c1_i32, %c4_i32 : i32
    %31 = vector.broadcast %30 : i32 to vector<16x1xi32>
    %32 = arith.remsi %28, %31 : vector<16x1xi32>
    %c0_i32_17 = arith.constant 0 : i32
    %33 = vector.broadcast %c0_i32_17 : i32 to vector<16x1xi32>
    %34 = arith.cmpi ne, %32, %33 : vector<16x1xi32>
    %c0_i32_18 = arith.constant 0 : i32
    %35 = vector.broadcast %c0_i32_18 : i32 to vector<16x1xi32>
    %36 = arith.cmpi slt, %32, %35 : vector<16x1xi32>
    %c0_i32_19 = arith.constant 0 : i32
    %37 = arith.cmpi slt, %30, %c0_i32_19 : i32
    %38 = vector.broadcast %37 : i1 to vector<16x1xi1>
    %39 = vector.broadcast %38 : vector<16x1xi1> to vector<16x1xi1>
    %40 = arith.xori %36, %39 : vector<16x1xi1>
    %41 = arith.andi %40, %34 : vector<16x1xi1>
    %42 = vector.broadcast %30 : i32 to vector<16x1xi32>
    %43 = arith.addi %32, %42 : vector<16x1xi32>
    %44 = arith.select %41, %43, %32 : vector<16x1xi1>, vector<16x1xi32>
    %c1_i32_20 = arith.constant 1 : i32
    %45 = vector.broadcast %c1_i32_20 : i32 to vector<16x1xi32>
    %46 = arith.cmpi sge, %44, %45 : vector<16x1xi32>
    %47 = arith.extui %46 : vector<16x1xi1> to vector<16x1xi32>
    %48 = arith.sitofp %47 : vector<16x1xi32> to vector<16x1xf32>
    %c3_i32 = arith.constant 3 : i32
    %49 = vector.broadcast %c3_i32 : i32 to vector<16x1xi32>
    %50 = arith.cmpi slt, %44, %49 : vector<16x1xi32>
    %51 = arith.extui %50 : vector<16x1xi1> to vector<16x1xi32>
    %52 = arith.sitofp %51 : vector<16x1xi32> to vector<16x1xf32>
    %cst_21 = arith.constant 0.000000e+00 : f32
    %53 = vector.broadcast %cst_21 : f32 to vector<16x128xf32>
    %c3 = arith.constant 3 : index
    %c0_22 = arith.constant 0 : index
    %54 = vector.load %arg11[%c3, %c0_22] : memref<32x128xf32, #tpu.memory_space<vmem>>, vector<16x128xf32>
    %55 = vector.broadcast %48 : vector<16x1xf32> to vector<16x128xf32>
    %56 = arith.mulf %54, %55 : vector<16x128xf32>
    %57 = arith.truncf %56 : vector<16x128xf32> to vector<16x128xbf16>
    %c0_23 = arith.constant 0 : index
    %c0_24 = arith.constant 0 : index
    %c0_25 = arith.constant 0 : index
    %58 = vector.load %arg6[%c0_23, %c0_24, %c0_25] : memref<9x128x128xbf16, #tpu.memory_space<vmem>>, vector<1x128x128xbf16>
    %59 = vector.shape_cast %58 : vector<1x128x128xbf16> to vector<128x128xbf16>
    %cst_26 = arith.constant dense<0.000000e+00> : vector<16x128xf32>
    %60 = tpu.matmul %57, %59, %cst_26 {dimension_numbers = #tpu.dot_dimension_numbers<[1], [0], [0], [1], [0, 0, 1, 1], [], []>} : vector<16x128xbf16>, vector<128x128xbf16>, vector<16x128xf32> -> vector<16x128xf32>
    %61 = arith.addf %53, %60 : vector<16x128xf32>
    %c4 = arith.constant 4 : index
    %c0_27 = arith.constant 0 : index
    %62 = vector.load %arg11[%c4, %c0_27] : memref<32x128xf32, #tpu.memory_space<vmem>>, vector<16x128xf32>
    %63 = arith.truncf %62 : vector<16x128xf32> to vector<16x128xbf16>
    %c1 = arith.constant 1 : index
    %c0_28 = arith.constant 0 : index
    %c0_29 = arith.constant 0 : index
    %64 = vector.load %arg6[%c1, %c0_28, %c0_29] : memref<9x128x128xbf16, #tpu.memory_space<vmem>>, vector<1x128x128xbf16>
    %65 = vector.shape_cast %64 : vector<1x128x128xbf16> to vector<128x128xbf16>
    %cst_30 = arith.constant dense<0.000000e+00> : vector<16x128xf32>
    %66 = tpu.matmul %63, %65, %cst_30 {dimension_numbers = #tpu.dot_dimension_numbers<[1], [0], [0], [1], [0, 0, 1, 1], [], []>} : vector<16x128xbf16>, vector<128x128xbf16>, vector<16x128xf32> -> vector<16x128xf32>
    %67 = arith.addf %61, %66 : vector<16x128xf32>
    %c5 = arith.constant 5 : index
    %c0_31 = arith.constant 0 : index
    %68 = vector.load %arg11[%c5, %c0_31] : memref<32x128xf32, #tpu.memory_space<vmem>>, vector<16x128xf32>
    %69 = vector.broadcast %52 : vector<16x1xf32> to vector<16x128xf32>
    %70 = arith.mulf %68, %69 : vector<16x128xf32>
    %71 = arith.truncf %70 : vector<16x128xf32> to vector<16x128xbf16>
    %c2 = arith.constant 2 : index
    %c0_32 = arith.constant 0 : index
    %c0_33 = arith.constant 0 : index
    %72 = vector.load %arg6[%c2, %c0_32, %c0_33] : memref<9x128x128xbf16, #tpu.memory_space<vmem>>, vector<1x128x128xbf16>
    %73 = vector.shape_cast %72 : vector<1x128x128xbf16> to vector<128x128xbf16>
    %cst_34 = arith.constant dense<0.000000e+00> : vector<16x128xf32>
    %74 = tpu.matmul %71, %73, %cst_34 {dimension_numbers = #tpu.dot_dimension_numbers<[1], [0], [0], [1], [0, 0, 1, 1], [], []>} : vector<16x128xbf16>, vector<128x128xbf16>, vector<16x128xf32> -> vector<16x128xf32>
    %75 = arith.addf %67, %74 : vector<16x128xf32>
    %c7 = arith.constant 7 : index
    %c0_35 = arith.constant 0 : index
    %76 = vector.load %arg11[%c7, %c0_35] : memref<32x128xf32, #tpu.memory_space<vmem>>, vector<16x128xf32>
    %77 = vector.broadcast %48 : vector<16x1xf32> to vector<16x128xf32>
    %78 = arith.mulf %76, %77 : vector<16x128xf32>
    %79 = arith.truncf %78 : vector<16x128xf32> to vector<16x128xbf16>
    %c3_36 = arith.constant 3 : index
    %c0_37 = arith.constant 0 : index
    %c0_38 = arith.constant 0 : index
    %80 = vector.load %arg6[%c3_36, %c0_37, %c0_38] : memref<9x128x128xbf16, #tpu.memory_space<vmem>>, vector<1x128x128xbf16>
    %81 = vector.shape_cast %80 : vector<1x128x128xbf16> to vector<128x128xbf16>
    %cst_39 = arith.constant dense<0.000000e+00> : vector<16x128xf32>
    %82 = tpu.matmul %79, %81, %cst_39 {dimension_numbers = #tpu.dot_dimension_numbers<[1], [0], [0], [1], [0, 0, 1, 1], [], []>} : vector<16x128xbf16>, vector<128x128xbf16>, vector<16x128xf32> -> vector<16x128xf32>
    %83 = arith.addf %75, %82 : vector<16x128xf32>
    %c8_40 = arith.constant 8 : index
    %c0_41 = arith.constant 0 : index
    %84 = vector.load %arg11[%c8_40, %c0_41] : memref<32x128xf32, #tpu.memory_space<vmem>>, vector<16x128xf32>
    %85 = arith.truncf %84 : vector<16x128xf32> to vector<16x128xbf16>
    %c4_42 = arith.constant 4 : index
    %c0_43 = arith.constant 0 : index
    %c0_44 = arith.constant 0 : index
    %86 = vector.load %arg6[%c4_42, %c0_43, %c0_44] : memref<9x128x128xbf16, #tpu.memory_space<vmem>>, vector<1x128x128xbf16>
    %87 = vector.shape_cast %86 : vector<1x128x128xbf16> to vector<128x128xbf16>
    %cst_45 = arith.constant dense<0.000000e+00> : vector<16x128xf32>
    %88 = tpu.matmul %85, %87, %cst_45 {dimension_numbers = #tpu.dot_dimension_numbers<[1], [0], [0], [1], [0, 0, 1, 1], [], []>} : vector<16x128xbf16>, vector<128x128xbf16>, vector<16x128xf32> -> vector<16x128xf32>
    %89 = arith.addf %83, %88 : vector<16x128xf32>
    %c9 = arith.constant 9 : index
    %c0_46 = arith.constant 0 : index
    %90 = vector.load %arg11[%c9, %c0_46] : memref<32x128xf32, #tpu.memory_space<vmem>>, vector<16x128xf32>
    %91 = vector.broadcast %52 : vector<16x1xf32> to vector<16x128xf32>
    %92 = arith.mulf %90, %91 : vector<16x128xf32>
    %93 = arith.truncf %92 : vector<16x128xf32> to vector<16x128xbf16>
    %c5_47 = arith.constant 5 : index
    %c0_48 = arith.constant 0 : index
    %c0_49 = arith.constant 0 : index
    %94 = vector.load %arg6[%c5_47, %c0_48, %c0_49] : memref<9x128x128xbf16, #tpu.memory_space<vmem>>, vector<1x128x128xbf16>
    %95 = vector.shape_cast %94 : vector<1x128x128xbf16> to vector<128x128xbf16>
    %cst_50 = arith.constant dense<0.000000e+00> : vector<16x128xf32>
    %96 = tpu.matmul %93, %95, %cst_50 {dimension_numbers = #tpu.dot_dimension_numbers<[1], [0], [0], [1], [0, 0, 1, 1], [], []>} : vector<16x128xbf16>, vector<128x128xbf16>, vector<16x128xf32> -> vector<16x128xf32>
    %97 = arith.addf %89, %96 : vector<16x128xf32>
    %c11 = arith.constant 11 : index
    %c0_51 = arith.constant 0 : index
    %98 = vector.load %arg11[%c11, %c0_51] : memref<32x128xf32, #tpu.memory_space<vmem>>, vector<16x128xf32>
    %99 = vector.broadcast %48 : vector<16x1xf32> to vector<16x128xf32>
    %100 = arith.mulf %98, %99 : vector<16x128xf32>
    %101 = arith.truncf %100 : vector<16x128xf32> to vector<16x128xbf16>
    %c6 = arith.constant 6 : index
    %c0_52 = arith.constant 0 : index
    %c0_53 = arith.constant 0 : index
    %102 = vector.load %arg6[%c6, %c0_52, %c0_53] : memref<9x128x128xbf16, #tpu.memory_space<vmem>>, vector<1x128x128xbf16>
    %103 = vector.shape_cast %102 : vector<1x128x128xbf16> to vector<128x128xbf16>
    %cst_54 = arith.constant dense<0.000000e+00> : vector<16x128xf32>
    %104 = tpu.matmul %101, %103, %cst_54 {dimension_numbers = #tpu.dot_dimension_numbers<[1], [0], [0], [1], [0, 0, 1, 1], [], []>} : vector<16x128xbf16>, vector<128x128xbf16>, vector<16x128xf32> -> vector<16x128xf32>
    %105 = arith.addf %97, %104 : vector<16x128xf32>
    %c12 = arith.constant 12 : index
    %c0_55 = arith.constant 0 : index
    %106 = vector.load %arg11[%c12, %c0_55] : memref<32x128xf32, #tpu.memory_space<vmem>>, vector<16x128xf32>
    %107 = arith.truncf %106 : vector<16x128xf32> to vector<16x128xbf16>
    %c7_56 = arith.constant 7 : index
    %c0_57 = arith.constant 0 : index
    %c0_58 = arith.constant 0 : index
    %108 = vector.load %arg6[%c7_56, %c0_57, %c0_58] : memref<9x128x128xbf16, #tpu.memory_space<vmem>>, vector<1x128x128xbf16>
    %109 = vector.shape_cast %108 : vector<1x128x128xbf16> to vector<128x128xbf16>
    %cst_59 = arith.constant dense<0.000000e+00> : vector<16x128xf32>
    %110 = tpu.matmul %107, %109, %cst_59 {dimension_numbers = #tpu.dot_dimension_numbers<[1], [0], [0], [1], [0, 0, 1, 1], [], []>} : vector<16x128xbf16>, vector<128x128xbf16>, vector<16x128xf32> -> vector<16x128xf32>
    %111 = arith.addf %105, %110 : vector<16x128xf32>
    %c13 = arith.constant 13 : index
    %c0_60 = arith.constant 0 : index
    %112 = vector.load %arg11[%c13, %c0_60] : memref<32x128xf32, #tpu.memory_space<vmem>>, vector<16x128xf32>
    %113 = vector.broadcast %52 : vector<16x1xf32> to vector<16x128xf32>
    %114 = arith.mulf %112, %113 : vector<16x128xf32>
    %115 = arith.truncf %114 : vector<16x128xf32> to vector<16x128xbf16>
    %c8_61 = arith.constant 8 : index
    %c0_62 = arith.constant 0 : index
    %c0_63 = arith.constant 0 : index
    %116 = vector.load %arg6[%c8_61, %c0_62, %c0_63] : memref<9x128x128xbf16, #tpu.memory_space<vmem>>, vector<1x128x128xbf16>
    %117 = vector.shape_cast %116 : vector<1x128x128xbf16> to vector<128x128xbf16>
    %cst_64 = arith.constant dense<0.000000e+00> : vector<16x128xf32>
    %118 = tpu.matmul %115, %117, %cst_64 {dimension_numbers = #tpu.dot_dimension_numbers<[1], [0], [0], [1], [0, 0, 1, 1], [], []>} : vector<16x128xbf16>, vector<128x128xbf16>, vector<16x128xf32> -> vector<16x128xf32>
    %119 = arith.addf %111, %118 : vector<16x128xf32>
    %c0_65 = arith.constant 0 : index
    %c0_66 = arith.constant 0 : index
    %120 = vector.load %arg7[%c0_65, %c0_66] : memref<1x128xf32, #tpu.memory_space<vmem>>, vector<1x128xf32>
    %121 = vector.shape_cast %120 : vector<1x128xf32> to vector<128xf32>
    %122 = vector.shape_cast %121 : vector<128xf32> to vector<1x128xf32>
    %123 = vector.broadcast %122 : vector<1x128xf32> to vector<16x128xf32>
    %124 = arith.addf %119, %123 : vector<16x128xf32>
    %cst_67 = arith.constant 0.000000e+00 : f32
    %125 = vector.broadcast %cst_67 : f32 to vector<16x128xf32>
    %126 = arith.maximumf %124, %125 : vector<16x128xf32>
    %127 = arith.truncf %126 : vector<16x128xf32> to vector<16x128xbf16>
    %c0_68 = arith.constant 0 : index
    %c0_69 = arith.constant 0 : index
    %128 = vector.load %arg8[%c0_68, %c0_69] : memref<128x128xbf16, #tpu.memory_space<vmem>>, vector<128x128xbf16>
    %cst_70 = arith.constant dense<0.000000e+00> : vector<16x128xf32>
    %129 = tpu.matmul %127, %128, %cst_70 {dimension_numbers = #tpu.dot_dimension_numbers<[1], [0], [0], [1], [0, 0, 1, 1], [], []>} : vector<16x128xbf16>, vector<128x128xbf16>, vector<16x128xf32> -> vector<16x128xf32>
    %c0_71 = arith.constant 0 : index
    %c0_72 = arith.constant 0 : index
    %130 = vector.load %arg9[%c0_71, %c0_72] : memref<1x128xf32, #tpu.memory_space<vmem>>, vector<1x128xf32>
    %131 = vector.shape_cast %130 : vector<1x128xf32> to vector<128xf32>
    %132 = vector.shape_cast %131 : vector<128xf32> to vector<1x128xf32>
    %133 = vector.broadcast %132 : vector<1x128xf32> to vector<16x128xf32>
    %134 = arith.addf %129, %133 : vector<16x128xf32>
    %135 = arith.addf %134, %1 : vector<16x128xf32>
    %c0_73 = arith.constant 0 : index
    %c0_74 = arith.constant 0 : index
    %c0_75 = arith.constant 0 : index
    %136 = vector.load %arg10[%c0_73, %c0_74, %c0_75] : memref<1x16x128xf32, #tpu.memory_space<vmem>>, vector<1x16x128xf32>
    %137 = vector.shape_cast %136 : vector<1x16x128xf32> to vector<16x128xf32>
    %138 = vector.shape_cast %135 : vector<16x128xf32> to vector<1x16x128xf32>
    tpu.vector_store %arg10[%c0_73, %c0_74, %c0_75], %138 {strides = array<i32>} : memref<1x16x128xf32, #tpu.memory_space<vmem>>, vector<1x16x128xf32>,
    return
  }
  func.func @transform_0(%arg0: i32) -> (i32, i32, i32) {
    %c0_i32 = arith.constant 0 : i32
    %c0_i32_0 = arith.constant 0 : i32
    %c0_i32_1 = arith.constant 0 : i32
    return %arg0, %c0_i32, %c0_i32_0 : i32, i32, i32
  }
  func.func @transform_1(%arg0: i32) -> (i32, i32) {
    %c0_i32 = arith.constant 0 : i32
    %c0_i32_0 = arith.constant 0 : i32
    %c0_i32_1 = arith.constant 0 : i32
    return %c0_i32, %c0_i32_0 : i32, i32
  }
  func.func @transform_2(%arg0: i32) -> (i32, i32) {
    %c0_i32 = arith.constant 0 : i32
    %c0_i32_0 = arith.constant 0 : i32
    %c0_i32_1 = arith.constant 0 : i32
    return %c0_i32, %c0_i32_0 : i32, i32
  }
  func.func @transform_3(%arg0: i32) -> (i32, i32) {
    %c0_i32 = arith.constant 0 : i32
    %c0_i32_0 = arith.constant 0 : i32
    %c0_i32_1 = arith.constant 0 : i32
    return %c0_i32, %c0_i32_0 : i32, i32
  }
  func.func @transform_4(%arg0: i32) -> (i32, i32) {
    %c0_i32 = arith.constant 0 : i32
    %c0_i32_0 = arith.constant 0 : i32
    %c0_i32_1 = arith.constant 0 : i32
    return %c0_i32, %c0_i32_0 : i32, i32
  }
  func.func @transform_5(%arg0: i32) -> (i32, i32, i32) {
    %c0_i32 = arith.constant 0 : i32
    %c0_i32_0 = arith.constant 0 : i32
    %c0_i32_1 = arith.constant 0 : i32
    %c0_i32_2 = arith.constant 0 : i32
    return %c0_i32, %c0_i32_0, %c0_i32_1 : i32, i32, i32
  }
  func.func @transform_6(%arg0: i32) -> (i32, i32) {
    %c0_i32 = arith.constant 0 : i32
    %c0_i32_0 = arith.constant 0 : i32
    %c0_i32_1 = arith.constant 0 : i32
    return %c0_i32, %c0_i32_0 : i32, i32
  }
  func.func @transform_7(%arg0: i32) -> (i32, i32) {
    %c0_i32 = arith.constant 0 : i32
    %c0_i32_0 = arith.constant 0 : i32
    %c0_i32_1 = arith.constant 0 : i32
    return %c0_i32, %c0_i32_0 : i32, i32
  }
  func.func @transform_8(%arg0: i32) -> (i32, i32) {
    %c0_i32 = arith.constant 0 : i32
    %c0_i32_0 = arith.constant 0 : i32
    %c0_i32_1 = arith.constant 0 : i32
    return %c0_i32, %c0_i32_0 : i32, i32
  }
  func.func @transform_9(%arg0: i32) -> (i32, i32, i32) {
    %c0_i32 = arith.constant 0 : i32
    %c0_i32_0 = arith.constant 0 : i32
    %c0_i32_1 = arith.constant 0 : i32
    return %arg0, %c0_i32, %c0_i32_0 : i32, i32, i32
  }
}

module attributes {stable_mosaic.version = 11 : i64} {
  func.func @_bottleneck_kernel(%arg0: i32, %arg1: memref<1x256x128xf32, #tpu.memory_space<vmem>>, %arg2: memref<1x128xf32, #tpu.memory_space<vmem>>, %arg3: memref<1x128xf32, #tpu.memory_space<vmem>>, %arg4: memref<128x128xbf16, #tpu.memory_space<vmem>>, %arg5: memref<1x128xf32, #tpu.memory_space<vmem>>, %arg6: memref<9x128x128xbf16, #tpu.memory_space<vmem>>, %arg7: memref<1x128xf32, #tpu.memory_space<vmem>>, %arg8: memref<128x128xbf16, #tpu.memory_space<vmem>>, %arg9: memref<1x128xf32, #tpu.memory_space<vmem>>, %arg10: memref<1x256x128xf32, #tpu.memory_space<vmem>>, %arg11: memref<320x128xf32, #tpu.memory_space<vmem>>) attributes {dimension_semantics = [#tpu.dimension_semantics<parallel>], iteration_bounds = array<i64: 2>, scalar_prefetch = 0 : i64, scratch_operands = 1 : i64, tpu.core_type = #tpu.core_type<tc>, window_params = [{transform_indices = @transform_0, window_bounds = array<i64: 1, 256, 128>}, {pipeline_mode = #tpu.pipeline_mode<synchronous>, transform_indices = @transform_1, window_bounds = array<i64: 1, 128>}, {pipeline_mode = #tpu.pipeline_mode<synchronous>, transform_indices = @transform_2, window_bounds = array<i64: 1, 128>}, {pipeline_mode = #tpu.pipeline_mode<synchronous>, transform_indices = @transform_3, window_bounds = array<i64: 128, 128>}, {pipeline_mode = #tpu.pipeline_mode<synchronous>, transform_indices = @transform_4, window_bounds = array<i64: 1, 128>}, {pipeline_mode = #tpu.pipeline_mode<synchronous>, transform_indices = @transform_5, window_bounds = array<i64: 9, 128, 128>}, {pipeline_mode = #tpu.pipeline_mode<synchronous>, transform_indices = @transform_6, window_bounds = array<i64: 1, 128>}, {pipeline_mode = #tpu.pipeline_mode<synchronous>, transform_indices = @transform_7, window_bounds = array<i64: 128, 128>}, {pipeline_mode = #tpu.pipeline_mode<synchronous>, transform_indices = @transform_8, window_bounds = array<i64: 1, 128>}, {transform_indices = @transform_9, window_bounds = array<i64: 1, 256, 128>}]} {
    %c0 = arith.constant 0 : index
    %c0_0 = arith.constant 0 : index
    %c0_1 = arith.constant 0 : index
    %0 = vector.load %arg1[%c0, %c0_0, %c0_1] : memref<1x256x128xf32, #tpu.memory_space<vmem>>, vector<1x256x128xf32>
    %1 = vector.shape_cast %0 : vector<1x256x128xf32> to vector<256x128xf32>
    %c0_2 = arith.constant 0 : index
    %c0_3 = arith.constant 0 : index
    %2 = vector.load %arg2[%c0_2, %c0_3] : memref<1x128xf32, #tpu.memory_space<vmem>>, vector<1x128xf32>
    %3 = vector.shape_cast %2 : vector<1x128xf32> to vector<128xf32>
    %4 = vector.shape_cast %3 : vector<128xf32> to vector<1x128xf32>
    %5 = vector.broadcast %4 : vector<1x128xf32> to vector<256x128xf32>
    %6 = arith.mulf %1, %5 : vector<256x128xf32>
    %c0_4 = arith.constant 0 : index
    %c0_5 = arith.constant 0 : index
    %7 = vector.load %arg3[%c0_4, %c0_5] : memref<1x128xf32, #tpu.memory_space<vmem>>, vector<1x128xf32>
    %8 = vector.shape_cast %7 : vector<1x128xf32> to vector<128xf32>
    %9 = vector.shape_cast %8 : vector<128xf32> to vector<1x128xf32>
    %10 = vector.broadcast %9 : vector<1x128xf32> to vector<256x128xf32>
    %11 = arith.addf %6, %10 : vector<256x128xf32>
    %cst = arith.constant 0.000000e+00 : f32
    %12 = vector.broadcast %cst : f32 to vector<256x128xf32>
    %13 = arith.maximumf %11, %12 : vector<256x128xf32>
    %14 = arith.truncf %13 : vector<256x128xf32> to vector<256x128xbf16>
    %c0_6 = arith.constant 0 : index
    %c0_7 = arith.constant 0 : index
    %15 = vector.load %arg4[%c0_6, %c0_7] : memref<128x128xbf16, #tpu.memory_space<vmem>>, vector<128x128xbf16>
    %cst_8 = arith.constant dense<0.000000e+00> : vector<256x128xf32>
    %16 = tpu.matmul %14, %15, %cst_8 {dimension_numbers = #tpu.dot_dimension_numbers<[1], [0], [0], [1], [0, 0, 1, 1], [], []>} : vector<256x128xbf16>, vector<128x128xbf16>, vector<256x128xf32> -> vector<256x128xf32>
    %c0_9 = arith.constant 0 : index
    %c0_10 = arith.constant 0 : index
    %17 = vector.load %arg5[%c0_9, %c0_10] : memref<1x128xf32, #tpu.memory_space<vmem>>, vector<1x128xf32>
    %18 = vector.shape_cast %17 : vector<1x128xf32> to vector<128xf32>
    %19 = vector.shape_cast %18 : vector<128xf32> to vector<1x128xf32>
    %20 = vector.broadcast %19 : vector<1x128xf32> to vector<256x128xf32>
    %21 = arith.addf %16, %20 : vector<256x128xf32>
    %cst_11 = arith.constant 0.000000e+00 : f32
    %22 = vector.broadcast %cst_11 : f32 to vector<256x128xf32>
    %23 = arith.maximumf %21, %22 : vector<256x128xf32>
    %cst_12 = arith.constant 0.000000e+00 : f32
    %24 = vector.broadcast %cst_12 : f32 to vector<32x128xf32>
    %c0_13 = arith.constant 0 : index
    %c0_14 = arith.constant 0 : index
    %25 = vector.load %arg11[%c0_13, %c0_14] : memref<320x128xf32, #tpu.memory_space<vmem>>, vector<32x128xf32>
    tpu.vector_store %arg11[%c0_13, %c0_14], %24 {strides = array<i32>} : memref<320x128xf32, #tpu.memory_space<vmem>>, vector<32x128xf32>,
    %c288 = arith.constant 288 : index
    %c0_15 = arith.constant 0 : index
    %26 = vector.load %arg11[%c288, %c0_15] : memref<320x128xf32, #tpu.memory_space<vmem>>, vector<32x128xf32>
    tpu.vector_store %arg11[%c288, %c0_15], %24 {strides = array<i32>} : memref<320x128xf32, #tpu.memory_space<vmem>>, vector<32x128xf32>,
    %c32 = arith.constant 32 : index
    %c0_16 = arith.constant 0 : index
    %27 = vector.load %arg11[%c32, %c0_16] : memref<320x128xf32, #tpu.memory_space<vmem>>, vector<256x128xf32>
    tpu.vector_store %arg11[%c32, %c0_16], %23 {strides = array<i32>} : memref<320x128xf32, #tpu.memory_space<vmem>>, vector<256x128xf32>,
    %28 = tpu.iota {dimensions = array<i32: 0>} : vector<256x1xi32>
    %c16_i32 = arith.constant 16 : i32
    %c0_i32 = arith.constant 0 : i32
    %29 = arith.cmpi eq, %c16_i32, %c0_i32 : i32
    %c1_i32 = arith.constant 1 : i32
    %30 = arith.select %29, %c1_i32, %c16_i32 : i32
    %31 = vector.broadcast %30 : i32 to vector<256x1xi32>
    %32 = arith.remsi %28, %31 : vector<256x1xi32>
    %c0_i32_17 = arith.constant 0 : i32
    %33 = vector.broadcast %c0_i32_17 : i32 to vector<256x1xi32>
    %34 = arith.cmpi ne, %32, %33 : vector<256x1xi32>
    %c0_i32_18 = arith.constant 0 : i32
    %35 = vector.broadcast %c0_i32_18 : i32 to vector<256x1xi32>
    %36 = arith.cmpi slt, %32, %35 : vector<256x1xi32>
    %c0_i32_19 = arith.constant 0 : i32
    %37 = arith.cmpi slt, %30, %c0_i32_19 : i32
    %38 = vector.broadcast %37 : i1 to vector<256x1xi1>
    %39 = vector.broadcast %38 : vector<256x1xi1> to vector<256x1xi1>
    %40 = arith.xori %36, %39 : vector<256x1xi1>
    %41 = arith.andi %40, %34 : vector<256x1xi1>
    %42 = vector.broadcast %30 : i32 to vector<256x1xi32>
    %43 = arith.addi %32, %42 : vector<256x1xi32>
    %44 = arith.select %41, %43, %32 : vector<256x1xi1>, vector<256x1xi32>
    %c1_i32_20 = arith.constant 1 : i32
    %45 = vector.broadcast %c1_i32_20 : i32 to vector<256x1xi32>
    %46 = arith.cmpi sge, %44, %45 : vector<256x1xi32>
    %47 = arith.extui %46 : vector<256x1xi1> to vector<256x1xi32>
    %48 = arith.sitofp %47 : vector<256x1xi32> to vector<256x1xf32>
    %c15_i32 = arith.constant 15 : i32
    %49 = vector.broadcast %c15_i32 : i32 to vector<256x1xi32>
    %50 = arith.cmpi slt, %44, %49 : vector<256x1xi32>
    %51 = arith.extui %50 : vector<256x1xi1> to vector<256x1xi32>
    %52 = arith.sitofp %51 : vector<256x1xi32> to vector<256x1xf32>
    %cst_21 = arith.constant 0.000000e+00 : f32
    %53 = vector.broadcast %cst_21 : f32 to vector<256x128xf32>
    %c15 = arith.constant 15 : index
    %c0_22 = arith.constant 0 : index
    %54 = vector.load %arg11[%c15, %c0_22] : memref<320x128xf32, #tpu.memory_space<vmem>>, vector<256x128xf32>
    %55 = vector.broadcast %48 : vector<256x1xf32> to vector<256x128xf32>
    %56 = arith.mulf %54, %55 : vector<256x128xf32>
    %57 = arith.truncf %56 : vector<256x128xf32> to vector<256x128xbf16>
    %c0_23 = arith.constant 0 : index
    %c0_24 = arith.constant 0 : index
    %c0_25 = arith.constant 0 : index
    %58 = vector.load %arg6[%c0_23, %c0_24, %c0_25] : memref<9x128x128xbf16, #tpu.memory_space<vmem>>, vector<1x128x128xbf16>
    %59 = vector.shape_cast %58 : vector<1x128x128xbf16> to vector<128x128xbf16>
    %cst_26 = arith.constant dense<0.000000e+00> : vector<256x128xf32>
    %60 = tpu.matmul %57, %59, %cst_26 {dimension_numbers = #tpu.dot_dimension_numbers<[1], [0], [0], [1], [0, 0, 1, 1], [], []>} : vector<256x128xbf16>, vector<128x128xbf16>, vector<256x128xf32> -> vector<256x128xf32>
    %61 = arith.addf %53, %60 : vector<256x128xf32>
    %c16 = arith.constant 16 : index
    %c0_27 = arith.constant 0 : index
    %62 = vector.load %arg11[%c16, %c0_27] : memref<320x128xf32, #tpu.memory_space<vmem>>, vector<256x128xf32>
    %63 = arith.truncf %62 : vector<256x128xf32> to vector<256x128xbf16>
    %c1 = arith.constant 1 : index
    %c0_28 = arith.constant 0 : index
    %c0_29 = arith.constant 0 : index
    %64 = vector.load %arg6[%c1, %c0_28, %c0_29] : memref<9x128x128xbf16, #tpu.memory_space<vmem>>, vector<1x128x128xbf16>
    %65 = vector.shape_cast %64 : vector<1x128x128xbf16> to vector<128x128xbf16>
    %cst_30 = arith.constant dense<0.000000e+00> : vector<256x128xf32>
    %66 = tpu.matmul %63, %65, %cst_30 {dimension_numbers = #tpu.dot_dimension_numbers<[1], [0], [0], [1], [0, 0, 1, 1], [], []>} : vector<256x128xbf16>, vector<128x128xbf16>, vector<256x128xf32> -> vector<256x128xf32>
    %67 = arith.addf %61, %66 : vector<256x128xf32>
    %c17 = arith.constant 17 : index
    %c0_31 = arith.constant 0 : index
    %68 = vector.load %arg11[%c17, %c0_31] : memref<320x128xf32, #tpu.memory_space<vmem>>, vector<256x128xf32>
    %69 = vector.broadcast %52 : vector<256x1xf32> to vector<256x128xf32>
    %70 = arith.mulf %68, %69 : vector<256x128xf32>
    %71 = arith.truncf %70 : vector<256x128xf32> to vector<256x128xbf16>
    %c2 = arith.constant 2 : index
    %c0_32 = arith.constant 0 : index
    %c0_33 = arith.constant 0 : index
    %72 = vector.load %arg6[%c2, %c0_32, %c0_33] : memref<9x128x128xbf16, #tpu.memory_space<vmem>>, vector<1x128x128xbf16>
    %73 = vector.shape_cast %72 : vector<1x128x128xbf16> to vector<128x128xbf16>
    %cst_34 = arith.constant dense<0.000000e+00> : vector<256x128xf32>
    %74 = tpu.matmul %71, %73, %cst_34 {dimension_numbers = #tpu.dot_dimension_numbers<[1], [0], [0], [1], [0, 0, 1, 1], [], []>} : vector<256x128xbf16>, vector<128x128xbf16>, vector<256x128xf32> -> vector<256x128xf32>
    %75 = arith.addf %67, %74 : vector<256x128xf32>
    %c31 = arith.constant 31 : index
    %c0_35 = arith.constant 0 : index
    %76 = vector.load %arg11[%c31, %c0_35] : memref<320x128xf32, #tpu.memory_space<vmem>>, vector<256x128xf32>
    %77 = vector.broadcast %48 : vector<256x1xf32> to vector<256x128xf32>
    %78 = arith.mulf %76, %77 : vector<256x128xf32>
    %79 = arith.truncf %78 : vector<256x128xf32> to vector<256x128xbf16>
    %c3 = arith.constant 3 : index
    %c0_36 = arith.constant 0 : index
    %c0_37 = arith.constant 0 : index
    %80 = vector.load %arg6[%c3, %c0_36, %c0_37] : memref<9x128x128xbf16, #tpu.memory_space<vmem>>, vector<1x128x128xbf16>
    %81 = vector.shape_cast %80 : vector<1x128x128xbf16> to vector<128x128xbf16>
    %cst_38 = arith.constant dense<0.000000e+00> : vector<256x128xf32>
    %82 = tpu.matmul %79, %81, %cst_38 {dimension_numbers = #tpu.dot_dimension_numbers<[1], [0], [0], [1], [0, 0, 1, 1], [], []>} : vector<256x128xbf16>, vector<128x128xbf16>, vector<256x128xf32> -> vector<256x128xf32>
    %83 = arith.addf %75, %82 : vector<256x128xf32>
    %c32_39 = arith.constant 32 : index
    %c0_40 = arith.constant 0 : index
    %84 = vector.load %arg11[%c32_39, %c0_40] : memref<320x128xf32, #tpu.memory_space<vmem>>, vector<256x128xf32>
    %85 = arith.truncf %84 : vector<256x128xf32> to vector<256x128xbf16>
    %c4 = arith.constant 4 : index
    %c0_41 = arith.constant 0 : index
    %c0_42 = arith.constant 0 : index
    %86 = vector.load %arg6[%c4, %c0_41, %c0_42] : memref<9x128x128xbf16, #tpu.memory_space<vmem>>, vector<1x128x128xbf16>
    %87 = vector.shape_cast %86 : vector<1x128x128xbf16> to vector<128x128xbf16>
    %cst_43 = arith.constant dense<0.000000e+00> : vector<256x128xf32>
    %88 = tpu.matmul %85, %87, %cst_43 {dimension_numbers = #tpu.dot_dimension_numbers<[1], [0], [0], [1], [0, 0, 1, 1], [], []>} : vector<256x128xbf16>, vector<128x128xbf16>, vector<256x128xf32> -> vector<256x128xf32>
    %89 = arith.addf %83, %88 : vector<256x128xf32>
    %c33 = arith.constant 33 : index
    %c0_44 = arith.constant 0 : index
    %90 = vector.load %arg11[%c33, %c0_44] : memref<320x128xf32, #tpu.memory_space<vmem>>, vector<256x128xf32>
    %91 = vector.broadcast %52 : vector<256x1xf32> to vector<256x128xf32>
    %92 = arith.mulf %90, %91 : vector<256x128xf32>
    %93 = arith.truncf %92 : vector<256x128xf32> to vector<256x128xbf16>
    %c5 = arith.constant 5 : index
    %c0_45 = arith.constant 0 : index
    %c0_46 = arith.constant 0 : index
    %94 = vector.load %arg6[%c5, %c0_45, %c0_46] : memref<9x128x128xbf16, #tpu.memory_space<vmem>>, vector<1x128x128xbf16>
    %95 = vector.shape_cast %94 : vector<1x128x128xbf16> to vector<128x128xbf16>
    %cst_47 = arith.constant dense<0.000000e+00> : vector<256x128xf32>
    %96 = tpu.matmul %93, %95, %cst_47 {dimension_numbers = #tpu.dot_dimension_numbers<[1], [0], [0], [1], [0, 0, 1, 1], [], []>} : vector<256x128xbf16>, vector<128x128xbf16>, vector<256x128xf32> -> vector<256x128xf32>
    %97 = arith.addf %89, %96 : vector<256x128xf32>
    %c47 = arith.constant 47 : index
    %c0_48 = arith.constant 0 : index
    %98 = vector.load %arg11[%c47, %c0_48] : memref<320x128xf32, #tpu.memory_space<vmem>>, vector<256x128xf32>
    %99 = vector.broadcast %48 : vector<256x1xf32> to vector<256x128xf32>
    %100 = arith.mulf %98, %99 : vector<256x128xf32>
    %101 = arith.truncf %100 : vector<256x128xf32> to vector<256x128xbf16>
    %c6 = arith.constant 6 : index
    %c0_49 = arith.constant 0 : index
    %c0_50 = arith.constant 0 : index
    %102 = vector.load %arg6[%c6, %c0_49, %c0_50] : memref<9x128x128xbf16, #tpu.memory_space<vmem>>, vector<1x128x128xbf16>
    %103 = vector.shape_cast %102 : vector<1x128x128xbf16> to vector<128x128xbf16>
    %cst_51 = arith.constant dense<0.000000e+00> : vector<256x128xf32>
    %104 = tpu.matmul %101, %103, %cst_51 {dimension_numbers = #tpu.dot_dimension_numbers<[1], [0], [0], [1], [0, 0, 1, 1], [], []>} : vector<256x128xbf16>, vector<128x128xbf16>, vector<256x128xf32> -> vector<256x128xf32>
    %105 = arith.addf %97, %104 : vector<256x128xf32>
    %c48 = arith.constant 48 : index
    %c0_52 = arith.constant 0 : index
    %106 = vector.load %arg11[%c48, %c0_52] : memref<320x128xf32, #tpu.memory_space<vmem>>, vector<256x128xf32>
    %107 = arith.truncf %106 : vector<256x128xf32> to vector<256x128xbf16>
    %c7 = arith.constant 7 : index
    %c0_53 = arith.constant 0 : index
    %c0_54 = arith.constant 0 : index
    %108 = vector.load %arg6[%c7, %c0_53, %c0_54] : memref<9x128x128xbf16, #tpu.memory_space<vmem>>, vector<1x128x128xbf16>
    %109 = vector.shape_cast %108 : vector<1x128x128xbf16> to vector<128x128xbf16>
    %cst_55 = arith.constant dense<0.000000e+00> : vector<256x128xf32>
    %110 = tpu.matmul %107, %109, %cst_55 {dimension_numbers = #tpu.dot_dimension_numbers<[1], [0], [0], [1], [0, 0, 1, 1], [], []>} : vector<256x128xbf16>, vector<128x128xbf16>, vector<256x128xf32> -> vector<256x128xf32>
    %111 = arith.addf %105, %110 : vector<256x128xf32>
    %c49 = arith.constant 49 : index
    %c0_56 = arith.constant 0 : index
    %112 = vector.load %arg11[%c49, %c0_56] : memref<320x128xf32, #tpu.memory_space<vmem>>, vector<256x128xf32>
    %113 = vector.broadcast %52 : vector<256x1xf32> to vector<256x128xf32>
    %114 = arith.mulf %112, %113 : vector<256x128xf32>
    %115 = arith.truncf %114 : vector<256x128xf32> to vector<256x128xbf16>
    %c8 = arith.constant 8 : index
    %c0_57 = arith.constant 0 : index
    %c0_58 = arith.constant 0 : index
    %116 = vector.load %arg6[%c8, %c0_57, %c0_58] : memref<9x128x128xbf16, #tpu.memory_space<vmem>>, vector<1x128x128xbf16>
    %117 = vector.shape_cast %116 : vector<1x128x128xbf16> to vector<128x128xbf16>
    %cst_59 = arith.constant dense<0.000000e+00> : vector<256x128xf32>
    %118 = tpu.matmul %115, %117, %cst_59 {dimension_numbers = #tpu.dot_dimension_numbers<[1], [0], [0], [1], [0, 0, 1, 1], [], []>} : vector<256x128xbf16>, vector<128x128xbf16>, vector<256x128xf32> -> vector<256x128xf32>
    %119 = arith.addf %111, %118 : vector<256x128xf32>
    %c0_60 = arith.constant 0 : index
    %c0_61 = arith.constant 0 : index
    %120 = vector.load %arg7[%c0_60, %c0_61] : memref<1x128xf32, #tpu.memory_space<vmem>>, vector<1x128xf32>
    %121 = vector.shape_cast %120 : vector<1x128xf32> to vector<128xf32>
    %122 = vector.shape_cast %121 : vector<128xf32> to vector<1x128xf32>
    %123 = vector.broadcast %122 : vector<1x128xf32> to vector<256x128xf32>
    %124 = arith.addf %119, %123 : vector<256x128xf32>
    %cst_62 = arith.constant 0.000000e+00 : f32
    %125 = vector.broadcast %cst_62 : f32 to vector<256x128xf32>
    %126 = arith.maximumf %124, %125 : vector<256x128xf32>
    %127 = arith.truncf %126 : vector<256x128xf32> to vector<256x128xbf16>
    %c0_63 = arith.constant 0 : index
    %c0_64 = arith.constant 0 : index
    %128 = vector.load %arg8[%c0_63, %c0_64] : memref<128x128xbf16, #tpu.memory_space<vmem>>, vector<128x128xbf16>
    %cst_65 = arith.constant dense<0.000000e+00> : vector<256x128xf32>
    %129 = tpu.matmul %127, %128, %cst_65 {dimension_numbers = #tpu.dot_dimension_numbers<[1], [0], [0], [1], [0, 0, 1, 1], [], []>} : vector<256x128xbf16>, vector<128x128xbf16>, vector<256x128xf32> -> vector<256x128xf32>
    %c0_66 = arith.constant 0 : index
    %c0_67 = arith.constant 0 : index
    %130 = vector.load %arg9[%c0_66, %c0_67] : memref<1x128xf32, #tpu.memory_space<vmem>>, vector<1x128xf32>
    %131 = vector.shape_cast %130 : vector<1x128xf32> to vector<128xf32>
    %132 = vector.shape_cast %131 : vector<128xf32> to vector<1x128xf32>
    %133 = vector.broadcast %132 : vector<1x128xf32> to vector<256x128xf32>
    %134 = arith.addf %129, %133 : vector<256x128xf32>
    %135 = arith.addf %134, %1 : vector<256x128xf32>
    %c0_68 = arith.constant 0 : index
    %c0_69 = arith.constant 0 : index
    %c0_70 = arith.constant 0 : index
    %136 = vector.load %arg10[%c0_68, %c0_69, %c0_70] : memref<1x256x128xf32, #tpu.memory_space<vmem>>, vector<1x256x128xf32>
    %137 = vector.shape_cast %136 : vector<1x256x128xf32> to vector<256x128xf32>
    %138 = vector.shape_cast %135 : vector<256x128xf32> to vector<1x256x128xf32>
    tpu.vector_store %arg10[%c0_68, %c0_69, %c0_70], %138 {strides = array<i32>} : memref<1x256x128xf32, #tpu.memory_space<vmem>>, vector<1x256x128xf32>,
    return
  }
  func.func @transform_0(%arg0: i32) -> (i32, i32, i32) {
    %c0_i32 = arith.constant 0 : i32
    %c0_i32_0 = arith.constant 0 : i32
    %c0_i32_1 = arith.constant 0 : i32
    return %arg0, %c0_i32, %c0_i32_0 : i32, i32, i32
  }
  func.func @transform_1(%arg0: i32) -> (i32, i32) {
    %c0_i32 = arith.constant 0 : i32
    %c0_i32_0 = arith.constant 0 : i32
    %c0_i32_1 = arith.constant 0 : i32
    return %c0_i32, %c0_i32_0 : i32, i32
  }
  func.func @transform_2(%arg0: i32) -> (i32, i32) {
    %c0_i32 = arith.constant 0 : i32
    %c0_i32_0 = arith.constant 0 : i32
    %c0_i32_1 = arith.constant 0 : i32
    return %c0_i32, %c0_i32_0 : i32, i32
  }
  func.func @transform_3(%arg0: i32) -> (i32, i32) {
    %c0_i32 = arith.constant 0 : i32
    %c0_i32_0 = arith.constant 0 : i32
    %c0_i32_1 = arith.constant 0 : i32
    return %c0_i32, %c0_i32_0 : i32, i32
  }
  func.func @transform_4(%arg0: i32) -> (i32, i32) {
    %c0_i32 = arith.constant 0 : i32
    %c0_i32_0 = arith.constant 0 : i32
    %c0_i32_1 = arith.constant 0 : i32
    return %c0_i32, %c0_i32_0 : i32, i32
  }
  func.func @transform_5(%arg0: i32) -> (i32, i32, i32) {
    %c0_i32 = arith.constant 0 : i32
    %c0_i32_0 = arith.constant 0 : i32
    %c0_i32_1 = arith.constant 0 : i32
    %c0_i32_2 = arith.constant 0 : i32
    return %c0_i32, %c0_i32_0, %c0_i32_1 : i32, i32, i32
  }
  func.func @transform_6(%arg0: i32) -> (i32, i32) {
    %c0_i32 = arith.constant 0 : i32
    %c0_i32_0 = arith.constant 0 : i32
    %c0_i32_1 = arith.constant 0 : i32
    return %c0_i32, %c0_i32_0 : i32, i32
  }
  func.func @transform_7(%arg0: i32) -> (i32, i32) {
    %c0_i32 = arith.constant 0 : i32
    %c0_i32_0 = arith.constant 0 : i32
    %c0_i32_1 = arith.constant 0 : i32
    return %c0_i32, %c0_i32_0 : i32, i32
  }
  func.func @transform_8(%arg0: i32) -> (i32, i32) {
    %c0_i32 = arith.constant 0 : i32
    %c0_i32_0 = arith.constant 0 : i32
    %c0_i32_1 = arith.constant 0 : i32
    return %c0_i32, %c0_i32_0 : i32, i32
  }
  func.func @transform_9(%arg0: i32) -> (i32, i32, i32) {
    %c0_i32 = arith.constant 0 : i32
    %c0_i32_0 = arith.constant 0 : i32
    %c0_i32_1 = arith.constant 0 : i32
    return %arg0, %c0_i32, %c0_i32_0 : i32, i32, i32
  }
}

</mosaic_0001>

<bundles_post_ra>
// kernel: hourglass_apply.10
= control target key start
LH: loop header
LB: loop body
LE: loop exit
PB: predicated region body
PF: predicated region fallthrough
CT: control target
= control target key end

     0   :  { %s2421_s30 = smov 0   ;;  %s2884_s0 = inlined_call_operand.vmem [shape: f32[2,16,128], index: 0, kind: input, shape index: {}]   ;;  %s2885_s1 = inlined_call_operand.vmem [shape: f32[1,128], index: 1, kind: input, shape index: {}]   ;;  %s2886_s2 = inlined_call_operand.vmem [shape: f32[1,128], index: 2, kind: input, shape index: {}]   ;;  %s2887_s3 = inlined_call_operand.vmem [shape: bf16[128,128], index: 3, kind: input, shape index: {}]   ;;  %s2888_s4 = inlined_call_operand.vmem [shape: f32[1,128], index: 4, kind: input, shape index: {}]   ;;  %s2889_s5 = inlined_call_operand.vmem [shape: bf16[9,128,128], index: 5, kind: input, shape index: {}]   ;;  %s2890_s6 = inlined_call_operand.vmem [shape: f32[1,128], index: 6, kind: input, shape index: {}]   ;;  %s2891_s7 = inlined_call_operand.vmem [shape: bf16[128,128], index: 7, kind: input, shape index: {}]   ;;  %s2892_s8 = inlined_call_operand.vmem [shape: f32[1,128], index: 8, kind: input, shape index: {}]   ;;  %s2893_s9 = inlined_call_operand.vmem [shape: f32[2,16,128], index: 9, kind: output, shape index: {}]  }
   0x1 LB: > { %s1703_s10 = sadd.s32 4294967295, %s2367_s30   ;;  %p1707_p0 = scmp.ge.s32.totalorder %s2367_s30, 1  ;;  %s2367_s30 = sphi %s2421_s30, %s19_s30  }
   0x2   : > { %p287_p1 = scmp.lt.s32.totalorder %s2367_s30, 3 }
   0x4   : > { %p288_p2 = pnand %p1707_p0, %p287_p1 }
   0x5   : > { %v2270_v0 = vld [vmem:[%s2887_s3] sm:$0xff] (!%p288_p2)   ;;  %v2369_v1 = vmov (!%p288_p2), 0.0   ;;  %v2271_v2 = vld [vmem:[%s2887_s3 + $0x8] sm:$0xff] (!%p288_p2)   ;;  %vm2370_vm0 = vmmov (!%p288_p2), 0   ;;  %p323_p3 = scmp.lt.s32.totalorder (!%p288_p2), %s1703_s10, 1  ;;  %v2272_v3 = vld [vmem:[%s2887_s3 + $0x10] sm:$0xff] (!%p288_p2)   ;;  %v475_v36 = vlaneseq (!%p288_p2) }
   0x6   : > { %291 = sbr.rel (%p288_p2) target bundleno = 835 (0x343), region = 56  ;;  %2040 = vmatprep.subr.bf16.mxu0 (!%p288_p2), %v2369_v1  ;;  %471 = vst [vmem:[#allocation2] sm:$0xff] (!%p288_p2), %v2369_v1  ;;  %472 = vst [vmem:[#allocation2 + $0x18] sm:$0xff] (!%p288_p2), %v2369_v1  ;;  %2060 = vmatprep.subr.bf16.mxu1 (!%p288_p2), %v2369_v1  ;;  %v2273_v4 = vld [vmem:[%s2887_s3 + $0x18] sm:$0xff] (!%p288_p2)   ;;  %v1712_v7 = vld [vmem:[%s2885_s1] ss:$0 sm:$0xff] (!%p288_p2) }
   0x7   : > { %2041 = vmatpush3.bf16.msra.mxu0 (!%p288_p2), %v2270_v0  ;;  %2056 = vmatprep.mubr.msk.bf16.mxu0 (!%p288_p2), %vm2370_vm0, %v2369_v1  ;;  %v1713_v10 = vld [vmem:[%s2886_s2] ss:$0 sm:$0xff] (!%p288_p2)  ;;  %v2280_v12 = vld [vmem:[%s2889_s5 + $0x48] sm:$0xff] (!%p288_p2)   ;;  %v2282_v16 = vld [vmem:[%s2889_s5 + $0x50] sm:$0xff] (!%p288_p2)   ;;  %v476_v37 = vshrl.u32 (!%p288_p2), %v475_v36, 7 }
   0x8   : > { %2042 = vmatprep.subr.bf16.mxu0 (!%p288_p2), %v2369_v1  ;;  %2076 = vmatprep.mubr.msk.bf16.mxu1 (!%p288_p2), %vm2370_vm0, %v2369_v1  ;;  %v2278_v11 = vld [vmem:[%s2889_s5 + $0x40] sm:$0xff] (!%p288_p2)   ;;  %v2275_v17 = vld [vmem:[%s2887_s3 + $0x28] sm:$0xff] (!%p288_p2)   ;;  %v2284_v20 = vld [vmem:[%s2889_s5 + $0x58] sm:$0xff] (!%p288_p2)  }
   0x9   : > { %2061 = vmatpush3.bf16.msra.mxu1 (!%p288_p2), %v2278_v11  ;;  %v2274_v13 = vld [vmem:[%s2887_s3 + $0x20] sm:$0xff] (!%p288_p2)   ;;  %v2276_v21 = vld [vmem:[%s2887_s3 + $0x30] sm:$0xff] (!%p288_p2)   ;;  %v2277_v22 = vld [vmem:[%s2887_s3 + $0x38] sm:$0xff] (!%p288_p2)   ;;  %v477_v42 = vadd.s32 (!%p288_p2), 8, %v476_v37  ;;  %v482_v48 = vand.u32 (!%p288_p2), 3, %v476_v37 }
   0xa   : > { %2062 = vmatprep.subr.bf16.mxu1 (!%p288_p2), %v2369_v1  ;;  %v2279_v23 = vld [vmem:[%s2889_s5] sm:$0xff] (!%p288_p2)   ;;  %v2281_v25 = vld [vmem:[%s2889_s5 + $0x8] sm:$0xff] (!%p288_p2)   ;;  %v2283_v26 = vld [vmem:[%s2889_s5 + $0x10] sm:$0xff] (!%p288_p2)  }
   0xb   : > { %2043 = vmatpush3.bf16.msra.mxu0 (!%p288_p2), %v2271_v2  ;;  %v2285_v27 = vld [vmem:[%s2889_s5 + $0x18] sm:$0xff] (!%p288_p2)   ;;  %v2286_v28 = vld [vmem:[%s2889_s5 + $0x60] sm:$0xff] (!%p288_p2)   ;;  %v2288_v30 = vld [vmem:[%s2889_s5 + $0x68] sm:$0xff] (!%p288_p2)   ;;  %v489_v49 = vand.u32 (!%p288_p2), 3, %v477_v42  ;;  %vm502_vm1 = vcmp.ge.s32.totalorder (!%p288_p2), %v482_v48, 1  ;;  %vm508_vm3 = vcmp.lt.s32.totalorder (!%p288_p2), %v482_v48, 3 }
   0xc   : > { %2044 = vmatprep.subr.bf16.mxu0 (!%p288_p2), %v2369_v1  ;;  %v2287_v29 = vld [vmem:[%s2889_s5 + $0x20] sm:$0xff] (!%p288_p2)   ;;  %v2289_v31 = vld [vmem:[%s2889_s5 + $0x28] sm:$0xff] (!%p288_p2)   ;;  %v2290_v32 = vld [vmem:[%s2889_s5 + $0x70] sm:$0xff] (!%p288_p2)   ;;  %v2559_v51 = vsel (!%p288_p2), %vm502_vm1, 1.0, %v2369_v1  ;;  %v2570_v58 = vsel (!%p288_p2), %vm508_vm3, 1.0, %v2369_v1 }
   0xd   : > { %s2895_s10 = smov (!%p323_p3, %s1703_s10), 1  ;;  %2063 = vmatpush3.bf16.msra.mxu1 %v2280_v12  ;;  %v2291_v33 = vld [vmem:[%s2889_s5 + $0x30] sm:$0xff]   ;;  %v2292_v34 = vld [vmem:[%s2889_s5 + $0x78] sm:$0xff]   ;;  %v1714_v38 = vld [vmem:[%s2888_s4] ss:$0 sm:$0xff]  ;;  %vm503_vm2 = vcmp.ge.s32.totalorder %v489_v49, 1 }
   0xe   : > { %s1939_s17 = sshll.u32 %s2895_s10, 4  ;;  %2064 = vmatprep.subr.bf16.mxu1 %v2369_v1  ;;  %v2293_v35 = vld [vmem:[%s2889_s5 + $0x38] sm:$0xff]   ;;  %vm509_vm4 = vcmp.lt.s32.totalorder %v489_v49, 3  ;;  %v2562_v52 = vsel %vm503_vm2, 1.0, %v2369_v1  ;;  %v2294_v55 = vld [vmem:[%s2889_s5 + $0x80] sm:$0xff]   ;;  %v2297_v11 = vld [vmem:[%s2889_s5 + $0xc8] sm:$0xff]  }
   0xf   : > { %s2456_s20 = scalar_lea.vmem %s2884_s0, %s1939_s17  ;;  %2045 = vmatpush3.bf16.msra.mxu0 %v2272_v3  ;;  %v2573_v59 = vsel %vm509_vm4, 1.0, %v2369_v1  ;;  %v2295_v2 = vld [vmem:[%s2889_s5 + $0xc0] sm:$0xff]   ;;  %v2312_v36 = vld [vmem:[%s2889_s5 + $0x108] sm:$0xff]   ;;  %v2324_v48 = vld [vmem:[%s2889_s5 + $0x138] sm:$0xff]   ;;  %s332_s14 = scalar_lea.vmem %s2893_s9, %s1939_s17 }
  0x10   : > { %v334_v5 = vld [vmem:[%s2456_s20] sm:$0xff]  ;;  %v335_v6 = vld [vmem:[%s2456_s20 + $0x8] sm:$0xff]  ;;  %2046 = vmatprep.subr.bf16.mxu0 %v2369_v1 }
  0x11   : > { %v343_v8 = vmul.f32 %v1712_v7, %v334_v5  ;;  %v344_v9 = vmul.f32 %v1712_v7, %v335_v6  ;;  %2065 = vmatpush3.bf16.msra.mxu1 %v2282_v16  ;;  %v2301_v16 = vld [vmem:[%s2889_s5 + $0xd8] sm:$0xff]   ;;  %v2313_v37 = vld [vmem:[%s2889_s5 + $0x148] sm:$0xff]   ;;  %v2318_v42 = vld [vmem:[%s2889_s5 + $0x120] sm:$0xff]  }
  0x12   : > { %2066 = vmatprep.subr.bf16.mxu1 %v2369_v1 }
  0x13   : > { %v352_v14 = vadd.f32 %v1713_v10, %v343_v8  ;;  %v353_v15 = vadd.f32 %v1713_v10, %v344_v9  ;;  %2047 = vmatpush3.bf16.msra.mxu0 %v2273_v4  ;;  %v2296_v8 = vld [vmem:[%s2889_s5 + $0x88] sm:$0xff]  }
  0x14   : > { %2048 = vmatprep.subr.bf16.mxu0 %v2369_v1 }
  0x15   : > { %v354_v18 = vmax.f32 %v352_v14, 0.0  ;;  %v355_v19 = vmax.f32 %v353_v15, 0.0  ;;  %2067 = vmatpush3.bf16.msra.mxu1 %v2284_v20  ;;  %v2299_v14 = vld [vmem:[%s2889_s5 + $0xd0] sm:$0xff]   ;;  %v2300_v15 = vld [vmem:[%s2889_s5 + $0x98] sm:$0xff]   ;;  %v2305_v20 = vld [vmem:[%s2889_s5 + $0xe8] sm:$0xff]  }
  0x16   : > { %2068 = vmatprep.subr.bf16.mxu1 %v2369_v1 }
  0x17   : > { %2049 = vmatpush3.bf16.msra.mxu0 %v2274_v13  ;;  %v356_v24 = vpack.c.bf16 %v355_v19, %v354_v18  ;;  %v2298_v13 = vld [vmem:[%s2889_s5 + $0x90] sm:$0xff]   ;;  %v2303_v18 = vld [vmem:[%s2889_s5 + $0xe0] sm:$0xff]   ;;  %v2304_v19 = vld [vmem:[%s2889_s5 + $0xa8] sm:$0xff]  }
  0x18   : > { %2050 = vmatprep.subr.bf16.mxu0 %v2369_v1 }
  0x19   : > { %2069 = vmatpush3.bf16.msra.mxu1 %v2286_v28 }
  0x1a   : > { %2070 = vmatprep.subr.bf16.mxu1 %v2369_v1 }
  0x1b   : > { %2051 = vmatpush3.bf16.msra.mxu0 %v2275_v17  ;;  %v2302_v17 = vld [vmem:[%s2889_s5 + $0xa0] sm:$0xff]  }
  0x1c   : > { %2052 = vmatprep.subr.bf16.mxu0 %v2369_v1 }
  0x1d   : > { %2071 = vmatpush3.bf16.msra.mxu1 %v2288_v30 }
  0x1e   : > { %2072 = vmatprep.subr.bf16.mxu1 %v2369_v1 }
  0x1f   : > { %2053 = vmatpush3.bf16.msra.mxu0 %v2276_v21  ;;  %v2306_v21 = vld [vmem:[%s2889_s5 + $0xb0] sm:$0xff]  }
  0x20   : > { %2054 = vmatprep.subr.bf16.mxu0 %v2369_v1 }
  0x21   : > { %2073 = vmatpush3.bf16.msra.mxu1 %v2290_v32 }
  0x22   : > { %2074 = vmatprep.subr.bf16.mxu1 %v2369_v1 }
  0x23   : > { %2055 = vmatpush3.bf16.msra.mxu0 %v2277_v22  ;;  %v2307_v22 = vld [vmem:[%s2889_s5 + $0xf0] sm:$0xff]  }
  0x24   : > { %2080 = vmatprep.subr.bf16.mxu0 %v2369_v1 }
  0x25   : > { %2075 = vmatpush3.bf16.msra.mxu1 %v2292_v34  ;;  %v2311_v34 = vld [vmem:[%s2889_s5 + $0x140] sm:$0xff]  }
  0x26   : > { %2057 = vmatmul.mubr.bf16.vlgmr.msra.gmra.mrb[0].mxu0 %v356_v24  ;;  %2100 = vmatprep.subr.bf16.mxu1 %v2369_v1 }
  0x27   : > { %2081 = vmatpush3.bf16.msra.mxu0 %v2279_v23  ;;  %2096 = vmatprep.mubr.msk.bf16.mxu0 %vm2370_vm0, %v2369_v1  ;;  %v2308_v23 = vld [vmem:[%s2889_s5 + $0xb8] sm:$0xff]  }
  0x28   : > { %2082 = vmatprep.subr.bf16.mxu0 %v2369_v1 }
  0x2b   : > { %2083 = vmatpush3.bf16.msra.mxu0 %v2281_v25 }
  0x2c   : > { %2084 = vmatprep.subr.bf16.mxu0 %v2369_v1 }
  0x2f   : > { %2085 = vmatpush3.bf16.msra.mxu0 %v2283_v26 }
  0x30   : > { %2086 = vmatprep.subr.bf16.mxu0 %v2369_v1 }
  0x33   : > { %2087 = vmatpush3.bf16.msra.mxu0 %v2285_v27  ;;  %v2309_v27 = vld [vmem:[%s2889_s5 + $0xf8] sm:$0xff]  }
  0x34   : > { %2088 = vmatprep.subr.bf16.mxu0 %v2369_v1 }
  0x37   : > { %2089 = vmatpush3.bf16.msra.mxu0 %v2287_v29 }
  0x38   : > { %2090 = vmatprep.subr.bf16.mxu0 %v2369_v1 }
  0x3b   : > { %2091 = vmatpush3.bf16.msra.mxu0 %v2289_v31  ;;  %v2310_v31 = vld [vmem:[%s2889_s5 + $0x100] sm:$0xff]  }
  0x3c   : > { %2092 = vmatprep.subr.bf16.mxu0 %v2369_v1 }
  0x3f   : > { %2093 = vmatpush3.bf16.msra.mxu0 %v2291_v33 }
  0x40   : > { %2094 = vmatprep.subr.bf16.mxu0 %v2369_v1 }
  0x43   : > { %2095 = vmatpush3.bf16.msra.mxu0 %v2293_v35 }
  0x44   : > { %2120 = vmatprep.subr.bf16.mxu0 %v2369_v1 }
  0xf9   : > { %v462_v39 = vpop.f32.mrb[0].mxu0 }
  0xfa   : > { %v463_v40 = vadd.f32 %v1714_v38, %v462_v39  ;;  %v2058_v41 = vpop.f32.mrb[1].mxu0  ;;  %v2315_v39 = vld [vmem:[%s2889_s5 + $0x150] sm:$0xff]  }
  0xfb   : > { %v465_v43 = vpop.f32.mrb[2].mxu0  ;;  %v2317_v41 = vld [vmem:[%s2889_s5 + $0x158] sm:$0xff]  }
  0xfc   : > { %v469_v44 = vmax.f32 %v463_v40, 0.0  ;;  %v466_v45 = vadd.f32 %v1714_v38, %v465_v43  ;;  %v2059_v46 = vpop.f32.mrb[3].mxu0  ;;  %v2314_v38 = vld [vmem:[%s2889_s5 + $0x110] sm:$0xff]   ;;  %v2316_v40 = vld [vmem:[%s2889_s5 + $0x118] sm:$0xff]   ;;  %v2319_v43 = vld [vmem:[%s2889_s5 + $0x160] sm:$0xff]  }
  0xfd   : > { %v2322_v46 = vld [vmem:[%s2889_s5 + $0x130] sm:$0xff]  }
  0xfe   : > { %473 = vst [vmem:[#allocation2 + $0x8] sm:$0xff] %v469_v44  ;;  %v470_v47 = vmax.f32 %v466_v45, 0.0  ;;  %v2321_v45 = vld [vmem:[%s2889_s5 + $0x168] sm:$0xff]  }
 0x100   : > { %474 = vst [vmem:[#allocation2 + $0x10] sm:$0xff] %v470_v47  ;;  %v2556_v50 = vpack.c.bf16 %v470_v47, %v469_v44  ;;  %v2320_v44 = vld [vmem:[%s2889_s5 + $0x128] sm:$0xff]   ;;  %v2323_v47 = vld [vmem:[%s2889_s5 + $0x170] sm:$0xff]  }
 0x105   : > { %v514_v53 = vld [vmem:[#allocation2 + $0x3] sm:$0xff] }
 0x106   : > { %v535_v54 = vld [vmem:[#allocation2 + $0x4] sm:$0xff]  ;;  %v516_v62 = vmul.f32 %v2559_v51, %v514_v53 }
 0x107   : > { %v2567_v56 = vld [vmem:[#allocation2 + $0xc] sm:$0xff]  ;;  %v1408_v4 = vld [vmem:[#allocation2 + $0x15] sm:$0xff] }
 0x108   : > { %v515_v57 = vld [vmem:[#allocation2 + $0xb] sm:$0xff]  ;;  %v537_v61 = vpack.c.bf16 %v2567_v56, %v535_v54  ;;  %v1184_v3 = vld [vmem:[#allocation2 + $0x13] sm:$0xff]  ;;  %v2596_v9 = vmul.f32 %v2573_v59, %v1408_v4 }
 0x109   : > { %v734_v60 = vld [vmem:[#allocation2 + $0xd] sm:$0xff]  ;;  %v517_v63 = vmul.f32 %v2562_v52, %v515_v57  ;;  %v2579_v0 = vmul.f32 %v2559_v51, %v515_v57  ;;  %v2588_v7 = vmul.f32 %v2562_v52, %v1184_v3  ;;  %v733_v24 = vld [vmem:[#allocation2 + $0x5] sm:$0xff] }
 0x10a   : > { %v2585_v5 = vmul.f32 %v2570_v58, %v734_v60  ;;  %2077 = vmatmul.mubr.bf16.vlgmr.msra.gmra.mrb[0].mxu1 %v537_v61  ;;  %v847_v25 = vld [vmem:[#allocation2 + $0xf] sm:$0xff]  ;;  %v736_v26 = vmul.f32 %v2573_v59, %v734_v60  ;;  %v846_v28 = vld [vmem:[#allocation2 + $0x7] sm:$0xff]  ;;  %v735_v29 = vmul.f32 %v2570_v58, %v733_v24 }
 0x10b   : > { %v518_v6 = vpack.c.bf16 %v517_v63, %v516_v62  ;;  %2101 = vmatpush3.bf16.msra.mxu1 %v2294_v55  ;;  %2116 = vmatprep.mubr.msk.bf16.mxu1 %vm2370_vm0, %v2369_v1  ;;  %v1187_v10 = vpack.c.bf16 %v2588_v7, %v2579_v0  ;;  %v849_v30 = vmul.f32 %v2562_v52, %v847_v25  ;;  %v1070_v49 = vld [vmem:[#allocation2 + $0x9] sm:$0xff]  ;;  %v2325_v52 = vld [vmem:[%s2889_s5 + $0x178] sm:$0xff]   ;;  %v2326_v55 = vld [vmem:[%s2889_s5 + $0x180] sm:$0xff]  }
 0x10c   : > { %2102 = vmatprep.subr.bf16.mxu1 %v2369_v1  ;;  %v1411_v12 = vpack.c.bf16 %v2596_v9, %v2585_v5  ;;  %v737_v32 = vpack.c.bf16 %v736_v26, %v735_v29  ;;  %v848_v33 = vmul.f32 %v2559_v51, %v846_v28  ;;  %v1071_v51 = vld [vmem:[#allocation2 + $0x11] sm:$0xff]  ;;  %v1072_v53 = vmul.f32 %v2570_v58, %v1070_v49  ;;  %v2327_v57 = vld [vmem:[%s2889_s5 + $0x1c0] sm:$0xff]   ;;  %v2328_v58 = vld [vmem:[%s2889_s5 + $0x188] sm:$0xff]  }
 0x10d   : > { %2097 = vmatmul.mubr.bf16.vlgmr.msra.gmra.mrb[4].mxu0 %v518_v6  ;;  %v1073_v54 = vmul.f32 %v2573_v59, %v1071_v51  ;;  %v2329_v59 = vld [vmem:[%s2889_s5 + $0x1c8] sm:$0xff]   ;;  %v2331_v61 = vld [vmem:[%s2889_s5 + $0x1d0] sm:$0xff]   ;;  %v2332_v62 = vld [vmem:[%s2889_s5 + $0x198] sm:$0xff]  }
 0x10e   : > { %2121 = vmatpush3.bf16.msra.mxu0 %v2295_v2  ;;  %2136 = vmatprep.mubr.msk.bf16.mxu0 %vm2370_vm0, %v2369_v1  ;;  %v850_v35 = vpack.c.bf16 %v849_v30, %v848_v33  ;;  %v2333_v63 = vld [vmem:[%s2889_s5 + $0x1d8] sm:$0xff]   ;;  %v2334_v2 = vld [vmem:[%s2889_s5 + $0x1a0] sm:$0xff]   ;;  %v2336_v4 = vld [vmem:[%s2889_s5 + $0x1a8] sm:$0xff]  }
 0x10f   : > { %2122 = vmatprep.subr.bf16.mxu0 %v2369_v1  ;;  %2103 = vmatpush3.bf16.msra.mxu1 %v2296_v8  ;;  %v1074_v60 = vpack.c.bf16 %v1073_v54, %v1072_v53  ;;  %v2335_v3 = vld [vmem:[%s2889_s5 + $0x1e0] sm:$0xff]   ;;  %v2337_v6 = vld [vmem:[%s2889_s5 + $0x1e8] sm:$0xff]   ;;  %v2338_v8 = vld [vmem:[%s2889_s5 + $0x1b0] sm:$0xff]  }
 0x110   : > { %2104 = vmatprep.subr.bf16.mxu1 %v2369_v1  ;;  %v2345_v0 = vld [vmem:[%s2889_s5 + $0x218] sm:$0xff]   ;;  %v2346_v7 = vld [vmem:[%s2889_s5 + $0x220] sm:$0xff]   ;;  %v2355_v24 = vld [vmem:[%s2891_s7 + $0x28] sm:$0xff]  }
 0x111   : > { %v2353_v5 = vld [vmem:[%s2891_s7 + $0x18] sm:$0xff]   ;;  %v2354_v9 = vld [vmem:[%s2891_s7 + $0x20] sm:$0xff]  }
 0x112   : > { %2123 = vmatpush3.bf16.msra.mxu0 %v2297_v11  ;;  %v2339_v11 = vld [vmem:[%s2889_s5 + $0x1f0] sm:$0xff]  }
 0x113   : > { %2124 = vmatprep.subr.bf16.mxu0 %v2369_v1  ;;  %2105 = vmatpush3.bf16.msra.mxu1 %v2298_v13  ;;  %v2340_v13 = vld [vmem:[%s2889_s5 + $0x1b8] sm:$0xff]  }
 0x114   : > { %2106 = vmatprep.subr.bf16.mxu1 %v2369_v1 }
 0x116   : > { %2125 = vmatpush3.bf16.msra.mxu0 %v2299_v14  ;;  %v2341_v14 = vld [vmem:[%s2889_s5 + $0x1f8] sm:$0xff]  }
 0x117   : > { %2126 = vmatprep.subr.bf16.mxu0 %v2369_v1  ;;  %2107 = vmatpush3.bf16.msra.mxu1 %v2300_v15  ;;  %v2342_v15 = vld [vmem:[%s2889_s5 + $0x200] sm:$0xff]  }
 0x118   : > { %2108 = vmatprep.subr.bf16.mxu1 %v2369_v1 }
 0x11a   : > { %2127 = vmatpush3.bf16.msra.mxu0 %v2301_v16  ;;  %v1297_v16 = vld [vmem:[#allocation2 + $0x14] sm:$0xff] }
 0x11b   : > { %2128 = vmatprep.subr.bf16.mxu0 %v2369_v1  ;;  %2109 = vmatpush3.bf16.msra.mxu1 %v2302_v17  ;;  %v1298_v17 = vpack.c.bf16 %v1297_v16, %v2567_v56  ;;  %v2344_v56 = vld [vmem:[%s2889_s5 + $0x210] sm:$0xff]  }
 0x11c   : > { %2110 = vmatprep.subr.bf16.mxu1 %v2369_v1 }
 0x11e   : > { %2129 = vmatpush3.bf16.msra.mxu0 %v2303_v18  ;;  %v2343_v18 = vld [vmem:[%s2889_s5 + $0x208] sm:$0xff]  }
 0x11f   : > { %2130 = vmatprep.subr.bf16.mxu0 %v2369_v1  ;;  %2111 = vmatpush3.bf16.msra.mxu1 %v2304_v19  ;;  %v2348_v19 = vld [vmem:[%s2889_s5 + $0x230] sm:$0xff]  }
 0x120   : > { %2112 = vmatprep.subr.bf16.mxu1 %v2369_v1 }
 0x122   : > { %2131 = vmatpush3.bf16.msra.mxu0 %v2305_v20  ;;  %v2349_v20 = vld [vmem:[%s2889_s5 + $0x238] sm:$0xff]  }
 0x123   : > { %2132 = vmatprep.subr.bf16.mxu0 %v2369_v1  ;;  %2113 = vmatpush3.bf16.msra.mxu1 %v2306_v21  ;;  %v2350_v21 = vld [vmem:[%s2891_s7] sm:$0xff]  }
 0x124   : > { %2114 = vmatprep.subr.bf16.mxu1 %v2369_v1 }
 0x126   : > { %2133 = vmatpush3.bf16.msra.mxu0 %v2307_v22  ;;  %v2351_v22 = vld [vmem:[%s2891_s7 + $0x8] sm:$0xff]  }
 0x127   : > { %2134 = vmatprep.subr.bf16.mxu0 %v2369_v1  ;;  %2115 = vmatpush3.bf16.msra.mxu1 %v2308_v23  ;;  %v2358_v23 = vld [vmem:[#allocation2] sm:$0xff] }
 0x128   : > { %2140 = vmatprep.subr.bf16.mxu1 %v2369_v1 }
 0x12a   : > { %2135 = vmatpush3.bf16.msra.mxu0 %v2309_v27  ;;  %2117 = vmatmul.mubr.bf16.vlgmr.msra.gmra.mrb[4].mxu1 %v737_v32  ;;  %v2356_v32 = vld [vmem:[%s2891_s7 + $0x30] sm:$0xff]  }
 0x12b   : > { %2160 = vmatprep.subr.bf16.mxu0 %v2369_v1  ;;  %2141 = vmatpush3.bf16.msra.mxu1 %v2310_v31 }
 0x12c   : > { %2156 = vmatprep.mubr.msk.bf16.mxu1 %vm2370_vm0, %v2369_v1  ;;  %2142 = vmatprep.subr.bf16.mxu1 %v2369_v1 }
 0x12d   : > { %2137 = vmatmul.mubr.bf16.vlgmr.msra.gmra.mrb[8].mxu0 %v850_v35  ;;  %v2357_v35 = vld [vmem:[%s2891_s7 + $0x38] sm:$0xff]  }
 0x12e   : > { %2161 = vmatpush3.bf16.msra.mxu0 %v2311_v34  ;;  %2176 = vmatprep.mubr.msk.bf16.mxu0 %vm2370_vm0, %v2369_v1 }
 0x12f   : > { %2162 = vmatprep.subr.bf16.mxu0 %v2369_v1  ;;  %2143 = vmatpush3.bf16.msra.mxu1 %v2312_v36 }
 0x130   : > { %2144 = vmatprep.subr.bf16.mxu1 %v2369_v1 }
 0x132   : > { %2163 = vmatpush3.bf16.msra.mxu0 %v2313_v37 }
 0x133   : > { %2164 = vmatprep.subr.bf16.mxu0 %v2369_v1  ;;  %2145 = vmatpush3.bf16.msra.mxu1 %v2314_v38 }
 0x134   : > { %2146 = vmatprep.subr.bf16.mxu1 %v2369_v1 }
 0x136   : > { %2165 = vmatpush3.bf16.msra.mxu0 %v2315_v39 }
 0x137   : > { %2166 = vmatprep.subr.bf16.mxu0 %v2369_v1  ;;  %2147 = vmatpush3.bf16.msra.mxu1 %v2316_v40 }
 0x138   : > { %2148 = vmatprep.subr.bf16.mxu1 %v2369_v1 }
 0x13a   : > { %2167 = vmatpush3.bf16.msra.mxu0 %v2317_v41 }
 0x13b   : > { %2168 = vmatprep.subr.bf16.mxu0 %v2369_v1  ;;  %2149 = vmatpush3.bf16.msra.mxu1 %v2318_v42 }
 0x13c   : > { %2150 = vmatprep.subr.bf16.mxu1 %v2369_v1 }
 0x13e   : > { %2169 = vmatpush3.bf16.msra.mxu0 %v2319_v43 }
 0x13f   : > { %2170 = vmatprep.subr.bf16.mxu0 %v2369_v1  ;;  %2151 = vmatpush3.bf16.msra.mxu1 %v2320_v44 }
 0x140   : > { %2152 = vmatprep.subr.bf16.mxu1 %v2369_v1 }
 0x142   : > { %2171 = vmatpush3.bf16.msra.mxu0 %v2321_v45 }
 0x143   : > { %2172 = vmatprep.subr.bf16.mxu0 %v2369_v1  ;;  %2153 = vmatpush3.bf16.msra.mxu1 %v2322_v46 }
 0x144   : > { %2154 = vmatprep.subr.bf16.mxu1 %v2369_v1 }
 0x146   : > { %2173 = vmatpush3.bf16.msra.mxu0 %v2323_v47 }
 0x147   : > { %2174 = vmatprep.subr.bf16.mxu0 %v2369_v1  ;;  %2155 = vmatpush3.bf16.msra.mxu1 %v2324_v48 }
 0x148   : > { %2180 = vmatprep.subr.bf16.mxu1 %v2369_v1 }
 0x14a   : > { %2175 = vmatpush3.bf16.msra.mxu0 %v2325_v52  ;;  %2157 = vmatmul.mubr.bf16.vlgmr.msra.gmra.mrb[8].mxu1 %v2556_v50  ;;  %v2330_v50 = vld [vmem:[%s2889_s5 + $0x190] sm:$0xff]  }
 0x14b   : > { %2200 = vmatprep.subr.bf16.mxu0 %v2369_v1  ;;  %2181 = vmatpush3.bf16.msra.mxu1 %v2326_v55 }
 0x14c   : > { %2196 = vmatprep.mubr.msk.bf16.mxu1 %vm2370_vm0, %v2369_v1  ;;  %2182 = vmatprep.subr.bf16.mxu1 %v2369_v1 }
 0x14d   : > { %2177 = vmatmul.mubr.bf16.vlgmr.msra.gmra.mrb[12].mxu0 %v1074_v60 }
 0x14e   : > { %2201 = vmatpush3.bf16.msra.mxu0 %v2327_v57  ;;  %2216 = vmatprep.mubr.msk.bf16.mxu0 %vm2370_vm0, %v2369_v1 }
 0x14f   : > { %2202 = vmatprep.subr.bf16.mxu0 %v2369_v1  ;;  %2183 = vmatpush3.bf16.msra.mxu1 %v2328_v58 }
 0x150   : > { %2184 = vmatprep.subr.bf16.mxu1 %v2369_v1 }
 0x152   : > { %2203 = vmatpush3.bf16.msra.mxu0 %v2329_v59 }
 0x153   : > { %2204 = vmatprep.subr.bf16.mxu0 %v2369_v1  ;;  %2185 = vmatpush3.bf16.msra.mxu1 %v2330_v50 }
 0x154   : > { %2186 = vmatprep.subr.bf16.mxu1 %v2369_v1 }
 0x156   : > { %2205 = vmatpush3.bf16.msra.mxu0 %v2331_v61 }
 0x157   : > { %2206 = vmatprep.subr.bf16.mxu0 %v2369_v1  ;;  %2187 = vmatpush3.bf16.msra.mxu1 %v2332_v62 }
 0x158   : > { %2188 = vmatprep.subr.bf16.mxu1 %v2369_v1 }
 0x15a   : > { %2207 = vmatpush3.bf16.msra.mxu0 %v2333_v63 }
 0x15b   : > { %2208 = vmatprep.subr.bf16.mxu0 %v2369_v1  ;;  %2189 = vmatpush3.bf16.msra.mxu1 %v2334_v2 }
 0x15c   : > { %2190 = vmatprep.subr.bf16.mxu1 %v2369_v1 }
 0x15e   : > { %2209 = vmatpush3.bf16.msra.mxu0 %v2335_v3 }
 0x15f   : > { %2210 = vmatprep.subr.bf16.mxu0 %v2369_v1  ;;  %2191 = vmatpush3.bf16.msra.mxu1 %v2336_v4 }
 0x160   : > { %2192 = vmatprep.subr.bf16.mxu1 %v2369_v1 }
 0x162   : > { %2211 = vmatpush3.bf16.msra.mxu0 %v2337_v6 }
 0x163   : > { %2212 = vmatprep.subr.bf16.mxu0 %v2369_v1  ;;  %2193 = vmatpush3.bf16.msra.mxu1 %v2338_v8 }
 0x164   : > { %2194 = vmatprep.subr.bf16.mxu1 %v2369_v1 }
 0x166   : > { %2213 = vmatpush3.bf16.msra.mxu0 %v2339_v11 }
 0x167   : > { %2214 = vmatprep.subr.bf16.mxu0 %v2369_v1  ;;  %2195 = vmatpush3.bf16.msra.mxu1 %v2340_v13 }
 0x168   : > { %2220 = vmatprep.subr.bf16.mxu1 %v2369_v1 }
 0x16a   : > { %2215 = vmatpush3.bf16.msra.mxu0 %v2341_v14  ;;  %2197 = vmatmul.mubr.bf16.vlgmr.msra.gmra.mrb[12].mxu1 %v1187_v10  ;;  %v2347_v10 = vld [vmem:[%s2889_s5 + $0x228] sm:$0xff]  }
 0x16b   : > { %2240 = vmatprep.subr.bf16.mxu0 %v2369_v1  ;;  %2221 = vmatpush3.bf16.msra.mxu1 %v2342_v15 }
 0x16c   : > { %2236 = vmatprep.mubr.msk.bf16.mxu1 %vm2370_vm0, %v2369_v1  ;;  %2222 = vmatprep.subr.bf16.mxu1 %v2369_v1 }
 0x16d   : > { %2217 = vmatmul.mubr.bf16.vlgmr.msra.gmra.mrb[16].mxu0 %v1298_v17  ;;  %v1927_v17 = vld [vmem:[%s2890_s6] ss:$0 sm:$0xff] }
 0x16e   : > { %2256 = vmatprep.mubr.msk.bf16.mxu0 %vm2370_vm0, %v2369_v1  ;;  %2241 = vmatpush3.bf16.msra.mxu0 %v2350_v21 }
 0x16f   : > { %2223 = vmatpush3.bf16.msra.mxu1 %v2343_v18  ;;  %2242 = vmatprep.subr.bf16.mxu0 %v2358_v23 }
 0x170   : > { %2224 = vmatprep.subr.bf16.mxu1 %v2369_v1 }
 0x172   : > { %2243 = vmatpush3.bf16.msra.mxu0 %v2351_v22 }
 0x173   : > { %2225 = vmatpush3.bf16.msra.mxu1 %v2344_v56  ;;  %2244 = vmatprep.subr.bf16.mxu0 %v2358_v23 }
 0x174   : > { %2226 = vmatprep.subr.bf16.mxu1 %v2369_v1 }
 0x177   : > { %2227 = vmatpush3.bf16.msra.mxu1 %v2345_v0 }
 0x178   : > { %2228 = vmatprep.subr.bf16.mxu1 %v2369_v1 }
 0x17b   : > { %2229 = vmatpush3.bf16.msra.mxu1 %v2346_v7 }
 0x17c   : > { %2230 = vmatprep.subr.bf16.mxu1 %v2369_v1 }
 0x17f   : > { %2231 = vmatpush3.bf16.msra.mxu1 %v2347_v10 }
 0x180   : > { %2232 = vmatprep.subr.bf16.mxu1 %v2369_v1 }
 0x183   : > { %2233 = vmatpush3.bf16.msra.mxu1 %v2348_v19 }
 0x184   : > { %2234 = vmatprep.subr.bf16.mxu1 %v2369_v1  ;;  %v2352_v1 = vld [vmem:[%s2891_s7 + $0x10] sm:$0xff]  }
 0x185   : > { %2245 = vmatpush3.bf16.msra.mxu0 %v2352_v1  ;;  %v1928_v1 = vld [vmem:[%s2892_s8] ss:$0 sm:$0xff] }
 0x186   : > { %2246 = vmatprep.subr.bf16.mxu0 %v2358_v23 }
 0x187   : > { %2235 = vmatpush3.bf16.msra.mxu1 %v2349_v20 }
 0x189   : > { %2247 = vmatpush3.bf16.msra.mxu0 %v2353_v5 }
 0x18a   : > { %2237 = vmatmul.mubr.bf16.vlgmr.msra.gmra.mrb[16].mxu1 %v1411_v12  ;;  %2248 = vmatprep.subr.bf16.mxu0 %v2358_v23 }
 0x18d   : > { %2249 = vmatpush3.bf16.msra.mxu0 %v2354_v9 }
 0x18e   : > { %2250 = vmatprep.subr.bf16.mxu0 %v2358_v23 }
 0x191   : > { %2251 = vmatpush3.bf16.msra.mxu0 %v2355_v24 }
 0x192   : > { %2252 = vmatprep.subr.bf16.mxu0 %v2358_v23 }
 0x195   : > { %2253 = vmatpush3.bf16.msra.mxu0 %v2356_v32 }
 0x196   : > { %2254 = vmatprep.subr.bf16.mxu0 %v2358_v23 }
 0x199   : > { %2255 = vmatpush3.bf16.msra.mxu0 %v2357_v35 }
 0x1dd   : > { %v637_v12 = vpop.f32.mrb[0].mxu1 }
 0x1de   : > { %v2078_v25 = vpop.f32.mrb[1].mxu1 }
 0x1df   : > { %v640_v26 = vpop.f32.mrb[2].mxu1  ;;  %v2359_v25 = vld [vmem:[%s2456_s20] sm:$0xff] }
 0x1e0   : > { %v726_v27 = vpop.f32.mrb[4].mxu0  ;;  %v2079_v29 = vpop.f32.mrb[3].mxu1 }
 0x1e1   : > { %v727_v28 = vadd.f32 %v726_v27, %v637_v12  ;;  %v2098_v30 = vpop.f32.mrb[5].mxu0  ;;  %v2360_v29 = vld [vmem:[%s2456_s20 + $0x8] sm:$0xff] }
 0x1e2   : > { %v729_v31 = vpop.f32.mrb[6].mxu0 }
 0x1e3   : > { %v730_v33 = vadd.f32 %v729_v31, %v640_v26  ;;  %v2099_v34 = vpop.f32.mrb[7].mxu0 }
 0x1fd   : > { %v837_v36 = vpop.f32.mrb[4].mxu1 }
 0x1fe   : > { %v844_v37 = vadd.f32 %v837_v36, %v727_v28  ;;  %v2118_v38 = vpop.f32.mrb[5].mxu1 }
 0x1ff   : > { %v840_v39 = vpop.f32.mrb[6].mxu1 }
 0x200   : > { %v950_v40 = vpop.f32.mrb[8].mxu0  ;;  %v845_v41 = vadd.f32 %v840_v39, %v730_v33  ;;  %v2119_v43 = vpop.f32.mrb[7].mxu1 }
 0x201   : > { %v957_v42 = vadd.f32 %v950_v40, %v844_v37  ;;  %v2138_v44 = vpop.f32.mrb[9].mxu0 }
 0x202   : > { %v953_v45 = vpop.f32.mrb[10].mxu0 }
 0x203   : > { %v958_v46 = vadd.f32 %v953_v45, %v845_v41  ;;  %v2139_v47 = vpop.f32.mrb[11].mxu0 }
 0x21d   : > { %v1061_v48 = vpop.f32.mrb[8].mxu1 }
 0x21e   : > { %v1068_v49 = vadd.f32 %v1061_v48, %v957_v42  ;;  %v2158_v51 = vpop.f32.mrb[9].mxu1 }
 0x21f   : > { %v1064_v52 = vpop.f32.mrb[10].mxu1 }
 0x220   : > { %v1174_v53 = vpop.f32.mrb[12].mxu0  ;;  %v1069_v54 = vadd.f32 %v1064_v52, %v958_v46  ;;  %v2159_v57 = vpop.f32.mrb[11].mxu1 }
 0x221   : > { %v1181_v55 = vadd.f32 %v1174_v53, %v1068_v49  ;;  %v2178_v60 = vpop.f32.mrb[13].mxu0 }
 0x222   : > { %v1177_v58 = vpop.f32.mrb[14].mxu0 }
 0x223   : > { %v1182_v59 = vadd.f32 %v1177_v58, %v1069_v54  ;;  %v2179_v50 = vpop.f32.mrb[15].mxu0 }
 0x23d   : > { %v1287_v61 = vpop.f32.mrb[12].mxu1 }
 0x23e   : > { %v1294_v62 = vadd.f32 %v1287_v61, %v1181_v55  ;;  %v2198_v63 = vpop.f32.mrb[13].mxu1 }
 0x23f   : > { %v1290_v2 = vpop.f32.mrb[14].mxu1 }
 0x240   : > { %v1398_v3 = vpop.f32.mrb[16].mxu0  ;;  %v1295_v4 = vadd.f32 %v1290_v2, %v1182_v59  ;;  %v2199_v8 = vpop.f32.mrb[15].mxu1 }
 0x241   : > { %v1405_v6 = vadd.f32 %v1398_v3, %v1294_v62  ;;  %v2218_v11 = vpop.f32.mrb[17].mxu0 }
 0x242   : > { %v1401_v13 = vpop.f32.mrb[18].mxu0 }
 0x243   : > { %v1406_v14 = vadd.f32 %v1401_v13, %v1295_v4  ;;  %v2219_v15 = vpop.f32.mrb[19].mxu0 }
 0x25d   : > { %v1511_v16 = vpop.f32.mrb[16].mxu1 }
 0x25e   : > { %v1518_v18 = vadd.f32 %v1511_v16, %v1405_v6  ;;  %v2238_v56 = vpop.f32.mrb[17].mxu1 }
 0x25f   : > { %v1514_v0 = vpop.f32.mrb[18].mxu1 }
 0x260   : > { %v1527_v7 = vadd.f32 %v1927_v17, %v1518_v18  ;;  %v1519_v10 = vadd.f32 %v1514_v0, %v1406_v14  ;;  %v2239_v19 = vpop.f32.mrb[19].mxu1 }
 0x262   : > { %v1528_v20 = vadd.f32 %v1927_v17, %v1519_v10  ;;  %v1529_v21 = vmax.f32 %v1527_v7, 0.0 }
 0x264   : > { %v1530_v22 = vmax.f32 %v1528_v20, 0.0 }
 0x266   : > { %v1531_v23 = vpack.c.bf16 %v1530_v22, %v1529_v21 }
 0x268   : > { %2257 = vmatmul.mubr.bf16.vlgmr.msra.gmra.mrb[20].mxu0 %v1531_v23 }
 0x33b   : > { %v1637_v5 = vpop.f32.mrb[20].mxu0 }
 0x33c   : > { %v1638_v9 = vadd.f32 %v1928_v1, %v1637_v5  ;;  %v2258_v12 = vpop.f32.mrb[21].mxu0 }
 0x33d   : > { %v1640_v24 = vpop.f32.mrb[22].mxu0 }
 0x33e   : > { %v1644_v26 = vadd.f32 %v2359_v25, %v1638_v9  ;;  %v1641_v27 = vadd.f32 %v1928_v1, %v1640_v24  ;;  %v2259_v28 = vpop.f32.mrb[23].mxu0 }
 0x340   : > { %1646 = vst [vmem:[%s332_s14] sm:$0xff] %v1644_v26  ;;  %v1645_v30 = vadd.f32 %v2360_v29, %v1641_v27 }
 0x342   : > { %1647 = vst [vmem:[%s332_s14 + $0x8] sm:$0xff] %v1645_v30 }
 0x343 PF: > { %s19_s30 = sadd.s32 1, %s2367_s30  }
 0x344   : > { %p16_p4 = scmp.ge.s32.totalorder %s19_s30, 4  }
 0x346   :  { %18 = sbr.rel (!%p16_p4) target bundleno = 1 (0x1), region = 94 }

// kernel: hourglass_apply.8
= control target key start
LH: loop header
LB: loop body
LE: loop exit
PB: predicated region body
PF: predicated region fallthrough
CT: control target
= control target key end

     0   :  { %s3182_s30 = smov 0   ;;  %s3929_s0 = inlined_call_operand.vmem [shape: f32[2,64,128], index: 0, kind: input, shape index: {}]   ;;  %s3930_s1 = inlined_call_operand.vmem [shape: f32[1,128], index: 1, kind: input, shape index: {}]   ;;  %s3931_s2 = inlined_call_operand.vmem [shape: f32[1,128], index: 2, kind: input, shape index: {}]   ;;  %s3932_s3 = inlined_call_operand.vmem [shape: bf16[128,128], index: 3, kind: input, shape index: {}]   ;;  %s3933_s4 = inlined_call_operand.vmem [shape: f32[1,128], index: 4, kind: input, shape index: {}]   ;;  %s3934_s5 = inlined_call_operand.vmem [shape: bf16[9,128,128], index: 5, kind: input, shape index: {}]   ;;  %s3935_s6 = inlined_call_operand.vmem [shape: f32[1,128], index: 6, kind: input, shape index: {}]   ;;  %s3936_s7 = inlined_call_operand.vmem [shape: bf16[128,128], index: 7, kind: input, shape index: {}]   ;;  %s3937_s8 = inlined_call_operand.vmem [shape: f32[1,128], index: 8, kind: input, shape index: {}]   ;;  %s3938_s9 = inlined_call_operand.vmem [shape: f32[2,64,128], index: 9, kind: output, shape index: {}]  }
   0x1 LB: > { %s2308_s10 = sadd.s32 4294967295, %s3129_s30   ;;  %p2312_p0 = scmp.ge.s32.totalorder %s3129_s30, 1  ;;  %s3129_s30 = sphi %s3182_s30, %s19_s30  }
   0x2   : > { %p287_p1 = scmp.lt.s32.totalorder %s3129_s30, 3 }
   0x4   : > { %p288_p2 = pnand %p2312_p0, %p287_p1 }
   0x5   : > { %v3027_v0 = vld [vmem:[%s3932_s3] sm:$0xff] (!%p288_p2)   ;;  %p323_p3 = scmp.lt.s32.totalorder (!%p288_p2), %s2308_s10, 1  ;;  %v3028_v1 = vld [vmem:[%s3932_s3 + $0x8] sm:$0xff] (!%p288_p2)   ;;  %v3029_v2 = vld [vmem:[%s3932_s3 + $0x10] sm:$0xff] (!%p288_p2)   ;;  %v3939_v60 = vmov (!%p288_p2), 0.0  }
   0x6   : > { %291 = sbr.rel (%p288_p2) target bundleno = 882 (0x372), region = 56  ;;  %2690 = vmatprep.subr.bf16.mxu0 (!%p288_p2), %v3027_v0  ;;  %v3030_v3 = vld [vmem:[%s3932_s3 + $0x18] sm:$0xff] (!%p288_p2)   ;;  %v2317_v6 = vld [vmem:[%s3930_s1] ss:$0 sm:$0xff] (!%p288_p2)  ;;  %v3032_v34 = vld [vmem:[%s3932_s3 + $0x28] sm:$0xff] (!%p288_p2)   ;;  %529 = vst [vmem:[#allocation2 + $0x8] sm:$0xff] (!%p288_p2), %v3939_v60 }
   0x7   : > { %2691 = vmatpush3.bf16.msra.mxu0 (!%p288_p2), %v3027_v0  ;;  %v2318_v9 = vld [vmem:[%s3931_s2] ss:$0 sm:$0xff] (!%p288_p2)  ;;  %v3038_v37 = vld [vmem:[%s3934_s5 + $0xc8] sm:$0xff] (!%p288_p2)   ;;  %v3040_v41 = vld [vmem:[%s3934_s5 + $0xd0] sm:$0xff] (!%p288_p2)   ;;  %528 = vst [vmem:[#allocation2] sm:$0xff] (!%p288_p2), %v3939_v60 }
   0x8   : > { %2692 = vmatprep.subr.bf16.mxu0 (!%p288_p2), %v3028_v1  ;;  %v3031_v22 = vld [vmem:[%s3932_s3 + $0x20] sm:$0xff] (!%p288_p2)   ;;  %v3033_v42 = vld [vmem:[%s3932_s3 + $0x30] sm:$0xff] (!%p288_p2)   ;;  %v3034_v45 = vld [vmem:[%s3932_s3 + $0x38] sm:$0xff] (!%p288_p2)   ;;  %530 = vst [vmem:[#allocation2 + $0x50] sm:$0xff] (!%p288_p2), %v3939_v60 }
   0x9   : > { %v3036_v31 = vld [vmem:[%s3934_s5 + $0xc0] sm:$0xff] (!%p288_p2)   ;;  %v3037_v48 = vld [vmem:[%s3934_s5 + $0x48] sm:$0xff] (!%p288_p2)   ;;  %v3039_v50 = vld [vmem:[%s3934_s5 + $0x50] sm:$0xff] (!%p288_p2)   ;;  %531 = vst [vmem:[#allocation2 + $0x58] sm:$0xff] (!%p288_p2), %v3939_v60 }
   0xa   : > { %2786 = vmatprep.subr.bf16.mxu1 (!%p288_p2), %v3036_v31  ;;  %v3035_v46 = vld [vmem:[%s3934_s5 + $0x40] sm:$0xff] (!%p288_p2)   ;;  %v3041_v52 = vld [vmem:[%s3934_s5 + $0x58] sm:$0xff] (!%p288_p2)   ;;  %v3045_v54 = vld [vmem:[%s3934_s5 + $0x68] sm:$0xff] (!%p288_p2)  }
   0xb   : > { %2693 = vmatpush3.bf16.msra.mxu0 (!%p288_p2), %v3028_v1  ;;  %2787 = vmatpush3.bf16.msra.mxu1 (!%p288_p2), %v3036_v31  ;;  %v3043_v53 = vld [vmem:[%s3934_s5 + $0x60] sm:$0xff] (!%p288_p2)   ;;  %v3042_v55 = vld [vmem:[%s3934_s5 + $0xd8] sm:$0xff] (!%p288_p2)   ;;  %v3047_v56 = vld [vmem:[%s3934_s5 + $0x70] sm:$0xff] (!%p288_p2)   ;;  %v540_v1 = vlaneseq (!%p288_p2) }
   0xc   : > { %2694 = vmatprep.subr.bf16.mxu0 (!%p288_p2), %v3029_v2  ;;  %2788 = vmatprep.subr.bf16.mxu1 (!%p288_p2), %v3038_v37  ;;  %v3044_v57 = vld [vmem:[%s3934_s5 + $0xe0] sm:$0xff] (!%p288_p2)   ;;  %v3049_v58 = vld [vmem:[%s3934_s5 + $0x78] sm:$0xff] (!%p288_p2)   ;;  %v3046_v59 = vld [vmem:[%s3934_s5 + $0xe8] sm:$0xff] (!%p288_p2)  }
   0xd   : > { %s3971_s10 = smov (!%p323_p3, %s2308_s10), 1  ;;  %v3051_v61 = vld [vmem:[%s3934_s5] sm:$0xff]   ;;  %v3048_v62 = vld [vmem:[%s3934_s5 + $0xf0] sm:$0xff]   ;;  %v3050_v63 = vld [vmem:[%s3934_s5 + $0xf8] sm:$0xff]  }
   0xe   : > { %s2556_s17 = sshll.u32 %s3971_s10, 6  ;;  %v3296_v0 = vld [vmem:[%s3934_s5 + $0x100] sm:$0xff]  }
   0xf   : > { %s3207_s20 = scalar_lea.vmem %s3929_s0, %s2556_s17  ;;  %2695 = vmatpush3.bf16.msra.mxu0 %v3029_v2  ;;  %2789 = vmatpush3.bf16.msra.mxu1 %v3038_v37  ;;  %v3299_v2 = vshrl.u32 %v540_v1, 7  ;;  %s3908_s14 = scalar_lea.vmem %s3938_s9, %s2556_s17 }
  0x10   : > { %v334_v4 = vld [vmem:[%s3207_s20] sm:$0xff]  ;;  %v335_v5 = vld [vmem:[%s3207_s20 + $0x8] sm:$0xff]  ;;  %v336_v10 = vld [vmem:[%s3207_s20 + $0x10] sm:$0xff]  ;;  %2696 = vmatprep.subr.bf16.mxu0 %v3030_v3  ;;  %2790 = vmatprep.subr.bf16.mxu1 %v3040_v41 }
  0x11   : > { %v349_v7 = vmul.f32 %v2317_v6, %v334_v4  ;;  %v350_v8 = vmul.f32 %v2317_v6, %v335_v5  ;;  %v337_v11 = vld [vmem:[%s3207_s20 + $0x18] sm:$0xff]  ;;  %v351_v12 = vmul.f32 %v2317_v6, %v336_v10  ;;  %v338_v14 = vld [vmem:[%s3207_s20 + $0x20] sm:$0xff]  ;;  %v339_v15 = vld [vmem:[%s3207_s20 + $0x28] sm:$0xff]  ;;  %v3305_v5 = vadd.s32 8, %v3299_v2 }
  0x12   : > { %v352_v13 = vmul.f32 %v2317_v6, %v337_v11  ;;  %v340_v16 = vld [vmem:[%s3207_s20 + $0x30] sm:$0xff]  ;;  %v353_v19 = vmul.f32 %v2317_v6, %v338_v14  ;;  %v354_v20 = vmul.f32 %v2317_v6, %v339_v15  ;;  %v341_v21 = vld [vmem:[%s3207_s20 + $0x38] sm:$0xff]  ;;  %v553_v15 = vand.u32 7, %v3299_v2 }
  0x13   : > { %v364_v17 = vadd.f32 %v2318_v9, %v349_v7  ;;  %v365_v18 = vadd.f32 %v2318_v9, %v350_v8  ;;  %v366_v23 = vadd.f32 %v2318_v9, %v351_v12  ;;  %v355_v25 = vmul.f32 %v2317_v6, %v340_v16  ;;  %2697 = vmatpush3.bf16.msra.mxu0 %v3030_v3  ;;  %v2319_v3 = vld [vmem:[%s3933_s4] ss:$0 sm:$0xff] }
  0x14   : > { %v367_v24 = vadd.f32 %v2318_v9, %v352_v13  ;;  %v356_v26 = vmul.f32 %v2317_v6, %v341_v21  ;;  %v368_v29 = vadd.f32 %v2318_v9, %v353_v19  ;;  %v369_v30 = vadd.f32 %v2318_v9, %v354_v20  ;;  %2698 = vmatprep.subr.bf16.mxu0 %v3031_v22 }
  0x15   : > { %v372_v27 = vmax.f32 %v364_v17, 0.0  ;;  %v373_v28 = vmax.f32 %v365_v18, 0.0  ;;  %v370_v32 = vadd.f32 %v2318_v9, %v355_v25  ;;  %v374_v36 = vmax.f32 %v366_v23, 0.0  ;;  %2791 = vmatpush3.bf16.msra.mxu1 %v3040_v41 }
  0x16   : > { %v371_v33 = vadd.f32 %v2318_v9, %v356_v26  ;;  %v375_v38 = vmax.f32 %v367_v24, 0.0  ;;  %v376_v39 = vmax.f32 %v368_v29, 0.0  ;;  %v377_v40 = vmax.f32 %v369_v30, 0.0  ;;  %2792 = vmatprep.subr.bf16.mxu1 %v3042_v55  ;;  %v3053_v29 = vld [vmem:[%s3934_s5 + $0x8] sm:$0xff]  }
  0x17   : > { %v380_v35 = vpack.c.bf16 %v373_v28, %v372_v27  ;;  %v378_v43 = vmax.f32 %v370_v32, 0.0  ;;  %2699 = vmatpush3.bf16.msra.mxu0 %v3031_v22  ;;  %v3308_v6 = vadd.s32 16, %v3299_v2  ;;  %v3311_v9 = vadd.s32 24, %v3299_v2 }
  0x18   : > { %v379_v44 = vmax.f32 %v371_v33, 0.0  ;;  %2700 = vmatprep.subr.bf16.mxu0 %v3032_v34  ;;  %v381_v47 = vpack.c.bf16 %v375_v38, %v374_v36  ;;  %v382_v49 = vpack.c.bf16 %v377_v40, %v376_v39  ;;  %v560_v18 = vand.u32 7, %v3305_v5  ;;  %v693_v39 = vld [vmem:[#allocation2 + $0x7] sm:$0xff]  ;;  %v3058_v5 = vld [vmem:[%s3934_s5 + $0x118] sm:$0xff]  }
  0x19   : > { %2706 = vmatprep.mubr.bf16.mxu0 %v380_v35  ;;  %2793 = vmatpush3.bf16.msra.mxu1 %v3042_v55  ;;  %v567_v19 = vand.u32 7, %v3308_v6  ;;  %v574_v21 = vand.u32 7, %v3311_v9  ;;  %vm3332_vm0 = vcmp.ge.s32.totalorder %v553_v15, 1  ;;  %v3367_v35 = vadd.s32 56, %v3299_v2 }
  0x1a   : > { %v383_v51 = vpack.c.bf16 %v379_v44, %v378_v43  ;;  %2794 = vmatprep.subr.bf16.mxu1 %v3044_v57  ;;  %vm3345_vm1 = vcmp.ge.s32.totalorder %v560_v18, 1  ;;  %v3373_v38 = vsel %vm3332_vm0, 1.0, %v3939_v60  ;;  %v3376_v40 = vadd.s32 32, %v3299_v2 }
  0x1b   : > { %2701 = vmatpush3.bf16.msra.mxu0 %v3032_v34  ;;  %vm3354_vm2 = vcmp.ge.s32.totalorder %v567_v19, 1  ;;  %vm3362_vm3 = vcmp.ge.s32.totalorder %v574_v21, 1  ;;  %v3379_v41 = vadd.s32 48, %v3299_v2  ;;  %v602_v55 = vand.u32 7, %v3367_v35  ;;  %v3059_v34 = vld [vmem:[%s3934_s5 + $0x20] sm:$0xff]  }
  0x1c   : > { %2702 = vmatprep.subr.bf16.mxu0 %v3033_v42  ;;  %vm3502_vm8 = vcmp.lt.s32.totalorder %v567_v19, 7  ;;  %vm3508_vm9 = vcmp.lt.s32.totalorder %v574_v21, 7  ;;  %vm3517_vm10 = vcmp.lt.s32.totalorder %v560_v18, 7  ;;  %vm3523_vm11 = vcmp.lt.s32.totalorder %v553_v15, 7  ;;  %v3063_v18 = vld [vmem:[%s3934_s5 + $0x30] sm:$0xff]  }
  0x1d   : > { %2795 = vmatpush3.bf16.msra.mxu1 %v3044_v57  ;;  %vm652_vm4 = vcmp.ge.s32.totalorder %v602_v55, 1  ;;  %vm676_vm15 = vcmp.lt.s32.totalorder %v602_v55, 7 }
  0x1e   : > { %2796 = vmatprep.subr.bf16.mxu1 %v3046_v59  ;;  %v3458_v30 = vsel %vm652_vm4, 1.0, %v3939_v60 }
  0x1f   : > { %2703 = vmatpush3.bf16.msra.mxu0 %v3033_v42 }
  0x20   : > { %2704 = vmatprep.subr.bf16.mxu0 %v3034_v45 }
  0x21   : > { %2797 = vmatpush3.bf16.msra.mxu1 %v3046_v59 }
  0x22   : > { %2798 = vmatprep.subr.bf16.mxu1 %v3048_v62 }
  0x23   : > { %2705 = vmatpush3.bf16.msra.mxu0 %v3034_v45  ;;  %v2329_v45 = vsel %vm3345_vm1, 1.0, %v3939_v60 }
  0x24   : > { %2714 = vmatprep.subr.bf16.mxu0 %v3035_v46 }
  0x25   : > { %2799 = vmatpush3.bf16.msra.mxu1 %v3048_v62 }
  0x26   : > { %2707 = vmatmul.mubr.bf16.vlgmr.msra.gmra.mrb[0].mxu0 %v381_v47  ;;  %2800 = vmatprep.subr.bf16.mxu1 %v3050_v63 }
  0x27   : > { %2710 = vmatprep.mubr.bf16.mxu0 %v382_v49  ;;  %2715 = vmatpush3.bf16.msra.mxu0 %v3035_v46  ;;  %v3389_v46 = vsel %vm3354_vm2, 1.0, %v3939_v60  ;;  %v3396_v49 = vsel %vm3362_vm3, 1.0, %v3939_v60 }
  0x28   : > { %2716 = vmatprep.subr.bf16.mxu0 %v3037_v48 }
  0x29   : > { %2801 = vmatpush3.bf16.msra.mxu1 %v3050_v63 }
  0x2a   : > { %2810 = vmatprep.subr.bf16.mxu1 %v3296_v0 }
  0x2b   : > { %2717 = vmatpush3.bf16.msra.mxu0 %v3037_v48 }
  0x2c   : > { %2718 = vmatprep.subr.bf16.mxu0 %v3039_v50 }
  0x2e   : > { %2711 = vmatmul.mubr.bf16.gmra.mrb[4].mxu0 %v383_v51 }
  0x2f   : > { %2719 = vmatpush3.bf16.msra.mxu0 %v3039_v50  ;;  %v3399_v50 = vadd.s32 40, %v3299_v2 }
  0x30   : > { %2720 = vmatprep.subr.bf16.mxu0 %v3041_v52 }
  0x33   : > { %2721 = vmatpush3.bf16.msra.mxu0 %v3041_v52 }
  0x34   : > { %2722 = vmatprep.subr.bf16.mxu0 %v3043_v53 }
  0x37   : > { %2723 = vmatpush3.bf16.msra.mxu0 %v3043_v53  ;;  %v3055_v53 = vld [vmem:[%s3934_s5 + $0x10] sm:$0xff]  }
  0x38   : > { %2724 = vmatprep.subr.bf16.mxu0 %v3045_v54 }
  0x3b   : > { %2725 = vmatpush3.bf16.msra.mxu0 %v3045_v54  ;;  %v701_v54 = vmul.f32 %v3373_v38, %v693_v39 }
  0x3c   : > { %2726 = vmatprep.subr.bf16.mxu0 %v3047_v56 }
  0x3f   : > { %2727 = vmatpush3.bf16.msra.mxu0 %v3047_v56 }
  0x40   : > { %2728 = vmatprep.subr.bf16.mxu0 %v3049_v58 }
  0x43   : > { %2729 = vmatpush3.bf16.msra.mxu0 %v3049_v58 }
  0x44   : > { %2738 = vmatprep.subr.bf16.mxu0 %v3051_v61 }
  0xf9   : > { %v2708_v4 = vpop.f32.mrb[0].mxu0 }
  0xfa   : > { %v498_v7 = vadd.f32 %v2708_v4, %v2319_v3  ;;  %v489_v8 = vpop.f32.mrb[1].mxu0  ;;  %v581_v4 = vand.u32 7, %v3376_v40 }
  0xfb   : > { %v490_v10 = vadd.f32 %v2319_v3, %v489_v8  ;;  %v2709_v11 = vpop.f32.mrb[2].mxu0 }
  0xfc   : > { %v3313_v12 = vmax.f32 %v498_v7, 0.0  ;;  %v501_v13 = vadd.f32 %v2709_v11, %v2319_v3  ;;  %v492_v14 = vpop.f32.mrb[3].mxu0  ;;  %v588_v11 = vand.u32 7, %v3399_v50  ;;  %vm649_vm6 = vcmp.ge.s32.totalorder %v581_v4, 1 }
  0xfd   : > { %v3316_v16 = vmax.f32 %v490_v10, 0.0  ;;  %v493_v17 = vadd.f32 %v2319_v3, %v492_v14  ;;  %v3477_v40 = vsel %vm649_vm6, 1.0, %v3939_v60  ;;  %vm3527_vm12 = vcmp.lt.s32.totalorder %v581_v4, 7 }
  0xfe   : > { %534 = vst [vmem:[#allocation2 + $0x20] sm:$0xff] %v3313_v12  ;;  %v3321_v20 = vmax.f32 %v501_v13, 0.0  ;;  %vm650_vm7 = vcmp.ge.s32.totalorder %v588_v11, 1  ;;  %vm3539_vm13 = vcmp.lt.s32.totalorder %v588_v11, 7  ;;  %v3552_v4 = vsel %vm3502_vm8, 1.0, %v3939_v60 }
  0xff   : > { %532 = vst [vmem:[#allocation2 + $0x10] sm:$0xff] %v3316_v16  ;;  %v3325_v22 = vmax.f32 %v493_v17, 0.0  ;;  %v737_v23 = vpack.c.bf16 %v3316_v16, %v3939_v60 }
 0x100   : > { %535 = vst [vmem:[#allocation2 + $0x28] sm:$0xff] %v3321_v20  ;;  %v1309_v25 = vpack.c.bf16 %v3321_v20, %v3313_v12 }
 0x101   : > { %533 = vst [vmem:[#allocation2 + $0x18] sm:$0xff] %v3325_v22  ;;  %v2712_v26 = vpop.f32.mrb[4].mxu0  ;;  %2730 = vmatprep.mubr.bf16.mxu0 %v737_v23  ;;  %v3341_v27 = vpack.c.bf16 %v3313_v12, %v3325_v22  ;;  %v1308_v31 = vpack.c.bf16 %v3325_v22, %v3316_v16  ;;  %v3060_v16 = vld [vmem:[%s3934_s5 + $0x120] sm:$0xff]  }
 0x102   : > { %v514_v32 = vadd.f32 %v2712_v26, %v2319_v3  ;;  %v505_v33 = vpop.f32.mrb[5].mxu0  ;;  %v3057_v26 = vld [vmem:[%s3934_s5 + $0x18] sm:$0xff]  }
 0x103   : > { %v506_v36 = vadd.f32 %v2319_v3, %v505_v33  ;;  %v2713_v37 = vpop.f32.mrb[6].mxu0  ;;  %2731 = vmatmul.mubr.bf16.vlgmr.msra.gmra.mrb[8].mxu0 %v3341_v27 }
 0x104   : > { %v3381_v42 = vmax.f32 %v514_v32, 0.0  ;;  %v517_v43 = vadd.f32 %v2713_v37, %v2319_v3  ;;  %v508_v44 = vpop.f32.mrb[7].mxu0  ;;  %2739 = vmatpush3.bf16.msra.mxu0 %v3051_v61  ;;  %v595_v61 = vand.u32 7, %v3379_v41  ;;  %v3562_v41 = vsel %vm3517_vm10, 1.0, %v3939_v60 }
 0x105   : > { %v3391_v47 = vmax.f32 %v506_v36, 0.0  ;;  %v509_v48 = vadd.f32 %v2319_v3, %v508_v44  ;;  %2740 = vmatprep.subr.bf16.mxu0 %v3053_v29 }
 0x106   : > { %538 = vst [vmem:[#allocation2 + $0x40] sm:$0xff] %v3381_v42  ;;  %v3402_v51 = vmax.f32 %v517_v43, 0.0  ;;  %v1142_v52 = vld [vmem:[#allocation2 + $0xf] sm:$0xff]  ;;  %vm651_vm5 = vcmp.ge.s32.totalorder %v595_v61, 1  ;;  %v3480_v43 = vsel %vm650_vm7, 1.0, %v3939_v60  ;;  %vm3545_vm14 = vcmp.lt.s32.totalorder %v595_v61, 7 }
 0x107   : > { %536 = vst [vmem:[#allocation2 + $0x30] sm:$0xff] %v3391_v47  ;;  %v3410_v56 = vmax.f32 %v509_v48, 0.0  ;;  %v3412_v57 = vld [vmem:[#allocation2 + $0x27] sm:$0xff]  ;;  %v3416_v58 = vpack.c.bf16 %v3391_v47, %v3321_v20  ;;  %v702_v59 = vmul.f32 %v2329_v45, %v1142_v52  ;;  %v1150_v7 = vmul.f32 %v3373_v38, %v1142_v52 }
 0x108   : > { %539 = vst [vmem:[#allocation2 + $0x48] sm:$0xff] %v3402_v51  ;;  %v3420_v62 = vld [vmem:[#allocation2 + $0x17] sm:$0xff]  ;;  %v3422_v63 = vld [vmem:[#allocation2 + $0x1f] sm:$0xff]  ;;  %v1153_v1 = vmul.f32 %v3396_v49, %v3412_v57  ;;  %v3428_v3 = vmul.f32 %v3389_v46, %v3412_v57  ;;  %2741 = vmatpush3.bf16.msra.mxu0 %v3053_v29  ;;  %v1311_v28 = vpack.c.bf16 %v3402_v51, %v3381_v42  ;;  %v3054_v29 = vld [vmem:[%s3934_s5 + $0x108] sm:$0xff]   ;;  %v3463_v33 = vsel %vm651_vm5, 1.0, %v3939_v60 }
 0x109   : > { %537 = vst [vmem:[#allocation2 + $0x38] sm:$0xff] %v3410_v56  ;;  %v1151_v8 = vmul.f32 %v2329_v45, %v3420_v62  ;;  %v1152_v10 = vmul.f32 %v3389_v46, %v3422_v63  ;;  %2734 = vmatprep.mubr.bf16.mxu0 %v3416_v58  ;;  %2742 = vmatprep.subr.bf16.mxu0 %v3055_v53  ;;  %v3564_v61 = vld [vmem:[#allocation2 + $0x19] sm:$0xff]  ;;  %v3077_v20 = vld [vmem:[%s3934_s5 + $0xa8] sm:$0xff]  }
 0x10a   : > { %v3440_v13 = vpack.c.bf16 %v3381_v42, %v3410_v56  ;;  %v709_v14 = vpack.c.bf16 %v702_v59, %v701_v54  ;;  %v1310_v17 = vpack.c.bf16 %v3410_v56, %v3391_v47  ;;  %v3469_v36 = vmul.f32 %v2329_v45, %v3422_v63  ;;  %v3056_v45 = vld [vmem:[%s3934_s5 + $0x110] sm:$0xff]   ;;  %v3078_v42 = vld [vmem:[%s3934_s5 + $0x168] sm:$0xff]  }
 0x10b   : > { %v1158_v23 = vpack.c.bf16 %v1151_v8, %v1150_v7  ;;  %v1159_v24 = vpack.c.bf16 %v1153_v1, %v1152_v10  ;;  %v3498_v54 = vmul.f32 %v3373_v38, %v3420_v62  ;;  %v3061_v7 = vld [vmem:[%s3934_s5 + $0x28] sm:$0xff]   ;;  %v3557_v10 = vsel %vm3508_vm9, 1.0, %v3939_v60  ;;  %v3079_v56 = vld [vmem:[%s3934_s5 + $0xb0] sm:$0xff]  }
 0x10c   : > { %2735 = vmatmul.mubr.bf16.gmra.mrb[12].mxu0 %v3440_v13  ;;  %v3537_v8 = vld [vmem:[#allocation2 + $0x21] sm:$0xff]  ;;  %v3603_v59 = vsel %vm3545_vm14, 1.0, %v3939_v60  ;;  %v704_v15 = vmul.f32 %v3396_v49, %v3422_v63  ;;  %v1459_v12 = vmul.f32 %v3562_v41, %v3564_v61 }
 0x10d   : > { %2802 = vmatprep.mubr.bf16.mxu1 %v1158_v23  ;;  %2743 = vmatpush3.bf16.msra.mxu0 %v3055_v53 }
 0x10e   : > { %2803 = vmatmul.mubr.bf16.vlgmr.msra.gmra.mrb[0].mxu1 %v1159_v24  ;;  %v3460_v32 = vld [vmem:[#allocation2 + $0x2f] sm:$0xff]  ;;  %2754 = vmatprep.mubr.bf16.mxu0 %v709_v14  ;;  %v3573_v24 = vsel %vm3523_vm11, 1.0, %v3939_v60 }
 0x10f   : > { %v3473_v37 = vmul.f32 %v3396_v49, %v3460_v32  ;;  %2811 = vmatpush3.bf16.msra.mxu1 %v3296_v0  ;;  %2744 = vmatprep.subr.bf16.mxu0 %v3057_v26  ;;  %v1149_v39 = vld [vmem:[#allocation2 + $0x47] sm:$0xff]  ;;  %v1154_v0 = vmul.f32 %v3477_v40, %v3460_v32  ;;  %v1615_v23 = vld [vmem:[#allocation2 + $0x4f] sm:$0xff]  ;;  %v706_v14 = vmul.f32 %v3480_v43, %v3460_v32  ;;  %v3066_v32 = vld [vmem:[%s3934_s5 + $0x138] sm:$0xff]  }
 0x110   : > { %2812 = vmatprep.subr.bf16.mxu1 %v3054_v29  ;;  %v3482_v44 = vld [vmem:[#allocation2 + $0x37] sm:$0xff]  ;;  %v3487_v48 = vld [vmem:[#allocation2 + $0x3f] sm:$0xff]  ;;  %v1157_v50 = vmul.f32 %v3458_v30, %v1149_v39  ;;  %v3566_v11 = vld [vmem:[#allocation2 + $0x29] sm:$0xff]  ;;  %v3618_v22 = vmul.f32 %v3458_v30, %v1615_v23  ;;  %v703_v23 = vmul.f32 %v3389_v46, %v3420_v62  ;;  %v705_v46 = vmul.f32 %v3477_v40, %v3412_v57 }
 0x111   : > { %v1155_v52 = vmul.f32 %v3480_v43, %v3482_v44  ;;  %v1156_v53 = vmul.f32 %v3463_v33, %v3487_v48  ;;  %2745 = vmatpush3.bf16.msra.mxu0 %v3057_v26  ;;  %v3578_v26 = vsel %vm3527_vm12, 1.0, %v3939_v60  ;;  %v3605_v1 = vld [vmem:[#allocation2 + $0x49] sm:$0xff]  ;;  %v3609_v38 = vmul.f32 %v3480_v43, %v3487_v48  ;;  %v985_v43 = vld [vmem:[#allocation2 + $0x11] sm:$0xff] }
 0x112   : > { %2746 = vmatprep.subr.bf16.mxu0 %v3059_v34  ;;  %v710_v62 = vpack.c.bf16 %v704_v15, %v703_v23  ;;  %v3069_v49 = vld [vmem:[%s3934_s5 + $0x88] sm:$0xff]   ;;  %v711_v63 = vpack.c.bf16 %v706_v14, %v705_v46  ;;  %v707_v57 = vmul.f32 %v3463_v33, %v3482_v44  ;;  %v3075_v23 = vld [vmem:[%s3934_s5 + $0xa0] sm:$0xff]  }
 0x113   : > { %2813 = vmatpush3.bf16.msra.mxu1 %v3054_v29  ;;  %v1160_v6 = vpack.c.bf16 %v1155_v52, %v1154_v0  ;;  %v1161_v19 = vpack.c.bf16 %v1157_v50, %v1156_v53  ;;  %v3580_v29 = vld [vmem:[#allocation2 + $0x31] sm:$0xff]  ;;  %v3584_v50 = vld [vmem:[#allocation2 + $0x41] sm:$0xff]  ;;  %v3590_v52 = vmul.f32 %v3477_v40, %v3482_v44  ;;  %v3598_v53 = vsel %vm3539_vm13, 1.0, %v3939_v60  ;;  %v984_v14 = vld [vmem:[#allocation2 + $0x9] sm:$0xff] }
 0x114   : > { %2814 = vmatprep.subr.bf16.mxu1 %v3056_v45  ;;  %v3636_v9 = vmul.f32 %v3557_v10, %v3580_v29  ;;  %v3644_v2 = vmul.f32 %v3598_v53, %v3584_v50  ;;  %v3062_v60 = vld [vmem:[%s3934_s5 + $0x128] sm:$0xff]   ;;  %v708_v40 = vmul.f32 %v3458_v30, %v3487_v48  ;;  %v992_v15 = vmul.f32 %v3573_v24, %v984_v14  ;;  %v3073_v30 = vld [vmem:[%s3934_s5 + $0x98] sm:$0xff]  }
 0x115   : > { %2806 = vmatprep.mubr.bf16.mxu1 %v1160_v6  ;;  %2747 = vmatpush3.bf16.msra.mxu0 %v3059_v34  ;;  %v3582_v34 = vld [vmem:[#allocation2 + $0x39] sm:$0xff]  ;;  %v3626_v6 = vmul.f32 %v3562_v41, %v3537_v8  ;;  %v3070_v48 = vld [vmem:[%s3934_s5 + $0x148] sm:$0xff]   ;;  %v997_v46 = vmul.f32 %v3598_v53, %v3580_v29  ;;  %v1462_v14 = vmul.f32 %v3578_v26, %v3580_v29 }
 0x116   : > { %2807 = vmatmul.mubr.bf16.gmra.mrb[4].mxu1 %v1161_v19  ;;  %2748 = vmatprep.subr.bf16.mxu0 %v3061_v7  ;;  %v3640_v21 = vmul.f32 %v3578_v26, %v3582_v34  ;;  %v3655_v19 = vmul.f32 %v3603_v59, %v3605_v1  ;;  %v998_v35 = vmul.f32 %v3603_v59, %v3582_v34 }
 0x117   : > { %2815 = vmatpush3.bf16.msra.mxu1 %v3056_v45  ;;  %2826 = vmatprep.mubr.bf16.mxu1 %v1308_v31  ;;  %v3612_v45 = vmul.f32 %v3463_v33, %v1149_v39  ;;  %v3622_v31 = vmul.f32 %v3573_v24, %v3564_v61  ;;  %v3630_v39 = vmul.f32 %v3552_v4, %v3566_v11 }
 0x118   : > { %2816 = vmatprep.subr.bf16.mxu1 %v3058_v5  ;;  %v712_v33 = vpack.c.bf16 %v708_v40, %v707_v57  ;;  %v3082_v57 = vld [vmem:[%s3934_s5 + $0x178] sm:$0xff]   ;;  %v1461_v40 = vmul.f32 %v3557_v10, %v3566_v11 }
 0x119   : > { %2749 = vmatpush3.bf16.msra.mxu0 %v3061_v7  ;;  %v3065_v7 = vld [vmem:[%s3934_s5 + $0x38] sm:$0xff]   ;;  %v1933_v0 = vpack.c.bf16 %v3636_v9, %v3630_v39  ;;  %v3113_v39 = vld [vmem:[%s3936_s7 + $0x30] sm:$0xff]  }
 0x11a   : > { %2750 = vmatprep.subr.bf16.mxu0 %v3063_v18  ;;  %v3114_v9 = vld [vmem:[%s3936_s7 + $0x38] sm:$0xff]  }
 0x11b   : > { %2817 = vmatpush3.bf16.msra.mxu1 %v3058_v5  ;;  %v3067_v5 = vld [vmem:[%s3934_s5 + $0x80] sm:$0xff]  }
 0x11c   : > { %2818 = vmatprep.subr.bf16.mxu1 %v3060_v16 }
 0x11d   : > { %2751 = vmatpush3.bf16.msra.mxu0 %v3063_v18  ;;  %v3064_v18 = vld [vmem:[%s3934_s5 + $0x130] sm:$0xff]  }
 0x11e   : > { %2752 = vmatprep.subr.bf16.mxu0 %v3065_v7 }
 0x11f   : > { %2819 = vmatpush3.bf16.msra.mxu1 %v3060_v16  ;;  %v993_v16 = vmul.f32 %v3562_v41, %v985_v43  ;;  %v3081_v41 = vld [vmem:[%s3934_s5 + $0xb8] sm:$0xff]  }
 0x120   : > { %2820 = vmatprep.subr.bf16.mxu1 %v3062_v60 }
 0x121   : > { %2753 = vmatpush3.bf16.msra.mxu0 %v3065_v7  ;;  %v3068_v7 = vld [vmem:[%s3934_s5 + $0x140] sm:$0xff]   ;;  %v1000_v44 = vpack.c.bf16 %v993_v16, %v992_v15  ;;  %v1463_v16 = vmul.f32 %v3598_v53, %v3582_v34  ;;  %v3086_v34 = vld [vmem:[%s3934_s5 + $0x198] sm:$0xff]   ;;  %v3964_v53 = vpack.c.bf16 %v3469_v36, %v3498_v54 }
 0x122   : > { %2762 = vmatprep.subr.bf16.mxu0 %v3067_v5  ;;  %v3090_v36 = vld [vmem:[%s3934_s5 + $0x1b8] sm:$0xff]   ;;  %v3091_v54 = vld [vmem:[%s3934_s5 + $0x1c0] sm:$0xff]  }
 0x123   : > { %2821 = vmatpush3.bf16.msra.mxu1 %v3062_v60  ;;  %v3071_v60 = vld [vmem:[%s3934_s5 + $0x90] sm:$0xff]  }
 0x124   : > { %2822 = vmatprep.subr.bf16.mxu1 %v3064_v18  ;;  %2755 = vmatmul.mubr.bf16.vlgmr.msra.gmra.mrb[8].mxu0 %v710_v62  ;;  %v3080_v62 = vld [vmem:[%s3934_s5 + $0x170] sm:$0xff]  }
 0x125   : > { %2758 = vmatprep.mubr.bf16.mxu0 %v711_v63  ;;  %2763 = vmatpush3.bf16.msra.mxu0 %v3067_v5  ;;  %v3072_v5 = vld [vmem:[%s3934_s5 + $0x150] sm:$0xff]  }
 0x126   : > { %2764 = vmatprep.subr.bf16.mxu0 %v3069_v49 }
 0x127   : > { %2823 = vmatpush3.bf16.msra.mxu1 %v3064_v18  ;;  %v1458_v18 = vmul.f32 %v3573_v24, %v985_v43  ;;  %v995_v24 = vmul.f32 %v3557_v10, %v3537_v8  ;;  %v3084_v10 = vld [vmem:[%s3934_s5 + $0x188] sm:$0xff]  }
 0x128   : > { %2824 = vmatprep.subr.bf16.mxu1 %v3066_v32 }
 0x129   : > { %2765 = vmatpush3.bf16.msra.mxu0 %v3069_v49  ;;  %v1466_v47 = vpack.c.bf16 %v1459_v12, %v1458_v18  ;;  %v996_v49 = vmul.f32 %v3578_v26, %v3566_v11  ;;  %v1468_v11 = vpack.c.bf16 %v1463_v16, %v1462_v14  ;;  %v1464_v26 = vmul.f32 %v3603_v59, %v3584_v50  ;;  %v3088_v59 = vld [vmem:[%s3934_s5 + $0x1a8] sm:$0xff]   ;;  %v3101_v18 = vld [vmem:[%s3934_s5 + $0x210] sm:$0xff]  }
 0x12a   : > { %2766 = vmatprep.subr.bf16.mxu0 %v3071_v60 }
 0x12b   : > { %2825 = vmatpush3.bf16.msra.mxu1 %v3066_v32  ;;  %v1002_v63 = vpack.c.bf16 %v997_v46, %v996_v49  ;;  %v3963_v32 = vmov 0.0  }
 0x12c   : > { %2834 = vmatprep.subr.bf16.mxu1 %v3068_v7  ;;  %2759 = vmatmul.mubr.bf16.gmra.mrb[12].mxu0 %v712_v33  ;;  %v3752_v43 = vsel %vm676_vm15, 1.0, %v3963_v32  ;;  %v1777_v12 = vpack.c.bf16 %v3963_v32, %v3402_v51  ;;  %v3104_v51 = vld [vmem:[%s3934_s5 + $0x228] sm:$0xff]  }
 0x12d   : > { %2767 = vmatpush3.bf16.msra.mxu0 %v3071_v60  ;;  %2778 = vmatprep.mubr.bf16.mxu0 %v1000_v44  ;;  %v999_v55 = vmul.f32 %v3752_v43, %v3584_v50  ;;  %v3083_v60 = vld [vmem:[%s3934_s5 + $0x180] sm:$0xff]   ;;  %v3965_v44 = vpack.c.bf16 %v3473_v37, %v3428_v3  ;;  %v3967_v3 = vpack.c.bf16 %v3618_v22, %v3612_v45  ;;  %v3100_v22 = vld [vmem:[%s3934_s5 + $0x208] sm:$0xff]  }
 0x12e   : > { %2827 = vmatmul.mubr.bf16.vlgmr.msra.gmra.mrb[0].mxu1 %v1309_v25  ;;  %2768 = vmatprep.subr.bf16.mxu0 %v3073_v30  ;;  %v3074_v25 = vld [vmem:[%s3934_s5 + $0x158] sm:$0xff]   ;;  %v3087_v50 = vld [vmem:[%s3934_s5 + $0x1a0] sm:$0xff]  }
 0x12f   : > { %2830 = vmatprep.mubr.bf16.mxu1 %v1310_v17  ;;  %2835 = vmatpush3.bf16.msra.mxu1 %v3068_v7  ;;  %v3076_v17 = vld [vmem:[%s3934_s5 + $0x160] sm:$0xff]   ;;  %v1460_v7 = vmul.f32 %v3552_v4, %v3537_v8  ;;  %v1003_v15 = vpack.c.bf16 %v999_v55, %v998_v35  ;;  %v1465_v8 = vmul.f32 %v3752_v43, %v3605_v1  ;;  %v3089_v1 = vld [vmem:[%s3934_s5 + $0x1b0] sm:$0xff]  }
 0x130   : > { %2836 = vmatprep.subr.bf16.mxu1 %v3070_v48  ;;  %v3095_v37 = vld [vmem:[%s3934_s5 + $0x1e0] sm:$0xff]  }
 0x131   : > { %2769 = vmatpush3.bf16.msra.mxu0 %v3073_v30  ;;  %v1467_v33 = vpack.c.bf16 %v1461_v40, %v1460_v7  ;;  %v1469_v29 = vpack.c.bf16 %v1465_v8, %v1464_v26  ;;  %v3092_v30 = vld [vmem:[%s3934_s5 + $0x1c8] sm:$0xff]   ;;  %v3099_v45 = vld [vmem:[%s3934_s5 + $0x200] sm:$0xff]  }
 0x132   : > { %2770 = vmatprep.subr.bf16.mxu0 %v3075_v23 }
 0x133   : > { %2837 = vmatpush3.bf16.msra.mxu1 %v3070_v48  ;;  %v3966_v48 = vpack.c.bf16 %v3609_v38, %v3590_v52  ;;  %v3096_v52 = vld [vmem:[%s3934_s5 + $0x1e8] sm:$0xff]   ;;  %v3097_v38 = vld [vmem:[%s3934_s5 + $0x1f0] sm:$0xff]  }
 0x134   : > { %2838 = vmatprep.subr.bf16.mxu1 %v3072_v5 }
 0x135   : > { %2771 = vmatpush3.bf16.msra.mxu0 %v3075_v23  ;;  %v3093_v23 = vld [vmem:[%s3934_s5 + $0x1d0] sm:$0xff]  }
 0x136   : > { %2831 = vmatmul.mubr.bf16.gmra.mrb[4].mxu1 %v1311_v28  ;;  %2772 = vmatprep.subr.bf16.mxu0 %v3077_v20  ;;  %v994_v28 = vmul.f32 %v3552_v4, %v3564_v61  ;;  %v3085_v4 = vld [vmem:[%s3934_s5 + $0x190] sm:$0xff]  }
 0x137   : > { %2839 = vmatpush3.bf16.msra.mxu1 %v3072_v5  ;;  %2850 = vmatprep.mubr.bf16.mxu1 %v1466_v47  ;;  %v3094_v5 = vld [vmem:[%s3934_s5 + $0x1d8] sm:$0xff]  }
 0x138   : > { %2840 = vmatprep.subr.bf16.mxu1 %v3074_v25  ;;  %v1001_v61 = vpack.c.bf16 %v995_v24, %v994_v28  ;;  %v3106_v47 = vld [vmem:[%s3934_s5 + $0x238] sm:$0xff]   ;;  %v3969_v28 = vpack.c.bf16 %v3644_v2, %v3640_v21 }
 0x139   : > { %2773 = vmatpush3.bf16.msra.mxu0 %v3077_v20  ;;  %v3102_v20 = vld [vmem:[%s3934_s5 + $0x218] sm:$0xff]  }
 0x13a   : > { %2774 = vmatprep.subr.bf16.mxu0 %v3079_v56 }
 0x13b   : > { %2841 = vmatpush3.bf16.msra.mxu1 %v3074_v25  ;;  %v3105_v25 = vld [vmem:[%s3934_s5 + $0x230] sm:$0xff]  }
 0x13c   : > { %2842 = vmatprep.subr.bf16.mxu1 %v3076_v17 }
 0x13d   : > { %2775 = vmatpush3.bf16.msra.mxu0 %v3079_v56  ;;  %v3109_v56 = vld [vmem:[%s3936_s7 + $0x10] sm:$0xff]  }
 0x13e   : > { %2776 = vmatprep.subr.bf16.mxu0 %v3081_v41 }
 0x13f   : > { %2843 = vmatpush3.bf16.msra.mxu1 %v3076_v17  ;;  %v3110_v17 = vld [vmem:[%s3936_s7 + $0x18] sm:$0xff]  }
 0x140   : > { %2844 = vmatprep.subr.bf16.mxu1 %v3078_v42 }
 0x141   : > { %2777 = vmatpush3.bf16.msra.mxu0 %v3081_v41  ;;  %v1923_v41 = vld [vmem:[#allocation2 + $0x51] sm:$0xff] }
 0x142   : > { %v1931_v24 = vmul.f32 %v3752_v43, %v1923_v41 }
 0x143   : > { %2845 = vmatpush3.bf16.msra.mxu1 %v3078_v42  ;;  %v3111_v42 = vld [vmem:[%s3936_s7 + $0x20] sm:$0xff]  }
 0x144   : > { %2846 = vmatprep.subr.bf16.mxu1 %v3080_v62  ;;  %2779 = vmatmul.mubr.bf16.vlgmr.msra.gmra.mrb[8].mxu0 %v1001_v61  ;;  %v1935_v46 = vpack.c.bf16 %v1931_v24, %v3655_v19 }
 0x145   : > { %2782 = vmatprep.mubr.bf16.mxu0 %v1002_v63 }
 0x147   : > { %2847 = vmatpush3.bf16.msra.mxu1 %v3080_v62 }
 0x148   : > { %2848 = vmatprep.subr.bf16.mxu1 %v3082_v57 }
 0x14b   : > { %2849 = vmatpush3.bf16.msra.mxu1 %v3082_v57  ;;  %v2544_v57 = vld [vmem:[%s3935_s6] ss:$0 sm:$0xff] }
 0x14c   : > { %2858 = vmatprep.subr.bf16.mxu1 %v3083_v60  ;;  %2783 = vmatmul.mubr.bf16.gmra.mrb[12].mxu0 %v1003_v15 }
 0x14e   : > { %2851 = vmatmul.mubr.bf16.vlgmr.msra.gmra.mrb[0].mxu1 %v1467_v33 }
 0x14f   : > { %2854 = vmatprep.mubr.bf16.mxu1 %v1468_v11  ;;  %2859 = vmatpush3.bf16.msra.mxu1 %v3083_v60 }
 0x150   : > { %2860 = vmatprep.subr.bf16.mxu1 %v3084_v10 }
 0x153   : > { %2861 = vmatpush3.bf16.msra.mxu1 %v3084_v10 }
 0x154   : > { %2862 = vmatprep.subr.bf16.mxu1 %v3085_v4 }
 0x156   : > { %2855 = vmatmul.mubr.bf16.gmra.mrb[4].mxu1 %v1469_v29 }
 0x157   : > { %2863 = vmatpush3.bf16.msra.mxu1 %v3085_v4  ;;  %2874 = vmatprep.mubr.bf16.mxu1 %v3964_v53 }
 0x158   : > { %2864 = vmatprep.subr.bf16.mxu1 %v3086_v34 }
 0x15b   : > { %2865 = vmatpush3.bf16.msra.mxu1 %v3086_v34 }
 0x15c   : > { %2866 = vmatprep.subr.bf16.mxu1 %v3087_v50 }
 0x15f   : > { %2867 = vmatpush3.bf16.msra.mxu1 %v3087_v50 }
 0x160   : > { %2868 = vmatprep.subr.bf16.mxu1 %v3088_v59 }
 0x163   : > { %2869 = vmatpush3.bf16.msra.mxu1 %v3088_v59 }
 0x164   : > { %2870 = vmatprep.subr.bf16.mxu1 %v3089_v1 }
 0x167   : > { %2871 = vmatpush3.bf16.msra.mxu1 %v3089_v1 }
 0x168   : > { %2872 = vmatprep.subr.bf16.mxu1 %v3090_v36 }
 0x16b   : > { %2873 = vmatpush3.bf16.msra.mxu1 %v3090_v36 }
 0x16c   : > { %2882 = vmatprep.subr.bf16.mxu1 %v3091_v54 }
 0x16e   : > { %2875 = vmatmul.mubr.bf16.vlgmr.msra.gmra.mrb[0].mxu1 %v3965_v44 }
 0x16f   : > { %2878 = vmatprep.mubr.bf16.mxu1 %v3966_v48  ;;  %2883 = vmatpush3.bf16.msra.mxu1 %v3091_v54 }
 0x170   : > { %2884 = vmatprep.subr.bf16.mxu1 %v3092_v30 }
 0x173   : > { %2885 = vmatpush3.bf16.msra.mxu1 %v3092_v30 }
 0x174   : > { %2886 = vmatprep.subr.bf16.mxu1 %v3093_v23 }
 0x176   : > { %2879 = vmatmul.mubr.bf16.gmra.mrb[4].mxu1 %v3967_v3 }
 0x177   : > { %2887 = vmatpush3.bf16.msra.mxu1 %v3093_v23  ;;  %2898 = vmatprep.mubr.bf16.mxu1 %v3341_v27  ;;  %v3098_v27 = vld [vmem:[%s3934_s5 + $0x1f8] sm:$0xff]  }
 0x178   : > { %2888 = vmatprep.subr.bf16.mxu1 %v3094_v5 }
 0x17b   : > { %2889 = vmatpush3.bf16.msra.mxu1 %v3094_v5 }
 0x17c   : > { %2890 = vmatprep.subr.bf16.mxu1 %v3095_v37 }
 0x17f   : > { %2891 = vmatpush3.bf16.msra.mxu1 %v3095_v37 }
 0x180   : > { %2892 = vmatprep.subr.bf16.mxu1 %v3096_v52 }
 0x183   : > { %2893 = vmatpush3.bf16.msra.mxu1 %v3096_v52 }
 0x184   : > { %2894 = vmatprep.subr.bf16.mxu1 %v3097_v38 }
 0x187   : > { %2895 = vmatpush3.bf16.msra.mxu1 %v3097_v38 }
 0x188   : > { %2896 = vmatprep.subr.bf16.mxu1 %v3098_v27 }
 0x18b   : > { %2897 = vmatpush3.bf16.msra.mxu1 %v3098_v27 }
 0x18c   : > { %2906 = vmatprep.subr.bf16.mxu1 %v3099_v45 }
 0x18e   : > { %2899 = vmatmul.mubr.bf16.vlgmr.msra.gmra.mrb[0].mxu1 %v3416_v58  ;;  %v3968_v58 = vpack.c.bf16 %v3626_v6, %v3622_v31  ;;  %v3107_v31 = vld [vmem:[%s3936_s7] sm:$0xff]   ;;  %v3108_v6 = vld [vmem:[%s3936_s7 + $0x8] sm:$0xff]  }
 0x18f   : > { %2902 = vmatprep.mubr.bf16.mxu1 %v3440_v13  ;;  %2907 = vmatpush3.bf16.msra.mxu1 %v3099_v45  ;;  %v3103_v13 = vld [vmem:[%s3934_s5 + $0x220] sm:$0xff]  }
 0x190   : > { %2908 = vmatprep.subr.bf16.mxu1 %v3100_v22  ;;  %2930 = vmatprep.subr.bf16.mxu0 %v3107_v31 }
 0x191   : > { %2931 = vmatpush3.bf16.msra.mxu0 %v3107_v31  ;;  %v3115_v31 = vld [vmem:[%s3207_s20 + $0x10] sm:$0xff] }
 0x192   : > { %2932 = vmatprep.subr.bf16.mxu0 %v3108_v6 }
 0x193   : > { %2909 = vmatpush3.bf16.msra.mxu1 %v3100_v22 }
 0x194   : > { %2910 = vmatprep.subr.bf16.mxu1 %v3101_v18 }
 0x195   : > { %2933 = vmatpush3.bf16.msra.mxu0 %v3108_v6 }
 0x196   : > { %2903 = vmatmul.mubr.bf16.gmra.mrb[4].mxu1 %v1777_v12  ;;  %2934 = vmatprep.subr.bf16.mxu0 %v3109_v56  ;;  %v2545_v12 = vld [vmem:[%s3937_s8] ss:$0 sm:$0xff] }
 0x197   : > { %2911 = vmatpush3.bf16.msra.mxu1 %v3101_v18  ;;  %2922 = vmatprep.mubr.bf16.mxu1 %v3968_v58 }
 0x198   : > { %2912 = vmatprep.subr.bf16.mxu1 %v3102_v20 }
 0x199   : > { %2935 = vmatpush3.bf16.msra.mxu0 %v3109_v56 }
 0x19a   : > { %2936 = vmatprep.subr.bf16.mxu0 %v3110_v17 }
 0x19b   : > { %2913 = vmatpush3.bf16.msra.mxu1 %v3102_v20 }
 0x19c   : > { %2914 = vmatprep.subr.bf16.mxu1 %v3103_v13 }
 0x19d   : > { %2937 = vmatpush3.bf16.msra.mxu0 %v3110_v17  ;;  %v3116_v17 = vld [vmem:[%s3207_s20] sm:$0xff] }
 0x19e   : > { %2938 = vmatprep.subr.bf16.mxu0 %v3111_v42 }
 0x19f   : > { %2915 = vmatpush3.bf16.msra.mxu1 %v3103_v13 }
 0x1a0   : > { %2916 = vmatprep.subr.bf16.mxu1 %v3104_v51 }
 0x1a1   : > { %2939 = vmatpush3.bf16.msra.mxu0 %v3111_v42 }
 0x1a3   : > { %2917 = vmatpush3.bf16.msra.mxu1 %v3104_v51 }
 0x1a4   : > { %2918 = vmatprep.subr.bf16.mxu1 %v3105_v25 }
 0x1a7   : > { %2919 = vmatpush3.bf16.msra.mxu1 %v3105_v25 }
 0x1a8   : > { %2920 = vmatprep.subr.bf16.mxu1 %v3106_v47 }
 0x1ab   : > { %2921 = vmatpush3.bf16.msra.mxu1 %v3106_v47 }
 0x1ae   : > { %2923 = vmatmul.mubr.bf16.vlgmr.msra.gmra.mrb[0].mxu1 %v1933_v0  ;;  %v3112_v0 = vld [vmem:[%s3936_s7 + $0x28] sm:$0xff]  }
 0x1af   : > { %2926 = vmatprep.mubr.bf16.mxu1 %v3969_v28  ;;  %2940 = vmatprep.subr.bf16.mxu0 %v3112_v0  ;;  %v3117_v28 = vld [vmem:[%s3207_s20 + $0x18] sm:$0xff] }
 0x1b0   : > { %2941 = vmatpush3.bf16.msra.mxu0 %v3112_v0 }
 0x1b1   : > { %2942 = vmatprep.subr.bf16.mxu0 %v3113_v39 }
 0x1b4   : > { %2943 = vmatpush3.bf16.msra.mxu0 %v3113_v39 }
 0x1b5   : > { %2944 = vmatprep.subr.bf16.mxu0 %v3114_v9 }
 0x1b6   : > { %2927 = vmatmul.mubr.bf16.gmra.mrb[4].mxu1 %v1935_v46  ;;  %v3118_v46 = vld [vmem:[%s3207_s20 + $0x8] sm:$0xff] }
 0x1b8   : > { %2945 = vmatpush3.bf16.msra.mxu0 %v3114_v9 }
 0x217   : > { %v2780_v19 = vpop.f32.mrb[8].mxu0 }
 0x218   : > { %v1103_v21 = vpop.f32.mrb[9].mxu0 }
 0x219   : > { %v2781_v2 = vpop.f32.mrb[10].mxu0 }
 0x21a   : > { %v1106_v62 = vpop.f32.mrb[11].mxu0 }
 0x21f   : > { %v2784_v49 = vpop.f32.mrb[12].mxu0 }
 0x220   : > { %v1119_v61 = vpop.f32.mrb[13].mxu0 }
 0x221   : > { %v2785_v63 = vpop.f32.mrb[14].mxu0 }
 0x222   : > { %v1122_v32 = vpop.f32.mrb[15].mxu0 }
 0x281   : > { %v2924_v43 = vpop.f32.mrb[0].mxu1 }
 0x282   : > { %v2954_v35 = vadd.f32 %v2924_v43, %v2780_v19  ;;  %v2035_v55 = vpop.f32.mrb[1].mxu1 }
 0x283   : > { %v2955_v40 = vadd.f32 %v2035_v55, %v1103_v21  ;;  %v2925_v60 = vpop.f32.mrb[2].mxu1 }
 0x284   : > { %v2083_v14 = vadd.f32 %v2954_v35, %v2544_v57  ;;  %v2956_v16 = vadd.f32 %v2925_v60, %v2781_v2  ;;  %v2038_v7 = vpop.f32.mrb[3].mxu1  ;;  %v3121_v35 = vld [vmem:[%s3207_s20 + $0x38] sm:$0xff] }
 0x285   : > { %v2081_v15 = vadd.f32 %v2955_v40, %v2544_v57  ;;  %v2957_v33 = vadd.f32 %v2038_v7, %v1106_v62  ;;  %v3119_v62 = vld [vmem:[%s3207_s20 + $0x30] sm:$0xff]  ;;  %v3122_v40 = vld [vmem:[%s3207_s20 + $0x28] sm:$0xff] }
 0x286   : > { %v2084_v10 = vadd.f32 %v2956_v16, %v2544_v57  ;;  %v2091_v26 = vmax.f32 %v2083_v14, 0.0 }
 0x287   : > { %v2082_v11 = vadd.f32 %v2957_v33, %v2544_v57  ;;  %v2089_v4 = vmax.f32 %v2081_v15, 0.0 }
 0x288   : > { %v2092_v8 = vmax.f32 %v2084_v10, 0.0 }
 0x289   : > { %v2090_v29 = vmax.f32 %v2082_v11, 0.0  ;;  %v2928_v34 = vpop.f32.mrb[4].mxu1 }
 0x28a   : > { %v2098_v53 = vpack.c.bf16 %v2092_v8, %v2091_v26  ;;  %v2958_v50 = vadd.f32 %v2928_v34, %v2784_v49  ;;  %v2051_v59 = vpop.f32.mrb[5].mxu1 }
 0x28b   : > { %v2959_v1 = vadd.f32 %v2051_v59, %v1119_v61  ;;  %v2929_v36 = vpop.f32.mrb[6].mxu1  ;;  %v2097_v54 = vpack.c.bf16 %v2090_v29, %v2089_v4 }
 0x28c   : > { %v2087_v30 = vadd.f32 %v2958_v50, %v2544_v57  ;;  %v2960_v44 = vadd.f32 %v2929_v36, %v2785_v63  ;;  %v2054_v48 = vpop.f32.mrb[7].mxu1 }
 0x28d   : > { %v2085_v23 = vadd.f32 %v2959_v1, %v2544_v57  ;;  %v2961_v5 = vadd.f32 %v2054_v48, %v1122_v32  ;;  %2946 = vmatprep.mubr.bf16.mxu0 %v2097_v54  ;;  %v3120_v32 = vld [vmem:[%s3207_s20 + $0x20] sm:$0xff] }
 0x28e   : > { %v2088_v3 = vadd.f32 %v2960_v44, %v2544_v57  ;;  %2947 = vmatmul.mubr.bf16.vlgmr.msra.gmra.mrb[16].mxu0 %v2098_v53  ;;  %v2095_v52 = vmax.f32 %v2087_v30, 0.0 }
 0x28f   : > { %v2086_v37 = vadd.f32 %v2961_v5, %v2544_v57  ;;  %v2093_v27 = vmax.f32 %v2085_v23, 0.0 }
 0x290   : > { %v2096_v38 = vmax.f32 %v2088_v3, 0.0 }
 0x291   : > { %v2094_v45 = vmax.f32 %v2086_v37, 0.0 }
 0x292   : > { %v2100_v22 = vpack.c.bf16 %v2096_v38, %v2095_v52 }
 0x293   : > { %v2099_v18 = vpack.c.bf16 %v2094_v45, %v2093_v27 }
 0x295   : > { %2950 = vmatprep.mubr.bf16.mxu0 %v2099_v18 }
 0x296   : > { %2951 = vmatmul.mubr.bf16.gmra.mrb[20].mxu0 %v2100_v22 }
 0x361   : > { %v2948_v20 = vpop.f32.mrb[16].mxu0 }
 0x362   : > { %v2215_v58 = vadd.f32 %v2948_v20, %v2545_v12  ;;  %v2206_v13 = vpop.f32.mrb[17].mxu0 }
 0x363   : > { %v2207_v51 = vadd.f32 %v2545_v12, %v2206_v13  ;;  %v2949_v25 = vpop.f32.mrb[18].mxu0 }
 0x364   : > { %v2239_v6 = vadd.f32 %v3115_v31, %v2215_v58  ;;  %v2218_v47 = vadd.f32 %v2949_v25, %v2545_v12  ;;  %v2209_v56 = vpop.f32.mrb[19].mxu0 }
 0x365   : > { %v2237_v41 = vadd.f32 %v3116_v17, %v2207_v51  ;;  %v2210_v42 = vadd.f32 %v2545_v12, %v2209_v56 }
 0x366   : > { %2247 = vst [vmem:[%s3908_s14 + $0x10] sm:$0xff] %v2239_v6  ;;  %v2240_v24 = vadd.f32 %v3117_v28, %v2218_v47 }
 0x367   : > { %2245 = vst [vmem:[%s3908_s14] sm:$0xff] %v2237_v41  ;;  %v2238_v0 = vadd.f32 %v3118_v46, %v2210_v42 }
 0x368   : > { %2248 = vst [vmem:[%s3908_s14 + $0x18] sm:$0xff] %v2240_v24 }
 0x369   : > { %2246 = vst [vmem:[%s3908_s14 + $0x8] sm:$0xff] %v2238_v0  ;;  %v2952_v39 = vpop.f32.mrb[20].mxu0 }
 0x36a   : > { %v2231_v9 = vadd.f32 %v2952_v39, %v2545_v12  ;;  %v2222_v19 = vpop.f32.mrb[21].mxu0 }
 0x36b   : > { %v2223_v21 = vadd.f32 %v2545_v12, %v2222_v19  ;;  %v2953_v2 = vpop.f32.mrb[22].mxu0 }
 0x36c   : > { %v2243_v49 = vadd.f32 %v3119_v62, %v2231_v9  ;;  %v2234_v61 = vadd.f32 %v2953_v2, %v2545_v12  ;;  %v2225_v63 = vpop.f32.mrb[23].mxu0 }
 0x36d   : > { %v2241_v43 = vadd.f32 %v3120_v32, %v2223_v21  ;;  %v2226_v57 = vadd.f32 %v2545_v12, %v2225_v63 }
 0x36e   : > { %2251 = vst [vmem:[%s3908_s14 + $0x30] sm:$0xff] %v2243_v49  ;;  %v2244_v55 = vadd.f32 %v3121_v35, %v2234_v61 }
 0x36f   : > { %2249 = vst [vmem:[%s3908_s14 + $0x20] sm:$0xff] %v2241_v43  ;;  %v2242_v60 = vadd.f32 %v3122_v40, %v2226_v57 }
 0x370   : > { %2252 = vst [vmem:[%s3908_s14 + $0x38] sm:$0xff] %v2244_v55 }
 0x371   : > { %2250 = vst [vmem:[%s3908_s14 + $0x28] sm:$0xff] %v2242_v60 }
 0x372 PF: > { %s19_s30 = sadd.s32 1, %s3129_s30  }
 0x373   : > { %p16_p4 = scmp.ge.s32.totalorder %s19_s30, 4  }
 0x375   :  { %18 = sbr.rel (!%p16_p4) target bundleno = 1 (0x1), region = 94 }

// kernel: hourglass_apply.7
= control target key start
LH: loop header
LB: loop body
LE: loop exit
PB: predicated region body
PF: predicated region fallthrough
CT: control target
= control target key end

     0   :  { %s6252_s30 = smov 0   ;;  %s7930_s0 = inlined_call_operand.vmem [shape: f32[2,256,128], index: 0, kind: input, shape index: {}]   ;;  %s7931_s1 = inlined_call_operand.vmem [shape: f32[1,128], index: 1, kind: input, shape index: {}]   ;;  %s7932_s2 = inlined_call_operand.vmem [shape: f32[1,128], index: 2, kind: input, shape index: {}]   ;;  %s7933_s3 = inlined_call_operand.vmem [shape: bf16[128,128], index: 3, kind: input, shape index: {}]   ;;  %s7934_s4 = inlined_call_operand.vmem [shape: f32[1,128], index: 4, kind: input, shape index: {}]   ;;  %s7935_s5 = inlined_call_operand.vmem [shape: bf16[9,128,128], index: 5, kind: input, shape index: {}]   ;;  %s7936_s6 = inlined_call_operand.vmem [shape: f32[1,128], index: 6, kind: input, shape index: {}]   ;;  %s7937_s7 = inlined_call_operand.vmem [shape: bf16[128,128], index: 7, kind: input, shape index: {}]   ;;  %s7938_s8 = inlined_call_operand.vmem [shape: f32[1,128], index: 8, kind: input, shape index: {}]   ;;  %s7939_s9 = inlined_call_operand.vmem [shape: f32[2,256,128], index: 9, kind: output, shape index: {}]  }
   0x1 LB: > { %s4724_s10 = sadd.s32 4294967295, %s6198_s30   ;;  %p4728_p0 = scmp.ge.s32.totalorder %s6198_s30, 1  ;;  %s6198_s30 = sphi %s6252_s30, %s19_s30  }
   0x2   : > { %p287_p1 = scmp.lt.s32.totalorder %s6198_s30, 3 }
   0x4   : > { %p288_p2 = pnand %p4728_p0, %p287_p1 }
   0x6   : > { %291 = sbr.rel (%p288_p2) target bundleno = 1098 (0x44a), region = 56 }
   0xd   : > { %v6063_v0 = vld [vmem:[%s7933_s3] sm:$0xff]   ;;  %p323_p3 = scmp.lt.s32.totalorder %s4724_s10, 1  ;;  %v6064_v1 = vld [vmem:[%s7933_s3 + $0x8] sm:$0xff]   ;;  %v6065_v2 = vld [vmem:[%s7933_s3 + $0x10] sm:$0xff]  }
   0xe   : > { %5254 = vmatprep.subr.bf16.mxu0 %v6063_v0  ;;  %v6066_v3 = vld [vmem:[%s7933_s3 + $0x18] sm:$0xff]   ;;  %v6287_v6 = vld [vmem:[%s7931_s1] ss:$0 sm:$0xff]  ;;  %v6068_v38 = vld [vmem:[%s7933_s3 + $0x28] sm:$0xff]  }
   0xf   : > { %s8256_s10 = smov (!%p323_p3, %s4724_s10), 1  ;;  %5255 = vmatpush3.bf16.msra.mxu0 %v6063_v0  ;;  %v6294_v9 = vld [vmem:[%s7932_s2] ss:$0 sm:$0xff]  ;;  %v6069_v49 = vld [vmem:[%s7933_s3 + $0x30] sm:$0xff]  }
  0x10   : > { %5256 = vmatprep.subr.bf16.mxu0 %v6064_v1  ;;  %s4988_s17 = sshll.u32 %s8256_s10, 8  ;;  %v6067_v21 = vld [vmem:[%s7933_s3 + $0x20] sm:$0xff]  }
  0x11   : > { %s6277_s20 = scalar_lea.vmem %s7930_s0, %s4988_s17  ;;  %s7830_s13 = scalar_lea.vmem %s7939_s9, %s4988_s17 }
  0x12   : > { %v334_v4 = vld [vmem:[%s6277_s20] sm:$0xff]  ;;  %v335_v5 = vld [vmem:[%s6277_s20 + $0x8] sm:$0xff]  ;;  %v336_v10 = vld [vmem:[%s6277_s20 + $0x10] sm:$0xff] }
  0x13   : > { %5257 = vmatpush3.bf16.msra.mxu0 %v6064_v1  ;;  %v373_v7 = vmul.f32 %v6287_v6, %v334_v4  ;;  %v374_v8 = vmul.f32 %v6287_v6, %v335_v5  ;;  %v337_v11 = vld [vmem:[%s6277_s20 + $0x18] sm:$0xff]  ;;  %v375_v12 = vmul.f32 %v6287_v6, %v336_v10  ;;  %v338_v14 = vld [vmem:[%s6277_s20 + $0x20] sm:$0xff]  ;;  %v339_v15 = vld [vmem:[%s6277_s20 + $0x28] sm:$0xff] }
  0x14   : > { %5258 = vmatprep.subr.bf16.mxu0 %v6065_v2  ;;  %v376_v13 = vmul.f32 %v6287_v6, %v337_v11  ;;  %v340_v16 = vld [vmem:[%s6277_s20 + $0x30] sm:$0xff]  ;;  %v377_v19 = vmul.f32 %v6287_v6, %v338_v14  ;;  %v341_v20 = vld [vmem:[%s6277_s20 + $0x38] sm:$0xff]  ;;  %v378_v24 = vmul.f32 %v6287_v6, %v339_v15  ;;  %v342_v25 = vld [vmem:[%s6277_s20 + $0x40] sm:$0xff] }
  0x15   : > { %v412_v17 = vadd.f32 %v6294_v9, %v373_v7  ;;  %v413_v18 = vadd.f32 %v6294_v9, %v374_v8  ;;  %v6311_v22 = vadd.f32 %v6294_v9, %v375_v12  ;;  %v379_v28 = vmul.f32 %v6287_v6, %v340_v16  ;;  %v343_v30 = vld [vmem:[%s6277_s20 + $0x48] sm:$0xff]  ;;  %v344_v31 = vld [vmem:[%s6277_s20 + $0x50] sm:$0xff]  ;;  %v345_v32 = vld [vmem:[%s6277_s20 + $0x58] sm:$0xff] }
  0x16   : > { %v6314_v23 = vadd.f32 %v6294_v9, %v376_v13  ;;  %v380_v29 = vmul.f32 %v6287_v6, %v341_v20  ;;  %v6324_v34 = vadd.f32 %v6294_v9, %v377_v19  ;;  %v381_v35 = vmul.f32 %v6287_v6, %v342_v25  ;;  %v346_v36 = vld [vmem:[%s6277_s20 + $0x60] sm:$0xff]  ;;  %v347_v37 = vld [vmem:[%s6277_s20 + $0x68] sm:$0xff]  ;;  %v348_v43 = vld [vmem:[%s6277_s20 + $0x70] sm:$0xff] }
  0x17   : > { %5259 = vmatpush3.bf16.msra.mxu0 %v6065_v2  ;;  %v444_v26 = vmax.f32 %v412_v17, 0.0  ;;  %v445_v27 = vmax.f32 %v413_v18, 0.0  ;;  %v446_v39 = vmax.f32 %v6311_v22, 0.0  ;;  %v6335_v41 = vadd.f32 %v6294_v9, %v378_v24  ;;  %v349_v48 = vld [vmem:[%s6277_s20 + $0x78] sm:$0xff]  ;;  %v350_v54 = vld [vmem:[%s6277_s20 + $0x80] sm:$0xff]  ;;  %v351_v55 = vld [vmem:[%s6277_s20 + $0x88] sm:$0xff] }
  0x18   : > { %5260 = vmatprep.subr.bf16.mxu0 %v6066_v3  ;;  %v447_v40 = vmax.f32 %v6314_v23, 0.0  ;;  %v382_v42 = vmul.f32 %v6287_v6, %v343_v30  ;;  %v6340_v44 = vadd.f32 %v6294_v9, %v379_v28  ;;  %v6343_v45 = vadd.f32 %v6294_v9, %v380_v29  ;;  %v352_v60 = vld [vmem:[%s6277_s20 + $0x90] sm:$0xff]  ;;  %v353_v61 = vld [vmem:[%s6277_s20 + $0x98] sm:$0xff]  ;;  %v354_v1 = vld [vmem:[%s6277_s20 + $0xa0] sm:$0xff] }
  0x19   : > { %v476_v33 = vpack.c.bf16 %v445_v27, %v444_v26  ;;  %v383_v46 = vmul.f32 %v6287_v6, %v344_v31  ;;  %v384_v47 = vmul.f32 %v6287_v6, %v345_v32  ;;  %v6352_v50 = vadd.f32 %v6294_v9, %v381_v35  ;;  %v355_v5 = vld [vmem:[%s6277_s20 + $0xa8] sm:$0xff]  ;;  %v356_v7 = vld [vmem:[%s6277_s20 + $0xb0] sm:$0xff]  ;;  %v6070_v8 = vld [vmem:[%s7933_s3 + $0x38] sm:$0xff]  }
  0x1a   : > { %v6355_v51 = vadd.f32 %v6294_v9, %v382_v42  ;;  %v385_v52 = vmul.f32 %v6287_v6, %v346_v36  ;;  %v386_v53 = vmul.f32 %v6287_v6, %v347_v37  ;;  %v448_v56 = vmax.f32 %v6324_v34, 0.0  ;;  %v357_v13 = vld [vmem:[%s6277_s20 + $0xb8] sm:$0xff]  ;;  %v358_v24 = vld [vmem:[%s6277_s20 + $0xc0] sm:$0xff]  ;;  %v359_v29 = vld [vmem:[%s6277_s20 + $0xc8] sm:$0xff] }
  0x1b   : > { %5261 = vmatpush3.bf16.msra.mxu0 %v6066_v3  ;;  %5270 = vmatprep.mubr.bf16.mxu0 %v476_v33  ;;  %v6363_v57 = vadd.f32 %v6294_v9, %v383_v46  ;;  %v6366_v58 = vadd.f32 %v6294_v9, %v384_v47  ;;  %v387_v59 = vmul.f32 %v6287_v6, %v348_v43  ;;  %v449_v62 = vmax.f32 %v6335_v41, 0.0  ;;  %v360_v33 = vld [vmem:[%s6277_s20 + $0xd0] sm:$0xff]  ;;  %v361_v34 = vld [vmem:[%s6277_s20 + $0xd8] sm:$0xff]  ;;  %v362_v41 = vld [vmem:[%s6277_s20 + $0xe0] sm:$0xff] }
  0x1c   : > { %5262 = vmatprep.subr.bf16.mxu0 %v6067_v21  ;;  %v6373_v63 = vadd.f32 %v6294_v9, %v385_v52  ;;  %v388_v0 = vmul.f32 %v6287_v6, %v349_v48  ;;  %v450_v2 = vmax.f32 %v6340_v44, 0.0  ;;  %v451_v3 = vmax.f32 %v6343_v45, 0.0  ;;  %v363_v42 = vld [vmem:[%s6277_s20 + $0xe8] sm:$0xff]  ;;  %v6071_v43 = vld [vmem:[%s7935_s5 + $0x40] sm:$0xff]   ;;  %v364_v52 = vld [vmem:[%s6277_s20 + $0xf0] sm:$0xff] }
  0x1d   : > { %v389_v4 = vmul.f32 %v6287_v6, %v350_v54  ;;  %v452_v10 = vmax.f32 %v6352_v50, 0.0  ;;  %v453_v11 = vmax.f32 %v6355_v51, 0.0  ;;  %v6388_v12 = vadd.f32 %v6294_v9, %v386_v53 }
  0x1e   : > { %v454_v14 = vmax.f32 %v6363_v57, 0.0  ;;  %v455_v15 = vmax.f32 %v6366_v58, 0.0  ;;  %v6394_v16 = vadd.f32 %v6294_v9, %v387_v59  ;;  %v390_v17 = vmul.f32 %v6287_v6, %v351_v55  ;;  %v365_v59 = vld [vmem:[%s6277_s20 + $0xf8] sm:$0xff] }
  0x1f   : > { %5263 = vmatpush3.bf16.msra.mxu0 %v6067_v21  ;;  %v456_v18 = vmax.f32 %v6373_v63, 0.0  ;;  %v6399_v19 = vadd.f32 %v6294_v9, %v388_v0  ;;  %v391_v20 = vmul.f32 %v6287_v6, %v352_v60  ;;  %v392_v21 = vmul.f32 %v6287_v6, %v353_v61  ;;  %v6072_v61 = vld [vmem:[%s7935_s5 + $0x48] sm:$0xff]  }
  0x20   : > { %5264 = vmatprep.subr.bf16.mxu0 %v6068_v38  ;;  %v6405_v25 = vadd.f32 %v6294_v9, %v389_v4  ;;  %v6408_v26 = vadd.f32 %v6294_v9, %v390_v17  ;;  %v393_v27 = vmul.f32 %v6287_v6, %v354_v1  ;;  %v394_v28 = vmul.f32 %v6287_v6, %v355_v5 }
  0x21   : > { %v6414_v30 = vadd.f32 %v6294_v9, %v391_v20  ;;  %v6417_v31 = vadd.f32 %v6294_v9, %v392_v21  ;;  %v395_v32 = vmul.f32 %v6287_v6, %v356_v7  ;;  %v457_v35 = vmax.f32 %v6388_v12, 0.0  ;;  %v6078_v12 = vld [vmem:[%s7935_s5 + $0x78] sm:$0xff]  }
  0x22   : > { %v6424_v36 = vadd.f32 %v6294_v9, %v393_v27  ;;  %v6427_v37 = vadd.f32 %v6294_v9, %v394_v28  ;;  %v477_v46 = vpack.c.bf16 %v447_v40, %v446_v39  ;;  %v458_v47 = vmax.f32 %v6394_v16, 0.0  ;;  %v6073_v28 = vld [vmem:[%s7935_s5 + $0x50] sm:$0xff]   ;;  %v6079_v16 = vld [vmem:[%s7935_s5 + $0xc0] sm:$0xff]  }
  0x23   : > { %5265 = vmatpush3.bf16.msra.mxu0 %v6068_v38  ;;  %v396_v38 = vmul.f32 %v6287_v6, %v357_v13  ;;  %v459_v48 = vmax.f32 %v6399_v19, 0.0  ;;  %v460_v53 = vmax.f32 %v6405_v25, 0.0  ;;  %v461_v54 = vmax.f32 %v6408_v26, 0.0  ;;  %5782 = vmatprep.subr.bf16.mxu1 %v6079_v16  ;;  %v6081_v19 = vld [vmem:[%s7935_s5 + $0xd0] sm:$0xff]  }
  0x24   : > { %5266 = vmatprep.subr.bf16.mxu0 %v6069_v49  ;;  %v397_v22 = vmul.f32 %v6287_v6, %v358_v24  ;;  %v478_v23 = vpack.c.bf16 %v449_v62, %v448_v56  ;;  %v462_v39 = vmax.f32 %v6414_v30, 0.0  ;;  %v463_v40 = vmax.f32 %v6417_v31, 0.0  ;;  %5790 = vmatpush3.bf16.msra.mxu1 %v6079_v16 }
  0x25   : > { %v6448_v55 = vadd.f32 %v6294_v9, %v396_v38  ;;  %v398_v60 = vmul.f32 %v6287_v6, %v359_v29  ;;  %v464_v0 = vmax.f32 %v6424_v36, 0.0  ;;  %v465_v1 = vmax.f32 %v6427_v37, 0.0 }
  0x26   : > { %v399_v4 = vmul.f32 %v6287_v6, %v360_v33  ;;  %v400_v5 = vmul.f32 %v6287_v6, %v361_v34  ;;  %v401_v7 = vmul.f32 %v6287_v6, %v362_v41  ;;  %v402_v13 = vmul.f32 %v6287_v6, %v363_v42 }
  0x27   : > { %5267 = vmatpush3.bf16.msra.mxu0 %v6069_v49  ;;  %v6442_v49 = vadd.f32 %v6294_v9, %v395_v32  ;;  %v467_v62 = vmax.f32 %v6448_v55, 0.0  ;;  %v436_v17 = vadd.f32 %v6294_v9, %v397_v22  ;;  %v403_v21 = vmul.f32 %v6287_v6, %v364_v52  ;;  %v6087_v52 = vld [vmem:[%s7935_s5] sm:$0xff]  }
  0x28   : > { %5268 = vmatprep.subr.bf16.mxu0 %v6070_v8  ;;  %v439_v20 = vadd.f32 %v6294_v9, %v400_v5  ;;  %v437_v24 = vadd.f32 %v6294_v9, %v398_v60  ;;  %v440_v25 = vadd.f32 %v6294_v9, %v401_v7  ;;  %v441_v26 = vadd.f32 %v6294_v9, %v402_v13  ;;  %v6551_v55 = vld [vmem:[%s7935_s5 + $0x100] sm:$0xff]  }
  0x29   : > { %v466_v56 = vmax.f32 %v6442_v49, 0.0  ;;  %v404_v27 = vmul.f32 %v6287_v6, %v365_v59  ;;  %v442_v31 = vadd.f32 %v6294_v9, %v403_v21  ;;  %v468_v36 = vmax.f32 %v436_v17, 0.0  ;;  %v6557_v22 = vld [vmem:[%s7934_s4] ss:$0 sm:$0xff] }
  0x2a   : > { %v471_v30 = vmax.f32 %v439_v20, 0.0  ;;  %v472_v32 = vmax.f32 %v440_v25, 0.0  ;;  %v473_v33 = vmax.f32 %v441_v26, 0.0  ;;  %v479_v6 = vpack.c.bf16 %v451_v3, %v450_v2  ;;  %v6075_v3 = vld [vmem:[%s7935_s5 + $0x60] sm:$0xff]  }
  0x2b   : > { %5269 = vmatpush3.bf16.msra.mxu0 %v6070_v8  ;;  %v438_v8 = vadd.f32 %v6294_v9, %v399_v4  ;;  %v443_v34 = vadd.f32 %v6294_v9, %v404_v27  ;;  %v474_v38 = vmax.f32 %v442_v31, 0.0  ;;  %v469_v41 = vmax.f32 %v437_v24, 0.0  ;;  %v6089_v24 = vld [vmem:[%s7935_s5 + $0x8] sm:$0xff]  }
  0x2c   : > { %5302 = vmatprep.subr.bf16.mxu0 %v6071_v43  ;;  %v490_v42 = vpack.c.bf16 %v473_v33, %v472_v32  ;;  %v480_v9 = vpack.c.bf16 %v453_v11, %v452_v10  ;;  %v481_v44 = vpack.c.bf16 %v455_v15, %v454_v14  ;;  %v482_v45 = vpack.c.bf16 %v457_v35, %v456_v18  ;;  %v6076_v10 = vld [vmem:[%s7935_s5 + $0x68] sm:$0xff]   ;;  %v6077_v11 = vld [vmem:[%s7935_s5 + $0x70] sm:$0xff]   ;;  %v6082_v35 = vld [vmem:[%s7935_s5 + $0xd8] sm:$0xff]  }
  0x2d   : > { %v470_v29 = vmax.f32 %v438_v8, 0.0  ;;  %v483_v50 = vpack.c.bf16 %v459_v48, %v458_v47  ;;  %v484_v51 = vpack.c.bf16 %v461_v54, %v460_v53  ;;  %v485_v57 = vpack.c.bf16 %v463_v40, %v462_v39  ;;  %v6080_v18 = vld [vmem:[%s7935_s5 + $0xc8] sm:$0xff]   ;;  %v6083_v47 = vld [vmem:[%s7935_s5 + $0xe0] sm:$0xff]   ;;  %v6085_v53 = vld [vmem:[%s7935_s5 + $0xf0] sm:$0xff]  }
  0x2e   : > { %5271 = vmatmul.mubr.bf16.vlgmr.msra.gmra.mrb[0].mxu0 %v477_v46  ;;  %v475_v46 = vmax.f32 %v443_v34, 0.0  ;;  %v486_v2 = vpack.c.bf16 %v465_v1, %v464_v0  ;;  %v487_v58 = vpack.c.bf16 %v467_v62, %v466_v56  ;;  %v488_v63 = vpack.c.bf16 %v469_v41, %v468_v36  ;;  %5783 = vmatprep.subr.bf16.mxu1 %v6080_v18  ;;  %v6084_v48 = vld [vmem:[%s7935_s5 + $0xe8] sm:$0xff]   ;;  %v6086_v54 = vld [vmem:[%s7935_s5 + $0xf8] sm:$0xff]  }
  0x2f   : > { %5274 = vmatprep.mubr.bf16.mxu0 %v478_v23  ;;  %5303 = vmatpush3.bf16.msra.mxu0 %v6071_v43  ;;  %v489_v37 = vpack.c.bf16 %v471_v30, %v470_v29  ;;  %v6074_v43 = vld [vmem:[%s7935_s5 + $0x58] sm:$0xff]   ;;  %v7942_v14 = vmov 0.0   ;;  %v6201_v15 = vmov 0.0|0.0   ;;  %v796_v59 = vlaneseq }
  0x30   : > { %5304 = vmatprep.subr.bf16.mxu0 %v6072_v61  ;;  %v491_v49 = vpack.c.bf16 %v475_v46, %v474_v38  ;;  %756 = vst [vmem:[#allocation2] sm:$0xff] %v7942_v14  ;;  %758 = vst [vmem:[#allocation2 + $0x10] sm:$0xff] %v7942_v14  ;;  %5791 = vmatpush3.bf16.msra.mxu1 %v6080_v18  ;;  %v6091_v38 = vld [vmem:[%s7935_s5 + $0x10] sm:$0xff]  }
  0x31   : > { %759 = vst [vmem:[#allocation2 + $0x18] sm:$0xff] %v7942_v14  ;;  %757 = vst [vmem:[#allocation2 + $0x8] sm:$0xff] %v7942_v14  ;;  %5784 = vmatprep.subr.bf16.mxu1 %v6081_v19  ;;  %v6561_v0 = vshrl.u32 %v796_v59, 7 }
  0x32   : > { %760 = vst [vmem:[#allocation2 + $0x120] sm:$0xff] %v7942_v14  ;;  %761 = vst [vmem:[#allocation2 + $0x128] sm:$0xff] %v7942_v14 }
  0x33   : > { %5305 = vmatpush3.bf16.msra.mxu0 %v6072_v61  ;;  %762 = vst [vmem:[#allocation2 + $0x130] sm:$0xff] %v7942_v14  ;;  %v833_v7 = vand.u32 15, %v6561_v0  ;;  %v799_v29 = vadd.s32 16, %v6561_v0  ;;  %v801_v34 = vadd.s32 32, %v6561_v0  ;;  %v805_v16 = vadd.s32 64, %v6561_v0 }
  0x34   : > { %5306 = vmatprep.subr.bf16.mxu0 %v6073_v28  ;;  %5792 = vmatpush3.bf16.msra.mxu1 %v6081_v19  ;;  %v803_v59 = vadd.s32 48, %v6561_v0 }
  0x35   : > { %5785 = vmatprep.subr.bf16.mxu1 %v6082_v35  ;;  %vm1213_vm0 = vcmp.ge.s32.totalorder %v833_v7, 1  ;;  %v847_v46 = vand.u32 15, %v799_v29 }
  0x36   : > { %5275 = vmatmul.mubr.bf16.gmra.mrb[4].mxu0 %v479_v6  ;;  %v6580_v33 = vsel %vm1213_vm0, 1.0, %v7942_v14 }
  0x37   : > { %5278 = vmatprep.mubr.bf16.mxu0 %v480_v9  ;;  %5307 = vmatpush3.bf16.msra.mxu0 %v6073_v28  ;;  %8033 = vst [vmem:[#allocation3_spill] sm:$0xff] %v6580_v33  ;;  %vm6607_vm1 = vcmp.ge.s32.totalorder %v847_v46, 1 }
  0x38   : > { %5308 = vmatprep.subr.bf16.mxu0 %v6074_v43  ;;  %5793 = vmatpush3.bf16.msra.mxu1 %v6082_v35  ;;  %v6095_v35 = vld [vmem:[%s7935_s5 + $0x20] sm:$0xff]  }
  0x39   : > { %5786 = vmatprep.subr.bf16.mxu1 %v6083_v47 }
  0x3b   : > { %5309 = vmatpush3.bf16.msra.mxu0 %v6074_v43 }
  0x3c   : > { %5310 = vmatprep.subr.bf16.mxu0 %v6075_v3  ;;  %5794 = vmatpush3.bf16.msra.mxu1 %v6083_v47 }
  0x3d   : > { %5787 = vmatprep.subr.bf16.mxu1 %v6084_v48 }
  0x3e   : > { %5279 = vmatmul.mubr.bf16.gmra.mrb[8].mxu0 %v481_v44  ;;  %v861_v44 = vand.u32 15, %v801_v34  ;;  %v6099_v34 = vld [vmem:[%s7935_s5 + $0x30] sm:$0xff]  }
  0x3f   : > { %5282 = vmatprep.mubr.bf16.mxu0 %v482_v45  ;;  %5311 = vmatpush3.bf16.msra.mxu0 %v6075_v3 }
  0x40   : > { %5312 = vmatprep.subr.bf16.mxu0 %v6076_v10  ;;  %5795 = vmatpush3.bf16.msra.mxu1 %v6084_v48  ;;  %vm1217_vm2 = vcmp.ge.s32.totalorder %v861_v44, 1 }
  0x41   : > { %5788 = vmatprep.subr.bf16.mxu1 %v6085_v53 }
  0x43   : > { %5313 = vmatpush3.bf16.msra.mxu0 %v6076_v10 }
  0x44   : > { %5314 = vmatprep.subr.bf16.mxu0 %v6077_v11  ;;  %5796 = vmatpush3.bf16.msra.mxu1 %v6085_v53  ;;  %v6623_v53 = vsel %vm6607_vm1, 1.0, %v7942_v14 }
  0x45   : > { %5789 = vmatprep.subr.bf16.mxu1 %v6086_v54  ;;  %8038 = vst [vmem:[#allocation6_spill] sm:$0xff] %v6623_v53 }
  0x46   : > { %5283 = vmatmul.mubr.bf16.gmra.mrb[12].mxu0 %v483_v50 }
  0x47   : > { %5286 = vmatprep.mubr.bf16.mxu0 %v484_v51  ;;  %5315 = vmatpush3.bf16.msra.mxu0 %v6077_v11  ;;  %v6093_v51 = vld [vmem:[%s7935_s5 + $0x18] sm:$0xff]  }
  0x48   : > { %5316 = vmatprep.subr.bf16.mxu0 %v6078_v12  ;;  %5797 = vmatpush3.bf16.msra.mxu1 %v6086_v54  ;;  %v6626_v54 = vsel %vm1217_vm2, 1.0, %v7942_v14 }
  0x49   : > { %5494 = vmatprep.subr.bf16.mxu1 %v6551_v55 }
  0x4b   : > { %5317 = vmatpush3.bf16.msra.mxu0 %v6078_v12 }
  0x4c   : > { %5350 = vmatprep.subr.bf16.mxu0 %v6087_v52 }
  0x4e   : > { %5287 = vmatmul.mubr.bf16.gmra.mrb[16].mxu0 %v485_v57 }
  0x4f   : > { %5290 = vmatprep.mubr.bf16.mxu0 %v486_v2 }
  0x56   : > { %5291 = vmatmul.mubr.bf16.gmra.mrb[20].mxu0 %v487_v58 }
  0x57   : > { %5294 = vmatprep.mubr.bf16.mxu0 %v488_v63 }
  0x5e   : > { %5295 = vmatmul.mubr.bf16.gmra.mrb[24].mxu0 %v489_v37 }
  0x5f   : > { %5298 = vmatprep.mubr.bf16.mxu0 %v490_v42 }
  0x66   : > { %5299 = vmatmul.mubr.bf16.gmra.mrb[28].mxu0 %v491_v49 }
  0x67   : > { %5318 = vmatprep.mubr.bf16.mxu0 %v6201_v15 }
 0x101   : > { %v5272_v23 = vpop.f32.mrb[0].mxu0 }
 0x102   : > { %v606_v39 = vadd.f32 %v5272_v23, %v6557_v22  ;;  %v597_v40 = vpop.f32.mrb[1].mxu0 }
 0x103   : > { %v598_v60 = vadd.f32 %v6557_v22, %v597_v40  ;;  %v5273_v61 = vpop.f32.mrb[2].mxu0  ;;  %v889_v40 = vand.u32 15, %v805_v16 }
 0x104   : > { %v726_v1 = vmax.f32 %v606_v39, 0.0  ;;  %v609_v4 = vadd.f32 %v5273_v61, %v6557_v22  ;;  %v600_v5 = vpop.f32.mrb[3].mxu0 }
 0x105   : > { %v724_v56 = vmax.f32 %v598_v60, 0.0  ;;  %v601_v62 = vadd.f32 %v6557_v22, %v600_v5  ;;  %v6097_v5 = vld [vmem:[%s7935_s5 + $0x28] sm:$0xff]   ;;  %vm1221_vm3 = vcmp.ge.s32.totalorder %v889_v40, 1 }
 0x106   : > { %766 = vst [vmem:[#allocation2 + $0x30] sm:$0xff] %v726_v1  ;;  %v727_v13 = vmax.f32 %v609_v4, 0.0 }
 0x107   : > { %764 = vst [vmem:[#allocation2 + $0x20] sm:$0xff] %v724_v56  ;;  %v725_v17 = vmax.f32 %v601_v62, 0.0 }
 0x108   : > { %767 = vst [vmem:[#allocation2 + $0x38] sm:$0xff] %v727_v13  ;;  %v6566_v8 = vpack.c.bf16 %v727_v13, %v726_v1 }
 0x109   : > { %765 = vst [vmem:[#allocation2 + $0x28] sm:$0xff] %v725_v17  ;;  %v5276_v20 = vpop.f32.mrb[4].mxu0  ;;  %v6568_v21 = vpack.c.bf16 %v725_v17, %v724_v56  ;;  %v807_v56 = vadd.s32 80, %v6561_v0 }
 0x10a   : > { %v622_v25 = vadd.f32 %v5276_v20, %v6557_v22  ;;  %v613_v26 = vpop.f32.mrb[5].mxu0 }
 0x10b   : > { %v614_v27 = vadd.f32 %v6557_v22, %v613_v26  ;;  %v5277_v28 = vpop.f32.mrb[6].mxu0  ;;  %5319 = vmatmul.mubr.bf16.vlgmr.msra.gmra.mrb[32].mxu0 %v6568_v21 }
 0x10c   : > { %v730_v30 = vmax.f32 %v622_v25, 0.0  ;;  %v625_v31 = vadd.f32 %v5277_v28, %v6557_v22  ;;  %v616_v32 = vpop.f32.mrb[7].mxu0  ;;  %5322 = vmatprep.mubr.bf16.mxu0 %v6566_v8  ;;  %5351 = vmatpush3.bf16.msra.mxu0 %v6087_v52 }
 0x10d   : > { %v728_v36 = vmax.f32 %v614_v27, 0.0  ;;  %v617_v37 = vadd.f32 %v6557_v22, %v616_v32  ;;  %5352 = vmatprep.subr.bf16.mxu0 %v6089_v24 }
 0x10e   : > { %770 = vst [vmem:[#allocation2 + $0x50] sm:$0xff] %v730_v30  ;;  %v731_v6 = vmax.f32 %v625_v31, 0.0  ;;  %v6587_v41 = vld [vmem:[#allocation2 + $0x1f] sm:$0xff] }
 0x10f   : > { %768 = vst [vmem:[#allocation2 + $0x40] sm:$0xff] %v728_v36  ;;  %v729_v42 = vmax.f32 %v617_v37, 0.0  ;;  %v6591_v43 = vmul.f32 %v6580_v33, %v6587_v41 }
 0x110   : > { %771 = vst [vmem:[#allocation2 + $0x58] sm:$0xff] %v731_v6  ;;  %v6593_v9 = vpack.c.bf16 %v731_v6, %v730_v30  ;;  %5353 = vmatpush3.bf16.msra.mxu0 %v6089_v24  ;;  %v6595_v49 = vld [vmem:[#allocation2 + $0x27] sm:$0xff]  ;;  %v875_v24 = vand.u32 15, %v803_v59  ;;  %v809_v30 = vadd.s32 96, %v6561_v0 }
 0x111   : > { %8034 = vst [vmem:[#allocation4_spill] sm:$0xff] %v6591_v43  ;;  %8035 = vst [vmem:[#allocation5_spill] sm:$0xff] %v6595_v49  ;;  %v5280_v45 = vpop.f32.mrb[8].mxu0  ;;  %v6597_v50 = vpack.c.bf16 %v729_v42, %v728_v36  ;;  %5354 = vmatprep.subr.bf16.mxu0 %v6091_v38  ;;  %v903_v36 = vand.u32 15, %v807_v56  ;;  %v815_v56 = vadd.s32 144, %v6561_v0 }
 0x112   : > { %769 = vst [vmem:[#allocation2 + $0x48] sm:$0xff] %v729_v42  ;;  %v638_v57 = vadd.f32 %v5280_v45, %v6557_v22  ;;  %v629_v2 = vpop.f32.mrb[9].mxu0  ;;  %v811_v42 = vadd.s32 112, %v6561_v0  ;;  %vm6670_vm4 = vcmp.ge.s32.totalorder %v875_v24, 1  ;;  %v6675_v45 = vsel %vm1221_vm3, 1.0, %v7942_v14 }
 0x113   : > { %v630_v63 = vadd.f32 %v6557_v22, %v629_v2  ;;  %v5281_v3 = vpop.f32.mrb[10].mxu0  ;;  %5323 = vmatmul.mubr.bf16.gmra.mrb[36].mxu0 %v6597_v50  ;;  %vm6694_vm5 = vcmp.ge.s32.totalorder %v903_v36, 1  ;;  %v959_v44 = vand.u32 15, %v815_v56 }
 0x114   : > { %v734_v11 = vmax.f32 %v638_v57, 0.0  ;;  %v641_v12 = vadd.f32 %v5281_v3, %v6557_v22  ;;  %v632_v15 = vpop.f32.mrb[11].mxu0  ;;  %5326 = vmatprep.mubr.bf16.mxu0 %v6593_v9  ;;  %5355 = vmatpush3.bf16.msra.mxu0 %v6091_v38  ;;  %v931_v40 = vand.u32 15, %v811_v42 }
 0x115   : > { %v732_v18 = vmax.f32 %v630_v63, 0.0  ;;  %v633_v19 = vadd.f32 %v6557_v22, %v632_v15  ;;  %5356 = vmatprep.subr.bf16.mxu0 %v6093_v51  ;;  %v917_v63 = vand.u32 15, %v809_v30  ;;  %v6101_v15 = vld [vmem:[%s7935_s5 + $0x38] sm:$0xff]   ;;  %v6730_v30 = vld [vmem:[%s7935_s5 + $0x80] sm:$0xff]   ;;  %vm6798_vm9 = vcmp.ge.s32.totalorder %v959_v44, 1 }
 0x116   : > { %774 = vst [vmem:[#allocation2 + $0x70] sm:$0xff] %v734_v11  ;;  %v735_v47 = vmax.f32 %v641_v12, 0.0  ;;  %v6618_v48 = vld [vmem:[#allocation2 + $0x3f] sm:$0xff]  ;;  %vm6749_vm7 = vcmp.ge.s32.totalorder %v931_v40, 1 }
 0x117   : > { %772 = vst [vmem:[#allocation2 + $0x60] sm:$0xff] %v732_v18  ;;  %v733_v52 = vmax.f32 %v633_v19, 0.0  ;;  %v6635_v60 = vmul.f32 %v6626_v54, %v6618_v48  ;;  %v6639_v61 = vmul.f32 %v6623_v53, %v6618_v48  ;;  %vm1225_vm6 = vcmp.ge.s32.totalorder %v917_v63, 1 }
 0x118   : > { %775 = vst [vmem:[#allocation2 + $0x78] sm:$0xff] %v735_v47  ;;  %v6629_v23 = vpack.c.bf16 %v735_v47, %v734_v11  ;;  %5357 = vmatpush3.bf16.msra.mxu0 %v6093_v51  ;;  %v6677_v51 = vld [vmem:[#allocation2 + $0x57] sm:$0xff]  ;;  %v813_v47 = vadd.s32 128, %v6561_v0  ;;  %v6745_v63 = vsel %vm1225_vm6, 1.0, %v7942_v14 }
 0x119   : > { %v6631_v39 = vld [vmem:[#allocation2 + $0x47] sm:$0xff]  ;;  %8040 = vst [vmem:[#allocation8_spill] sm:$0xff] %v6635_v60  ;;  %8041 = vst [vmem:[#allocation9_spill] sm:$0xff] %v6639_v61  ;;  %v5284_v1 = vpop.f32.mrb[12].mxu0  ;;  %v6641_v4 = vpack.c.bf16 %v733_v52, %v732_v18  ;;  %5358 = vmatprep.subr.bf16.mxu0 %v6095_v35  ;;  %v6648_v13 = vld [vmem:[#allocation2 + $0x4f] sm:$0xff]  ;;  %v6699_v18 = vadd.s32 24, %v6561_v0 }
 0x11a   : > { %8039 = vst [vmem:[#allocation7_spill] sm:$0xff] %v6631_v39  ;;  %773 = vst [vmem:[#allocation2 + $0x68] sm:$0xff] %v733_v52  ;;  %v654_v62 = vadd.f32 %v5284_v1, %v6557_v22  ;;  %v645_v7 = vpop.f32.mrb[13].mxu0  ;;  %v6665_v37 = vmul.f32 %v6626_v54, %v6648_v13  ;;  %v6706_v52 = vsel %vm6670_vm4, 1.0, %v7942_v14  ;;  %v945_v36 = vand.u32 15, %v813_v47 }
 0x11b   : > { %v646_v17 = vadd.f32 %v6557_v22, %v645_v7  ;;  %v5285_v20 = vpop.f32.mrb[14].mxu0  ;;  %5327 = vmatmul.mubr.bf16.gmra.mrb[40].mxu0 %v6641_v4  ;;  %8045 = vst [vmem:[#allocation11_spill] sm:$0xff] %v6677_v51  ;;  %8050 = vst [vmem:[#allocation14_spill] sm:$0xff] %v6706_v52 }
 0x11c   : > { %v738_v27 = vmax.f32 %v654_v62, 0.0  ;;  %v657_v28 = vadd.f32 %v5285_v20, %v6557_v22  ;;  %v648_v29 = vpop.f32.mrb[15].mxu0  ;;  %5330 = vmatprep.mubr.bf16.mxu0 %v6629_v23  ;;  %5359 = vmatpush3.bf16.msra.mxu0 %v6095_v35  ;;  %8042 = vst [vmem:[#allocation10_spill] sm:$0xff] %v6665_v37  ;;  %vm6773_vm8 = vcmp.ge.s32.totalorder %v945_v36, 1  ;;  %v817_v36 = vadd.s32 160, %v6561_v0 }
 0x11d   : > { %v736_v31 = vmax.f32 %v646_v17, 0.0  ;;  %v649_v32 = vadd.f32 %v6557_v22, %v648_v29  ;;  %5360 = vmatprep.subr.bf16.mxu0 %v6097_v5  ;;  %v819_v62 = vadd.s32 176, %v6561_v0  ;;  %v6813_v44 = vsel %vm6773_vm8, 1.0, %v7942_v14 }
 0x11e   : > { %778 = vst [vmem:[#allocation2 + $0x90] sm:$0xff] %v738_v27  ;;  %v739_v38 = vmax.f32 %v657_v28, 0.0  ;;  %v6667_v6 = vld [vmem:[#allocation2 + $0x5f] sm:$0xff] }
 0x11f   : > { %776 = vst [vmem:[#allocation2 + $0x80] sm:$0xff] %v736_v31  ;;  %v737_v46 = vmax.f32 %v649_v32, 0.0  ;;  %v6687_v10 = vmul.f32 %v6675_v45, %v6667_v6  ;;  %v6717_v7 = vmul.f32 %v6706_v52, %v6667_v6  ;;  %v987_v43 = vand.u32 15, %v819_v62 }
 0x120   : > { %779 = vst [vmem:[#allocation2 + $0x98] sm:$0xff] %v739_v38  ;;  %v6679_v57 = vpack.c.bf16 %v739_v38, %v738_v27  ;;  %5361 = vmatpush3.bf16.msra.mxu0 %v6097_v5  ;;  %v6724_v27 = vsel %vm6694_vm5, 1.0, %v7942_v14 }
 0x121   : > { %v6681_v2 = vld [vmem:[#allocation2 + $0x67] sm:$0xff]  ;;  %8047 = vst [vmem:[#allocation13_spill] sm:$0xff] %v6687_v10  ;;  %777 = vst [vmem:[#allocation2 + $0x88] sm:$0xff] %v737_v46  ;;  %v5288_v11 = vpop.f32.mrb[16].mxu0  ;;  %v6689_v12 = vpack.c.bf16 %v737_v46, %v736_v31  ;;  %5362 = vmatprep.subr.bf16.mxu0 %v6099_v34  ;;  %v6708_v59 = vld [vmem:[#allocation2 + $0x6f] sm:$0xff]  ;;  %vm6876_vm12 = vcmp.ge.s32.totalorder %v987_v43, 1 }
 0x122   : > { %8046 = vst [vmem:[#allocation12_spill] sm:$0xff] %v6679_v57  ;;  %v670_v19 = vadd.f32 %v5288_v11, %v6557_v22  ;;  %v661_v35 = vpop.f32.mrb[17].mxu0  ;;  %8051 = vst [vmem:[#allocation15_spill] sm:$0xff] %v6717_v7  ;;  %v6736_v32 = vmul.f32 %v6675_v45, %v6708_v59  ;;  %v6742_v42 = vmul.f32 %v6724_v27, %v6708_v59  ;;  %v6747_v11 = vld [vmem:[#allocation2 + $0x77] sm:$0xff] }
 0x123   : > { %v662_v1 = vadd.f32 %v6557_v22, %v661_v35  ;;  %v5289_v5 = vpop.f32.mrb[18].mxu0  ;;  %5331 = vmatmul.mubr.bf16.gmra.mrb[44].mxu0 %v6689_v12 }
 0x124   : > { %v742_v17 = vmax.f32 %v670_v19, 0.0  ;;  %v673_v20 = vadd.f32 %v5289_v5, %v6557_v22  ;;  %v664_v24 = vpop.f32.mrb[19].mxu0  ;;  %5334 = vmatprep.mubr.bf16.mxu0 %v6679_v57  ;;  %5363 = vmatpush3.bf16.msra.mxu0 %v6099_v34  ;;  %8052 = vst [vmem:[#allocation16_spill] sm:$0xff] %v6736_v32  ;;  %8053 = vst [vmem:[#allocation17_spill] sm:$0xff] %v6742_v42 }
 0x125   : > { %v740_v28 = vmax.f32 %v662_v1, 0.0  ;;  %v665_v29 = vadd.f32 %v6557_v22, %v664_v24  ;;  %5364 = vmatprep.subr.bf16.mxu0 %v6101_v15 }
 0x126   : > { %782 = vst [vmem:[#allocation2 + $0xb0] sm:$0xff] %v742_v17  ;;  %v743_v34 = vmax.f32 %v673_v20, 0.0  ;;  %v6738_v38 = vld [vmem:[#allocation2 + $0x7f] sm:$0xff] }
 0x127   : > { %780 = vst [vmem:[#allocation2 + $0xa0] sm:$0xff] %v740_v28  ;;  %v741_v46 = vmax.f32 %v665_v29, 0.0  ;;  %v6763_v5 = vmul.f32 %v6745_v63, %v6738_v38  ;;  %v6794_v16 = vmul.f32 %v6724_v27, %v6738_v38  ;;  %v6826_v32 = vld [vmem:[#allocation2 + $0x97] sm:$0xff]  ;;  %v6829_v29 = vadd.s32 88, %v6561_v0 }
 0x128   : > { %783 = vst [vmem:[#allocation2 + $0xb8] sm:$0xff] %v743_v34  ;;  %v6753_v19 = vpack.c.bf16 %v743_v34, %v742_v17  ;;  %5365 = vmatpush3.bf16.msra.mxu0 %v6101_v15  ;;  %v6755_v35 = vld [vmem:[#allocation2 + $0x87] sm:$0xff]  ;;  %v854_v15 = vand.u32 15, %v6699_v18  ;;  %v6770_v17 = vadd.s32 40, %v6561_v0  ;;  %v6780_v34 = vsel %vm6749_vm7, 1.0, %v7942_v14 }
 0x129   : > { %8057 = vst [vmem:[#allocation19_spill] sm:$0xff] %v6763_v5  ;;  %781 = vst [vmem:[#allocation2 + $0xa8] sm:$0xff] %v741_v46  ;;  %v5292_v40 = vpop.f32.mrb[20].mxu0  ;;  %v6765_v56 = vpack.c.bf16 %v741_v46, %v740_v28  ;;  %5398 = vmatprep.subr.bf16.mxu0 %v6730_v30  ;;  %v6782_v28 = vld [vmem:[#allocation2 + $0x8f] sm:$0xff]  ;;  %v6785_v46 = vadd.s32 56, %v6561_v0  ;;  %v8068_v5 = vmov 0.0  }
 0x12a   : > { %8056 = vst [vmem:[#allocation18_spill] sm:$0xff] %v6753_v19  ;;  %v686_v20 = vadd.f32 %v5292_v40, %v6557_v22  ;;  %v677_v24 = vpop.f32.mrb[21].mxu0  ;;  %8061 = vst [vmem:[#allocation21_spill] sm:$0xff] %v6794_v16  ;;  %v6836_v7 = vsel %vm6798_vm9, 1.0, %v8068_v5  ;;  %vm6854_vm10 = vcmp.lt.s32.totalorder %v854_v15, 15  ;;  %v868_v37 = vand.u32 15, %v6770_v17 }
 0x12b   : > { %8058 = vst [vmem:[#allocation20_spill] sm:$0xff] %v6765_v56  ;;  %v678_v18 = vadd.f32 %v6557_v22, %v677_v24  ;;  %v5293_v47 = vpop.f32.mrb[22].mxu0  ;;  %5335 = vmatmul.mubr.bf16.gmra.mrb[48].mxu0 %v6765_v56  ;;  %8069 = vst [vmem:[#allocation26_spill] sm:$0xff] %v6836_v7  ;;  %v821_v15 = vadd.s32 192, %v6561_v0  ;;  %v6892_v43 = vsel %vm6854_vm10, 1.0, %v8068_v5 }
 0x12c   : > { %v746_v31 = vmax.f32 %v686_v20, 0.0  ;;  %v689_v1 = vadd.f32 %v5293_v47, %v6557_v22  ;;  %v680_v3 = vpop.f32.mrb[23].mxu0  ;;  %5338 = vmatprep.mubr.bf16.mxu0 %v6753_v19  ;;  %v6808_v20 = vmul.f32 %v6745_v63, %v6782_v28  ;;  %vm6902_vm13 = vcmp.lt.s32.totalorder %v868_v37, 15  ;;  %v1409_v37 = vld [vmem:[#allocation2 + $0x2f] sm:$0xff] }
 0x12d   : > { %v744_v26 = vmax.f32 %v678_v18, 0.0  ;;  %v681_v25 = vadd.f32 %v6557_v22, %v680_v3  ;;  %v6818_v18 = vadd.s32 72, %v6561_v0  ;;  %v6822_v3 = vmul.f32 %v6780_v34, %v6782_v28 }
 0x12e   : > { %8064 = vst [vmem:[#allocation22_spill] sm:$0xff] %v6808_v20  ;;  %786 = vst [vmem:[#allocation2 + $0xd0] sm:$0xff] %v746_v31  ;;  %v747_v47 = vmax.f32 %v689_v1, 0.0  ;;  %v6815_v58 = vld [vmem:[#allocation2 + $0x9f] sm:$0xff]  ;;  %v973_v1 = vand.u32 15, %v817_v36  ;;  %v882_v20 = vand.u32 15, %v6785_v46 }
 0x12f   : > { %8065 = vst [vmem:[#allocation23_spill] sm:$0xff] %v6815_v58  ;;  %8066 = vst [vmem:[#allocation24_spill] sm:$0xff] %v6822_v3  ;;  %v745_v40 = vmax.f32 %v681_v25, 0.0  ;;  %v2370_v16 = vmul.f32 %v6813_v44, %v6815_v58  ;;  %v1001_v62 = vand.u32 15, %v821_v15 }
 0x130   : > { %784 = vst [vmem:[#allocation2 + $0xc0] sm:$0xff] %v744_v26  ;;  %787 = vst [vmem:[#allocation2 + $0xd8] sm:$0xff] %v747_v47  ;;  %v6831_v14 = vld [vmem:[#allocation2 + $0xa7] sm:$0xff]  ;;  %v6838_v42 = vld [vmem:[#allocation2 + $0xaf] sm:$0xff]  ;;  %v6840_v25 = vpack.c.bf16 %v747_v47, %v746_v31  ;;  %vm6866_vm11 = vcmp.ge.s32.totalorder %v973_v1, 1  ;;  %vm6906_vm14 = vcmp.lt.s32.totalorder %v882_v20, 15 }
 0x131   : > { %8067 = vst [vmem:[#allocation25_spill] sm:$0xff] %v6831_v14  ;;  %8070 = vst [vmem:[#allocation27_spill] sm:$0xff] %v6838_v42  ;;  %v5296_v10 = vpop.f32.mrb[24].mxu0  ;;  %v2394_v61 = vpack.c.bf16 %v6831_v14, %v2370_v16  ;;  %v2372_v60 = vmul.f32 %v6836_v7, %v6838_v42  ;;  %v6849_v24 = vpack.c.bf16 %v745_v40, %v744_v26  ;;  %v6852_v47 = vld [vmem:[#allocation2 + $0xb7] sm:$0xff]  ;;  %v6926_v20 = vadd.s32 120, %v6561_v0  ;;  %v1405_v42 = vld [vmem:[#allocation2 + $0xf] sm:$0xff] }
 0x132   : > { %8071 = vst [vmem:[#allocation28_spill] sm:$0xff] %v6840_v25  ;;  %785 = vst [vmem:[#allocation2 + $0xc8] sm:$0xff] %v745_v40  ;;  %v702_v19 = vadd.f32 %v5296_v10, %v6557_v22  ;;  %v693_v31 = vpop.f32.mrb[25].mxu0  ;;  %v6090_v10 = vld [vmem:[%s7935_s5 + $0x108] sm:$0xff]   ;;  %vm6952_vm1 = vcmp.ge.s32.totalorder %v1001_v62, 1  ;;  %v825_v7 = vadd.s32 224, %v6561_v0 }
 0x133   : > { %8072 = vst [vmem:[#allocation29_spill] sm:$0xff] %v6849_v24  ;;  %8073 = vst [vmem:[#allocation30_spill] sm:$0xff] %v6852_v47  ;;  %v694_v16 = vadd.f32 %v6557_v22, %v693_v31  ;;  %v5297_v3 = vpop.f32.mrb[26].mxu0  ;;  %5478 = vmatprep.mubr.bf16.mxu1 %v2394_v61  ;;  %v2395_v26 = vpack.c.bf16 %v6852_v47, %v2372_v60  ;;  %5339 = vmatmul.mubr.bf16.gmra.mrb[52].mxu0 %v6849_v24  ;;  %v896_v60 = vand.u32 15, %v6818_v18 }
 0x134   : > { %v750_v17 = vmax.f32 %v702_v19, 0.0  ;;  %v705_v46 = vadd.f32 %v5297_v3, %v6557_v22  ;;  %v696_v40 = vpop.f32.mrb[27].mxu0  ;;  %5342 = vmatprep.mubr.bf16.mxu0 %v6840_v25  ;;  %v910_v61 = vand.u32 15, %v6829_v29  ;;  %v823_v24 = vadd.s32 208, %v6561_v0 }
 0x135   : > { %v748_v31 = vmax.f32 %v694_v16, 0.0  ;;  %v697_v56 = vadd.f32 %v6557_v22, %v696_v40  ;;  %5479 = vmatmul.mubr.bf16.vlgmr.msra.gmra.mrb[0].mxu1 %v2395_v26  ;;  %v6885_v18 = vsel %vm6866_vm11, 1.0, %v8068_v5  ;;  %v6895_v29 = vadd.s32 104, %v6561_v0  ;;  %v6092_v26 = vld [vmem:[%s7935_s5 + $0x110] sm:$0xff]  }
 0x136   : > { %790 = vst [vmem:[#allocation2 + $0xf0] sm:$0xff] %v750_v17  ;;  %v751_v19 = vmax.f32 %v705_v46, 0.0  ;;  %5495 = vmatpush3.bf16.msra.mxu1 %v6551_v55  ;;  %8080 = vst [vmem:[#allocation31_spill] sm:$0xff] %v6885_v18  ;;  %vm6921_vm15 = vcmp.lt.s32.totalorder %v896_v60, 15  ;;  %v1015_v14 = vand.u32 15, %v823_v24  ;;  %vm6933_vm0 = vcmp.lt.s32.totalorder %v910_v61, 15 }
 0x137   : > { %v6887_v3 = vld [vmem:[#allocation2 + $0xbf] sm:$0xff]  ;;  %788 = vst [vmem:[#allocation2 + $0xe0] sm:$0xff] %v748_v31  ;;  %v749_v16 = vmax.f32 %v697_v56, 0.0  ;;  %5496 = vmatprep.subr.bf16.mxu1 %v6090_v10  ;;  %v6915_v56 = vsel %vm6876_vm12, 1.0, %v8068_v5  ;;  %v6098_v46 = vld [vmem:[%s7935_s5 + $0x128] sm:$0xff]  }
 0x138   : > { %8081 = vst [vmem:[#allocation32_spill] sm:$0xff] %v6887_v3  ;;  %v2374_v55 = vmul.f32 %v6885_v18, %v6887_v3  ;;  %791 = vst [vmem:[#allocation2 + $0xf8] sm:$0xff] %v751_v19  ;;  %v6919_v3 = vpack.c.bf16 %v751_v19, %v750_v17  ;;  %v6938_v18 = vld [vmem:[#allocation2 + $0xd7] sm:$0xff]  ;;  %vm6963_vm2 = vcmp.ge.s32.totalorder %v1015_v14, 1  ;;  %v7051_v17 = vld [vmem:[#allocation2 + $0x49] sm:$0xff] }
 0x139   : > { %v6910_v40 = vld [vmem:[#allocation2 + $0xc7] sm:$0xff]  ;;  %8087 = vst [vmem:[#allocation34_spill] sm:$0xff] %v6915_v56  ;;  %v6917_v25 = vld [vmem:[#allocation2 + $0xcf] sm:$0xff]  ;;  %789 = vst [vmem:[#allocation2 + $0xe8] sm:$0xff] %v749_v16  ;;  %v5300_v15 = vpop.f32.mrb[28].mxu0  ;;  %v6931_v47 = vpack.c.bf16 %v749_v16, %v748_v31  ;;  %v6945_v31 = vadd.s32 152, %v6561_v0 }
 0x13a   : > { %8086 = vst [vmem:[#allocation33_spill] sm:$0xff] %v6910_v40  ;;  %8088 = vst [vmem:[#allocation35_spill] sm:$0xff] %v6917_v25  ;;  %v2396_v57 = vpack.c.bf16 %v6910_v40, %v2374_v55  ;;  %v2376_v1 = vmul.f32 %v6915_v56, %v6917_v25  ;;  %v718_v60 = vadd.f32 %v5300_v15, %v6557_v22  ;;  %5497 = vmatpush3.bf16.msra.mxu1 %v6090_v10  ;;  %v709_v19 = vpop.f32.mrb[29].mxu0  ;;  %v6094_v10 = vld [vmem:[%s7935_s5 + $0x118] sm:$0xff]  }
 0x13b   : > { %8089 = vst [vmem:[#allocation36_spill] sm:$0xff] %v6919_v3  ;;  %8092 = vst [vmem:[#allocation37_spill] sm:$0xff] %v6931_v47  ;;  %v6942_v55 = vadd.s32 136, %v6561_v0  ;;  %v710_v24 = vadd.f32 %v6557_v22, %v709_v19  ;;  %v5301_v61 = vpop.f32.mrb[30].mxu0  ;;  %5498 = vmatprep.subr.bf16.mxu1 %v6092_v26  ;;  %5343 = vmatmul.mubr.bf16.gmra.mrb[56].mxu0 %v6931_v47  ;;  %v6971_v47 = vsel %vm6952_vm1, 1.0, %v8068_v5  ;;  %v966_v14 = vand.u32 15, %v6945_v31 }
 0x13c   : > { %8095 = vst [vmem:[#allocation38_spill] sm:$0xff] %v6938_v18  ;;  %5482 = vmatprep.mubr.bf16.mxu1 %v2396_v57  ;;  %v2397_v16 = vpack.c.bf16 %v6938_v18, %v2376_v1  ;;  %v754_v40 = vmax.f32 %v718_v60, 0.0  ;;  %v721_v25 = vadd.f32 %v5301_v61, %v6557_v22  ;;  %v712_v56 = vpop.f32.mrb[31].mxu0  ;;  %v827_v57 = vadd.s32 240, %v6561_v0  ;;  %5346 = vmatprep.mubr.bf16.mxu0 %v6919_v3 }
 0x13d   : > { %v938_v1 = vand.u32 15, %v6926_v20  ;;  %v752_v19 = vmax.f32 %v710_v24, 0.0  ;;  %v713_v18 = vadd.f32 %v6557_v22, %v712_v56  ;;  %v1437_v60 = vmul.f32 %v6580_v33, %v1405_v42  ;;  %8100 = vst [vmem:[#allocation39_spill] sm:$0xff] %v6971_v47  ;;  %v1406_v22 = vld [vmem:[#allocation2 + $0x17] sm:$0xff]  ;;  %8120 = vst [vmem:[#allocation48_spill] sm:$0xff] %v7051_v17 }
 0x13e   : > { %5483 = vmatmul.mubr.bf16.gmra.mrb[4].mxu1 %v2397_v16  ;;  %794 = vst [vmem:[#allocation2 + $0x110] sm:$0xff] %v754_v40  ;;  %v755_v61 = vmax.f32 %v721_v25, 0.0  ;;  %v6973_v20 = vld [vmem:[#allocation2 + $0xdf] sm:$0xff]  ;;  %v952_v56 = vand.u32 15, %v6942_v55  ;;  %v818_v16 = vadd.s32 168, %v6561_v0  ;;  %v6988_v55 = vsel %vm6963_vm2, 1.0, %v8068_v5 }
 0x13f   : > { %5499 = vmatpush3.bf16.msra.mxu1 %v6092_v26  ;;  %8101 = vst [vmem:[#allocation40_spill] sm:$0xff] %v6973_v20  ;;  %792 = vst [vmem:[#allocation2 + $0x100] sm:$0xff] %v752_v19  ;;  %v753_v24 = vmax.f32 %v713_v18, 0.0  ;;  %v2378_v42 = vmul.f32 %v6971_v47, %v6973_v20  ;;  %v6096_v25 = vld [vmem:[%s7935_s5 + $0x120] sm:$0xff]   ;;  %v1029_v26 = vand.u32 15, %v825_v7  ;;  %v1043_v31 = vand.u32 15, %v827_v57 }
 0x140   : > { %5500 = vmatprep.subr.bf16.mxu1 %v6094_v10  ;;  %795 = vst [vmem:[#allocation2 + $0x118] sm:$0xff] %v755_v61  ;;  %v6983_v15 = vld [vmem:[#allocation2 + $0xe7] sm:$0xff]  ;;  %v6990_v18 = vld [vmem:[#allocation2 + $0xef] sm:$0xff]  ;;  %v6992_v33 = vpack.c.bf16 %v755_v61, %v754_v40  ;;  %v820_v3 = vadd.s32 184, %v6561_v0  ;;  %v1469_v58 = vpack.c.bf16 %v1406_v22, %v1437_v60  ;;  %v7000_v62 = vld [vmem:[#allocation2 + $0xf7] sm:$0xff]  ;;  %v7005_v57 = vsel %vm6902_vm13, 1.0, %v8068_v5 }
 0x141   : > { %8102 = vst [vmem:[#allocation41_spill] sm:$0xff] %v6983_v15  ;;  %793 = vst [vmem:[#allocation2 + $0x108] sm:$0xff] %v753_v24  ;;  %v2398_v7 = vpack.c.bf16 %v6983_v15, %v2378_v42  ;;  %v2380_v20 = vmul.f32 %v6988_v55, %v6990_v18  ;;  %v6998_v47 = vpack.c.bf16 %v753_v24, %v752_v19  ;;  %v7010_v40 = vsel %vm6906_vm14, 1.0, %v8068_v5 }
 0x142   : > { %8103 = vst [vmem:[#allocation42_spill] sm:$0xff] %v6992_v33  ;;  %8105 = vst [vmem:[#allocation44_spill] sm:$0xff] %v7000_v62  ;;  %v7015_v61 = vsel %vm6921_vm15, 1.0, %v8068_v5  ;;  %v822_v19 = vadd.s32 200, %v6561_v0  ;;  %vm7022_vm3 = vcmp.ge.s32.totalorder %v1029_v26, 1  ;;  %v980_v36 = vand.u32 15, %v818_v16 }
 0x143   : > { %8104 = vst [vmem:[#allocation43_spill] sm:$0xff] %v6998_v47  ;;  %5501 = vmatpush3.bf16.msra.mxu1 %v6094_v10  ;;  %8106 = vst [vmem:[#allocation45_spill] sm:$0xff] %v7005_v57  ;;  %5486 = vmatprep.mubr.bf16.mxu1 %v2398_v7  ;;  %v2399_v10 = vpack.c.bf16 %v7000_v62, %v2380_v20  ;;  %v826_v22 = vadd.s32 232, %v6561_v0  ;;  %v7031_v24 = vsel %vm6933_vm0, 1.0, %v8068_v5  ;;  %v8111_v20 = vand.u32 15, %v6895_v29  ;;  %v7053_v29 = vld [vmem:[#allocation2 + $0x59] sm:$0xff] }
 0x144   : > { %8107 = vst [vmem:[#allocation46_spill] sm:$0xff] %v7010_v40  ;;  %5502 = vmatprep.subr.bf16.mxu1 %v6096_v25  ;;  %5347 = vmatmul.mubr.bf16.gmra.mrb[60].mxu0 %v6998_v47  ;;  %8110 = vst [vmem:[#allocation47_spill] sm:$0xff] %v7031_v24  ;;  %vm7039_vm5 = vcmp.lt.s32.totalorder %v938_v1, 15  ;;  %vm7043_vm6 = vcmp.lt.s32.totalorder %v952_v56, 15  ;;  %vm7047_vm7 = vcmp.ge.s32.totalorder %v1043_v31, 1  ;;  %vm7057_vm8 = vcmp.lt.s32.totalorder %v966_v14, 15 }
 0x145   : > { %vm7035_vm4 = vcmp.lt.s32.totalorder %v8111_v20, 15  ;;  %5366 = vmatprep.mubr.bf16.mxu0 %v1469_v58  ;;  %8121 = vst [vmem:[#allocation49_spill] sm:$0xff] %v7053_v29  ;;  %v7055_v20 = vld [vmem:[#allocation2 + $0x69] sm:$0xff]  ;;  %v994_v56 = vand.u32 15, %v820_v3  ;;  %v7064_v31 = vsel %vm7022_vm3, 1.0, %v8068_v5  ;;  %v1439_v58 = vmul.f32 %v6623_v53, %v6587_v41 }
 0x146   : > { %5487 = vmatmul.mubr.bf16.gmra.mrb[8].mxu1 %v2399_v10  ;;  %8122 = vst [vmem:[#allocation50_spill] sm:$0xff] %v7055_v20  ;;  %v7066_v10 = vld [vmem:[#allocation2 + $0xff] sm:$0xff]  ;;  %v1008_v33 = vand.u32 15, %v822_v19  ;;  %v824_v47 = vadd.s32 216, %v6561_v0  ;;  %v6100_v3 = vld [vmem:[%s7935_s5 + $0x130] sm:$0xff]   ;;  %vm7077_vm9 = vcmp.lt.s32.totalorder %v980_v36, 15  ;;  %v7090_v53 = vmul.f32 %v6892_v43, %v7051_v17 }
 0x147   : > { %5503 = vmatpush3.bf16.msra.mxu1 %v6096_v25  ;;  %8125 = vst [vmem:[#allocation51_spill] sm:$0xff] %v7066_v10  ;;  %v2382_v14 = vmul.f32 %v7064_v31, %v7066_v10  ;;  %v1441_v25 = vmul.f32 %v6626_v54, %v1409_v37  ;;  %v1036_v62 = vand.u32 15, %v826_v22  ;;  %v7086_v41 = vsel %vm7047_vm7, 1.0, %v8068_v5  ;;  %v2353_v17 = vld [vmem:[#allocation2 + $0x117] sm:$0xff] }
 0x148   : > { %5504 = vmatprep.subr.bf16.mxu1 %v6098_v46  ;;  %v7081_v15 = vld [vmem:[#allocation2 + $0x107] sm:$0xff]  ;;  %v2352_v19 = vld [vmem:[#allocation2 + $0x10f] sm:$0xff]  ;;  %8128 = vst [vmem:[#allocation52_spill] sm:$0xff] %v7090_v53  ;;  %v7094_v54 = vmul.f32 %v7005_v57, %v7053_v29  ;;  %v7098_v36 = vmul.f32 %v7010_v40, %v7055_v20  ;;  %v7104_v7 = vmul.f32 %v6706_v52, %v6618_v48  ;;  %vm7106_vm10 = vcmp.lt.s32.totalorder %v994_v56, 15  ;;  %v7113_v29 = vld [vmem:[%s7935_s5 + $0x138] sm:$0xff]  }
 0x149   : > { %v2400_v22 = vpack.c.bf16 %v7081_v15, %v2382_v14  ;;  %v2384_v37 = vmul.f32 %v7086_v41, %v2352_v19  ;;  %v1470_v20 = vpack.c.bf16 %v6595_v49, %v1439_v58  ;;  %v1410_v14 = vld [vmem:[#allocation2 + $0x37] sm:$0xff]  ;;  %v7118_v19 = vmul.f32 %v6675_v45, %v6648_v13  ;;  %v7127_v40 = vld [vmem:[%s7935_s5 + $0x88] sm:$0xff]  }
 0x14a   : > { %8129 = vst [vmem:[#allocation53_spill] sm:$0xff] %v7094_v54  ;;  %8130 = vst [vmem:[#allocation54_spill] sm:$0xff] %v7098_v36  ;;  %vm7120_vm11 = vcmp.lt.s32.totalorder %v1008_v33, 15  ;;  %v1022_v56 = vand.u32 15, %v824_v47  ;;  %v1471_v52 = vpack.c.bf16 %v1410_v14, %v1441_v25  ;;  %v7129_v58 = vld [vmem:[#allocation2 + $0x41] sm:$0xff]  ;;  %v7131_v49 = vld [vmem:[#allocation2 + $0x51] sm:$0xff]  ;;  %v1472_v16 = vpack.c.bf16 %v6631_v39, %v7104_v7 }
 0x14b   : > { %5505 = vmatpush3.bf16.msra.mxu1 %v6098_v46  ;;  %5490 = vmatprep.mubr.bf16.mxu1 %v2400_v22  ;;  %v2401_v46 = vpack.c.bf16 %v2353_v17, %v2384_v37  ;;  %v7136_v33 = vsel %vm7035_vm4, 1.0, %v8068_v5  ;;  %v7141_v13 = vsel %vm7039_vm5, 1.0, %v8068_v5  ;;  %v7143_v45 = vld [vmem:[#allocation2 + $0x79] sm:$0xff]  ;;  %v7145_v47 = vld [vmem:[#allocation2 + $0x89] sm:$0xff]  ;;  %v7150_v17 = vsel %vm7043_vm6, 1.0, %v8068_v5  ;;  %v7219_v57 = vld [vmem:[#allocation2 + $0x91] sm:$0xff] }
 0x14c   : > { %5506 = vmatprep.subr.bf16.mxu1 %v6100_v3  ;;  %5367 = vmatmul.mubr.bf16.vlgmr.msra.gmra.mrb[32].mxu0 %v1470_v20  ;;  %8135 = vst [vmem:[#allocation55_spill] sm:$0xff] %v7143_v45  ;;  %8136 = vst [vmem:[#allocation56_spill] sm:$0xff] %v7145_v47  ;;  %v7152_v25 = vld [vmem:[#allocation2 + $0x99] sm:$0xff]  ;;  %v7157_v42 = vsel %vm7057_vm8, 1.0, %v8068_v5  ;;  %vm7159_vm12 = vcmp.lt.s32.totalorder %v1036_v62, 15  ;;  %v7170_v22 = vld [vmem:[#allocation2 + $0xa9] sm:$0xff]  ;;  %v1473_v60 = vpack.c.bf16 %v6677_v51, %v7118_v19 }
 0x14d   : > { %8137 = vst [vmem:[#allocation57_spill] sm:$0xff] %v7150_v17  ;;  %8138 = vst [vmem:[#allocation58_spill] sm:$0xff] %v7152_v25  ;;  %5370 = vmatprep.mubr.bf16.mxu0 %v1471_v52  ;;  %v7166_v20 = vld [vmem:[%s7935_s5 + $0x140] sm:$0xff]   ;;  %v7175_v1 = vsel %vm7077_vm9, 1.0, %v8068_v5  ;;  %v7179_v37 = vld [vmem:[#allocation2 + $0xc9] sm:$0xff]  ;;  %v7184_v52 = vsel %vm7106_vm10, 1.0, %v8068_v5  ;;  %5399 = vmatpush3.bf16.msra.mxu0 %v6730_v30  ;;  %v7234_v30 = vmul.f32 %v7031_v24, %v7145_v47 }
 0x14e   : > { %8139 = vst [vmem:[#allocation59_spill] sm:$0xff] %v7157_v42  ;;  %5491 = vmatmul.mubr.bf16.gmra.mrb[12].mxu1 %v2401_v46  ;;  %8142 = vst [vmem:[#allocation60_spill] sm:$0xff] %v7170_v22  ;;  %v7177_v62 = vld [vmem:[#allocation2 + $0xb9] sm:$0xff]  ;;  %v7189_v7 = vsel %vm7120_vm11, 1.0, %v8068_v5  ;;  %v7197_v14 = vld [vmem:[%s7935_s5 + $0x90] sm:$0xff]   ;;  %vm7205_vm13 = vcmp.lt.s32.totalorder %v1022_v56, 15  ;;  %5400 = vmatprep.subr.bf16.mxu0 %v7127_v40  ;;  %v7257_v47 = vmul.f32 %v7157_v42, %v7179_v37 }
 0x14f   : > { %8143 = vst [vmem:[#allocation61_spill] sm:$0xff] %v7177_v62  ;;  %8144 = vst [vmem:[#allocation62_spill] sm:$0xff] %v7179_v37  ;;  %5507 = vmatpush3.bf16.msra.mxu1 %v6100_v3  ;;  %5510 = vmatprep.mubr.bf16.mxu1 %v6568_v21  ;;  %v7199_v46 = vld [vmem:[#allocation2 + $0x61] sm:$0xff]  ;;  %v7201_v10 = vld [vmem:[#allocation2 + $0xd9] sm:$0xff]  ;;  %v7224_v56 = vsel %vm7159_vm12, 1.0, %v8068_v5  ;;  %v7230_v3 = vmul.f32 %v7015_v61, %v7143_v45  ;;  %v7245_v5 = vmul.f32 %v7136_v33, %v7152_v25 }
 0x150   : > { %8145 = vst [vmem:[#allocation63_spill] sm:$0xff] %v7199_v46  ;;  %v7203_v39 = vld [vmem:[#allocation2 + $0xe9] sm:$0xff]  ;;  %5508 = vmatprep.subr.bf16.mxu1 %v7113_v29  ;;  %v7215_v19 = vld [vmem:[#allocation2 + $0x71] sm:$0xff]  ;;  %v7217_v51 = vld [vmem:[#allocation2 + $0x81] sm:$0xff]  ;;  %v7249_v21 = vmul.f32 %v7141_v13, %v7170_v22  ;;  %v7253_v36 = vmul.f32 %v7150_v17, %v7177_v62  ;;  %v7271_v62 = vmul.f32 %v7175_v1, %v7201_v10 }
 0x151   : > { %8146 = vst [vmem:[#allocation64_spill] sm:$0xff] %v7203_v39  ;;  %8149 = vst [vmem:[#allocation65_spill] sm:$0xff] %v7230_v3  ;;  %v7237_v54 = vld [vmem:[#allocation2 + $0xa1] sm:$0xff]  ;;  %v7239_v53 = vld [vmem:[#allocation2 + $0xb1] sm:$0xff]  ;;  %v7275_v37 = vmul.f32 %v7184_v52, %v7203_v39  ;;  %5401 = vmatpush3.bf16.msra.mxu0 %v7127_v40 }
 0x152   : > { %8150 = vst [vmem:[#allocation66_spill] sm:$0xff] %v7234_v30  ;;  %v7241_v26 = vld [vmem:[#allocation2 + $0xf9] sm:$0xff]  ;;  %8151 = vst [vmem:[#allocation67_spill] sm:$0xff] %v7253_v36  ;;  %v7259_v46 = vld [vmem:[#allocation2 + $0xc1] sm:$0xff]  ;;  %5402 = vmatprep.subr.bf16.mxu0 %v7197_v14  ;;  %v1465_v36 = vmul.f32 %v7064_v31, %v6990_v18 }
 0x153   : > { %8152 = vst [vmem:[#allocation68_spill] sm:$0xff] %v7257_v47  ;;  %v7261_v45 = vld [vmem:[#allocation2 + $0x109] sm:$0xff]  ;;  %v7263_v24 = vld [vmem:[#allocation2 + $0x119] sm:$0xff]  ;;  %8153 = vst [vmem:[#allocation69_spill] sm:$0xff] %v7271_v62  ;;  %5509 = vmatpush3.bf16.msra.mxu1 %v7113_v29  ;;  %v7308_v25 = vmul.f32 %v7189_v7, %v7241_v26  ;;  %v1447_v62 = vmul.f32 %v6724_v27, %v6667_v6 }
 0x154   : > { %8154 = vst [vmem:[#allocation70_spill] sm:$0xff] %v7275_v37  ;;  %v7278_v42 = vld [vmem:[#allocation2 + $0xd1] sm:$0xff]  ;;  %v7280_v17 = vld [vmem:[#allocation2 + $0xe1] sm:$0xff]  ;;  %5542 = vmatprep.subr.bf16.mxu1 %v7166_v20  ;;  %5371 = vmatmul.mubr.bf16.gmra.mrb[36].mxu0 %v1472_v16  ;;  %v7322_v3 = vmul.f32 %v7224_v56, %v7263_v24 }
 0x155   : > { %v6104_v29 = vld [vmem:[%s7935_s5 + $0x148] sm:$0xff]   ;;  %v7295_v39 = vld [vmem:[#allocation2] sm:$0xff]  ;;  %8155 = vst [vmem:[#allocation71_spill] sm:$0xff] %v7308_v25  ;;  %v6112_v40 = vld [vmem:[%s7935_s5 + $0x98] sm:$0xff]   ;;  %5374 = vmatprep.mubr.bf16.mxu0 %v1473_v60  ;;  %v1449_v60 = vmul.f32 %v6745_v63, %v6708_v59  ;;  %5403 = vmatpush3.bf16.msra.mxu0 %v7197_v14  ;;  %v1474_v6 = vpack.c.bf16 %v6681_v2, %v1447_v62 }
 0x156   : > { %v7300_v22 = vsel %vm7205_vm13, 1.0, %v7295_v39  ;;  %v7314_v48 = vld [vmem:[#allocation2 + $0xf1] sm:$0xff]  ;;  %8157 = vst [vmem:[#allocation73_spill] sm:$0xff] %v7322_v3  ;;  %5511 = vmatmul.mubr.bf16.vlgmr.msra.gmra.mrb[16].mxu1 %v6566_v8  ;;  %v7325_v16 = vld [vmem:[#allocation2 + $0x101] sm:$0xff]  ;;  %5404 = vmatprep.subr.bf16.mxu0 %v6112_v40  ;;  %v1453_v62 = vmul.f32 %v6813_v44, %v6782_v28 }
 0x157   : > { %v7318_v47 = vmul.f32 %v7300_v22, %v7261_v45  ;;  %v7327_v30 = vld [vmem:[#allocation2 + $0x111] sm:$0xff]  ;;  %5543 = vmatpush3.bf16.msra.mxu1 %v7166_v20  ;;  %5514 = vmatprep.mubr.bf16.mxu1 %v6597_v50  ;;  %v6113_v50 = vld [vmem:[%s7935_s5 + $0xa0] sm:$0xff]   ;;  %v1475_v27 = vpack.c.bf16 %v6747_v11, %v1449_v60  ;;  %v6115_v63 = vld [vmem:[%s7935_s5 + $0xa8] sm:$0xff]   ;;  %v1451_v20 = vmul.f32 %v6780_v34, %v6738_v38 }
 0x158   : > { %5544 = vmatprep.subr.bf16.mxu1 %v6104_v29  ;;  %v6105_v37 = vld [vmem:[%s7935_s5 + $0x150] sm:$0xff]   ;;  %v6106_v59 = vld [vmem:[%s7935_s5 + $0x158] sm:$0xff]   ;;  %v6108_v14 = vld [vmem:[%s7935_s5 + $0x160] sm:$0xff]  }
 0x159   : > { %8156 = vst [vmem:[#allocation72_spill] sm:$0xff] %v7318_v47  ;;  %5405 = vmatpush3.bf16.msra.mxu0 %v6112_v40  ;;  %v6111_v38 = vld [vmem:[%s7935_s5 + $0x168] sm:$0xff]   ;;  %v6118_v28 = vld [vmem:[%s7935_s5 + $0xb8] sm:$0xff]   ;;  %v8175_v3 = vld [vmem:[#allocation41_spill] sm:$0xff] }
 0x15a   : > { %5406 = vmatprep.subr.bf16.mxu0 %v6113_v50  ;;  %v8159_v40 = vld [vmem:[#allocation26_spill] sm:$0xff] }
 0x15b   : > { %5545 = vmatpush3.bf16.msra.mxu1 %v6104_v29  ;;  %v8158_v29 = vld [vmem:[#allocation23_spill] sm:$0xff]  ;;  %v1988_v47 = vld [vmem:[#allocation2 + $0x31] sm:$0xff] }
 0x15c   : > { %5546 = vmatprep.subr.bf16.mxu1 %v6105_v37  ;;  %5375 = vmatmul.mubr.bf16.gmra.mrb[40].mxu0 %v1474_v6  ;;  %v1455_v60 = vmul.f32 %v8159_v40, %v8158_v29  ;;  %v8161_v6 = vld [vmem:[#allocation31_spill] sm:$0xff] }
 0x15d   : > { %5378 = vmatprep.mubr.bf16.mxu0 %v1475_v27  ;;  %5407 = vmatpush3.bf16.msra.mxu0 %v6113_v50  ;;  %v8160_v50 = vld [vmem:[#allocation27_spill] sm:$0xff] }
 0x15e   : > { %5515 = vmatmul.mubr.bf16.gmra.mrb[20].mxu1 %v6593_v9  ;;  %5408 = vmatprep.subr.bf16.mxu0 %v6115_v63  ;;  %v6116_v9 = vld [vmem:[%s7935_s5 + $0xb0] sm:$0xff]   ;;  %v1457_v27 = vmul.f32 %v8161_v6, %v8160_v50  ;;  %v8169_v50 = vld [vmem:[#allocation39_spill] sm:$0xff] }
 0x15f   : > { %5518 = vmatprep.mubr.bf16.mxu1 %v6641_v4  ;;  %5547 = vmatpush3.bf16.msra.mxu1 %v6105_v37  ;;  %v1476_v4 = vpack.c.bf16 %v6755_v35, %v1451_v20  ;;  %v1477_v37 = vpack.c.bf16 %v6826_v32, %v1453_v62 }
 0x160   : > { %5548 = vmatprep.subr.bf16.mxu1 %v6106_v59 }
 0x161   : > { %5409 = vmatpush3.bf16.msra.mxu0 %v6115_v63  ;;  %v8162_v63 = vld [vmem:[#allocation25_spill] sm:$0xff] }
 0x162   : > { %5410 = vmatprep.subr.bf16.mxu0 %v6116_v9  ;;  %v1478_v20 = vpack.c.bf16 %v8162_v63, %v1455_v60  ;;  %v8168_v60 = vld [vmem:[#allocation35_spill] sm:$0xff]  ;;  %v798_v63 = vadd.s32 8, %v6561_v0 }
 0x163   : > { %5549 = vmatpush3.bf16.msra.mxu1 %v6106_v59  ;;  %v6114_v59 = vld [vmem:[%s7935_s5 + $0x170] sm:$0xff]  }
 0x164   : > { %5550 = vmatprep.subr.bf16.mxu1 %v6108_v14  ;;  %5379 = vmatmul.mubr.bf16.gmra.mrb[44].mxu0 %v1476_v4  ;;  %v8164_v4 = vld [vmem:[#allocation12_spill] sm:$0xff] }
 0x165   : > { %5382 = vmatprep.mubr.bf16.mxu0 %v1477_v37  ;;  %5411 = vmatpush3.bf16.msra.mxu0 %v6116_v9  ;;  %v8165_v9 = vld [vmem:[#allocation20_spill] sm:$0xff] }
 0x166   : > { %5519 = vmatmul.mubr.bf16.gmra.mrb[24].mxu1 %v6629_v23  ;;  %5412 = vmatprep.subr.bf16.mxu0 %v6118_v28  ;;  %v8163_v23 = vld [vmem:[#allocation30_spill] sm:$0xff]  ;;  %v8166_v37 = vld [vmem:[#allocation32_spill] sm:$0xff] }
 0x167   : > { %5522 = vmatprep.mubr.bf16.mxu1 %v6689_v12  ;;  %5551 = vmatpush3.bf16.msra.mxu1 %v6108_v14  ;;  %v1479_v62 = vpack.c.bf16 %v8163_v23, %v1457_v27  ;;  %v6117_v12 = vld [vmem:[%s7935_s5 + $0x178] sm:$0xff]   ;;  %v6152_v14 = vld [vmem:[%s7935_s5 + $0xc0] sm:$0xff]   ;;  %v1461_v27 = vmul.f32 %v8169_v50, %v8168_v60  ;;  %v8174_v60 = vld [vmem:[#allocation40_spill] sm:$0xff] }
 0x168   : > { %5552 = vmatprep.subr.bf16.mxu1 %v6111_v38  ;;  %v1463_v8 = vmul.f32 %v6988_v55, %v8174_v60  ;;  %v8180_v60 = vld [vmem:[#allocation36_spill] sm:$0xff] }
 0x169   : > { %5413 = vmatpush3.bf16.msra.mxu0 %v6118_v28  ;;  %v6119_v28 = vld [vmem:[%s7935_s5 + $0x180] sm:$0xff]  }
 0x16a   : > { %5446 = vmatprep.subr.bf16.mxu0 %v6152_v14 }
 0x16b   : > { %5553 = vmatpush3.bf16.msra.mxu1 %v6111_v38  ;;  %v8167_v38 = vld [vmem:[#allocation34_spill] sm:$0xff] }
 0x16c   : > { %5554 = vmatprep.subr.bf16.mxu1 %v6114_v59  ;;  %5383 = vmatmul.mubr.bf16.gmra.mrb[48].mxu0 %v1478_v20  ;;  %v1459_v29 = vmul.f32 %v8167_v38, %v8166_v37  ;;  %v8170_v20 = vld [vmem:[#allocation33_spill] sm:$0xff] }
 0x16d   : > { %5386 = vmatprep.mubr.bf16.mxu0 %v1479_v62  ;;  %v8171_v62 = vld [vmem:[#allocation38_spill] sm:$0xff]  ;;  %v8173_v37 = vld [vmem:[#allocation29_spill] sm:$0xff] }
 0x16e   : > { %5523 = vmatmul.mubr.bf16.gmra.mrb[28].mxu1 %v8164_v4  ;;  %v1480_v23 = vpack.c.bf16 %v8170_v20, %v1459_v29  ;;  %v1481_v4 = vpack.c.bf16 %v8171_v62, %v1461_v27  ;;  %v1482_v29 = vpack.c.bf16 %v8175_v3, %v1463_v8  ;;  %v8177_v62 = vld [vmem:[#allocation28_spill] sm:$0xff] }
 0x16f   : > { %5526 = vmatprep.mubr.bf16.mxu1 %v8165_v9  ;;  %5555 = vmatpush3.bf16.msra.mxu1 %v6114_v59  ;;  %v8172_v9 = vld [vmem:[#allocation18_spill] sm:$0xff]  ;;  %v840_v59 = vand.u32 15, %v798_v63  ;;  %v8178_v63 = vld [vmem:[#allocation37_spill] sm:$0xff] }
 0x170   : > { %5556 = vmatprep.subr.bf16.mxu1 %v6117_v12 }
 0x171   : > { %vm1310_vm14 = vcmp.lt.s32.totalorder %v840_v59, 15  ;;  %v1984_v59 = vld [vmem:[#allocation2 + $0x11] sm:$0xff] }
 0x172   : > { %v7414_v27 = vsel %vm1310_vm14, 1.0, %v7295_v39 }
 0x173   : > { %5557 = vmatpush3.bf16.msra.mxu1 %v6117_v12  ;;  %v8176_v12 = vld [vmem:[#allocation44_spill] sm:$0xff] }
 0x174   : > { %5590 = vmatprep.subr.bf16.mxu1 %v6119_v28  ;;  %5387 = vmatmul.mubr.bf16.gmra.mrb[52].mxu0 %v1480_v23  ;;  %v1483_v20 = vpack.c.bf16 %v8176_v12, %v1465_v36  ;;  %v1985_v23 = vld [vmem:[#allocation2 + $0x19] sm:$0xff]  ;;  %v2967_v36 = vld [vmem:[#allocation2 + $0x29] sm:$0xff] }
 0x175   : > { %5390 = vmatprep.mubr.bf16.mxu0 %v1481_v4  ;;  %v8179_v4 = vld [vmem:[#allocation51_spill] sm:$0xff]  ;;  %v2017_v18 = vmul.f32 %v7414_v27, %v1985_v23  ;;  %v2019_v12 = vmul.f32 %v6892_v43, %v2967_v36 }
 0x176   : > { %5527 = vmatmul.mubr.bf16.gmra.mrb[0].mxu1 %v8172_v9  ;;  %v1467_v9 = vmul.f32 %v7086_v41, %v8179_v4  ;;  %v2966_v4 = vld [vmem:[#allocation2 + $0x21] sm:$0xff] }
 0x177   : > { %5530 = vmatprep.mubr.bf16.mxu1 %v8173_v37  ;;  %v2048_v8 = vpack.c.bf16 %v2017_v18, %v1984_v59  ;;  %v1989_v37 = vld [vmem:[#allocation2 + $0x39] sm:$0xff]  ;;  %v2049_v23 = vpack.c.bf16 %v2019_v12, %v2966_v4  ;;  %v8184_v18 = vld [vmem:[#allocation48_spill] sm:$0xff] }
 0x178   : > { %v1484_v3 = vpack.c.bf16 %v7081_v15, %v1467_v9  ;;  %v8183_v9 = vld [vmem:[#allocation42_spill] sm:$0xff] }
 0x179   : > { %v8185_v59 = vld [vmem:[#allocation46_spill] sm:$0xff] }
 0x17c   : > { %5391 = vmatmul.mubr.bf16.gmra.mrb[56].mxu0 %v1482_v29  ;;  %v8181_v29 = vld [vmem:[#allocation43_spill] sm:$0xff] }
 0x17d   : > { %5394 = vmatprep.mubr.bf16.mxu0 %v1483_v20  ;;  %v8182_v20 = vld [vmem:[#allocation45_spill] sm:$0xff] }
 0x17e   : > { %5531 = vmatmul.mubr.bf16.gmra.mrb[4].mxu1 %v8177_v62  ;;  %v2021_v62 = vmul.f32 %v8182_v20, %v1989_v37  ;;  %v3003_v12 = vmul.f32 %v8182_v20, %v8184_v18  ;;  %v8187_v20 = vld [vmem:[#allocation50_spill] sm:$0xff] }
 0x17f   : > { %5534 = vmatprep.mubr.bf16.mxu1 %v8178_v63  ;;  %v2999_v63 = vmul.f32 %v7414_v27, %v2967_v36  ;;  %v6153_v36 = vld [vmem:[%s7935_s5 + $0xc8] sm:$0xff]  }
 0x180   : > { %v2050_v25 = vpack.c.bf16 %v2021_v62, %v1988_v47 }
 0x181   : > { %v3030_v15 = vpack.c.bf16 %v2999_v63, %v2966_v4 }
 0x184   : > { %5395 = vmatmul.mubr.bf16.gmra.mrb[60].mxu0 %v1484_v3  ;;  %v2023_v3 = vmul.f32 %v8185_v59, %v8184_v18  ;;  %v6121_v18 = vld [vmem:[%s7935_s5 + $0x190] sm:$0xff]  }
 0x185   : > { %5414 = vmatprep.mubr.bf16.mxu0 %v2048_v8  ;;  %v3001_v8 = vmul.f32 %v6892_v43, %v1989_v37  ;;  %v6120_v43 = vld [vmem:[%s7935_s5 + $0x188] sm:$0xff]   ;;  %v3032_v37 = vpack.c.bf16 %v3003_v12, %v7129_v58  ;;  %v6156_v12 = vld [vmem:[%s7935_s5 + $0xe0] sm:$0xff]  }
 0x186   : > { %5535 = vmatmul.mubr.bf16.gmra.mrb[8].mxu1 %v8180_v60  ;;  %v8186_v60 = vld [vmem:[#allocation49_spill] sm:$0xff] }
 0x187   : > { %5538 = vmatprep.mubr.bf16.mxu1 %v8181_v29  ;;  %v2025_v29 = vmul.f32 %v7015_v61, %v8186_v60  ;;  %v3031_v62 = vpack.c.bf16 %v3001_v8, %v1988_v47  ;;  %v8188_v47 = vld [vmem:[#allocation47_spill] sm:$0xff] }
 0x188   : > { %v2027_v4 = vmul.f32 %v8188_v47, %v8187_v20  ;;  %v8190_v8 = vld [vmem:[#allocation63_spill] sm:$0xff] }
 0x189   : > { %v2052_v63 = vpack.c.bf16 %v2025_v29, %v7131_v49 }
 0x18a   : > { %v2053_v29 = vpack.c.bf16 %v2027_v4, %v8190_v8 }
 0x18c   : > { %5415 = vmatmul.mubr.bf16.vlgmr.msra.gmra.mrb[32].mxu0 %v2049_v23  ;;  %v3005_v23 = vmul.f32 %v8185_v59, %v8186_v60 }
 0x18d   : > { %5418 = vmatprep.mubr.bf16.mxu0 %v2050_v25  ;;  %5447 = vmatpush3.bf16.msra.mxu0 %v6152_v14  ;;  %v2051_v25 = vpack.c.bf16 %v2023_v3, %v7129_v58  ;;  %v6154_v14 = vld [vmem:[%s7935_s5 + $0xd0] sm:$0xff]   ;;  %v3007_v3 = vmul.f32 %v7015_v61, %v8187_v20  ;;  %v6123_v20 = vld [vmem:[%s7935_s5 + $0x1a0] sm:$0xff]  }
 0x18e   : > { %5539 = vmatmul.mubr.bf16.gmra.mrb[12].mxu1 %v8183_v9  ;;  %5448 = vmatprep.subr.bf16.mxu0 %v6153_v36  ;;  %v3033_v59 = vpack.c.bf16 %v3005_v23, %v7131_v49  ;;  %v6157_v23 = vld [vmem:[%s7935_s5 + $0xe8] sm:$0xff]  }
 0x18f   : > { %5558 = vmatprep.mubr.bf16.mxu1 %v3030_v15  ;;  %v8189_v15 = vld [vmem:[#allocation55_spill] sm:$0xff]  ;;  %v3034_v61 = vpack.c.bf16 %v3007_v3, %v8190_v8  ;;  %v6158_v3 = vld [vmem:[%s7935_s5 + $0xf0] sm:$0xff]  }
 0x190   : > { %v2029_v9 = vmul.f32 %v7136_v33, %v8189_v15 }
 0x191   : > { %5449 = vmatpush3.bf16.msra.mxu0 %v6153_v36  ;;  %v6122_v36 = vld [vmem:[%s7935_s5 + $0x198] sm:$0xff]  }
 0x192   : > { %5450 = vmatprep.subr.bf16.mxu0 %v6154_v14  ;;  %v2054_v60 = vpack.c.bf16 %v2029_v9, %v7215_v19 }
 0x194   : > { %5419 = vmatmul.mubr.bf16.gmra.mrb[36].mxu0 %v2051_v25  ;;  %v8191_v25 = vld [vmem:[#allocation56_spill] sm:$0xff] }
 0x195   : > { %5422 = vmatprep.mubr.bf16.mxu0 %v2052_v63  ;;  %5451 = vmatpush3.bf16.msra.mxu0 %v6154_v14  ;;  %v3009_v63 = vmul.f32 %v8188_v47, %v8189_v15  ;;  %v8193_v14 = vld [vmem:[#allocation57_spill] sm:$0xff]  ;;  %v3011_v4 = vmul.f32 %v7136_v33, %v8191_v25 }
 0x196   : > { %5559 = vmatmul.mubr.bf16.vlgmr.msra.gmra.mrb[16].mxu1 %v3031_v62  ;;  %v2031_v62 = vmul.f32 %v7141_v13, %v8191_v25 }
 0x197   : > { %5591 = vmatpush3.bf16.msra.mxu1 %v6119_v28  ;;  %5562 = vmatprep.mubr.bf16.mxu1 %v3032_v37  ;;  %v6155_v28 = vld [vmem:[%s7935_s5 + $0xd8] sm:$0xff]   ;;  %v3035_v47 = vpack.c.bf16 %v3009_v63, %v7215_v19  ;;  %v3036_v33 = vpack.c.bf16 %v3011_v4, %v7217_v51 }
 0x198   : > { %5592 = vmatprep.subr.bf16.mxu1 %v6120_v43  ;;  %5452 = vmatprep.subr.bf16.mxu0 %v6155_v28  ;;  %v2055_v9 = vpack.c.bf16 %v2031_v62, %v7217_v51  ;;  %v6159_v62 = vld [vmem:[%s7935_s5 + $0xf8] sm:$0xff]  }
 0x199   : > { %5453 = vmatpush3.bf16.msra.mxu0 %v6155_v28  ;;  %v8194_v28 = vld [vmem:[#allocation60_spill] sm:$0xff] }
 0x19a   : > { %5454 = vmatprep.subr.bf16.mxu0 %v6156_v12  ;;  %v3015_v25 = vmul.f32 %v8193_v14, %v8194_v28 }
 0x19b   : > { %5593 = vmatpush3.bf16.msra.mxu1 %v6120_v43  ;;  %v8192_v43 = vld [vmem:[#allocation58_spill] sm:$0xff] }
 0x19c   : > { %5594 = vmatprep.subr.bf16.mxu1 %v6121_v18  ;;  %5423 = vmatmul.mubr.bf16.gmra.mrb[40].mxu0 %v2053_v29  ;;  %v2033_v37 = vmul.f32 %v8193_v14, %v8192_v43  ;;  %v8195_v29 = vld [vmem:[#allocation59_spill] sm:$0xff]  ;;  %v3038_v14 = vpack.c.bf16 %v3015_v25, %v7237_v54 }
 0x19d   : > { %5426 = vmatprep.mubr.bf16.mxu0 %v2054_v60  ;;  %5455 = vmatpush3.bf16.msra.mxu0 %v6156_v12  ;;  %v3013_v60 = vmul.f32 %v7141_v13, %v8192_v43  ;;  %v6125_v12 = vld [vmem:[%s7935_s5 + $0x1b0] sm:$0xff]  }
 0x19e   : > { %5563 = vmatmul.mubr.bf16.gmra.mrb[20].mxu1 %v3033_v59  ;;  %5456 = vmatprep.subr.bf16.mxu0 %v6157_v23  ;;  %v2056_v15 = vpack.c.bf16 %v2033_v37, %v7219_v57  ;;  %v2035_v59 = vmul.f32 %v8195_v29, %v8194_v28  ;;  %v6126_v37 = vld [vmem:[%s7935_s5 + $0x1b8] sm:$0xff]  }
 0x19f   : > { %5566 = vmatprep.mubr.bf16.mxu1 %v3034_v61  ;;  %5595 = vmatpush3.bf16.msra.mxu1 %v6121_v18  ;;  %v6124_v18 = vld [vmem:[%s7935_s5 + $0x1a8] sm:$0xff]   ;;  %v3037_v13 = vpack.c.bf16 %v3013_v60, %v7219_v57 }
 0x1a0   : > { %5596 = vmatprep.subr.bf16.mxu1 %v6122_v36  ;;  %v2057_v63 = vpack.c.bf16 %v2035_v59, %v7237_v54  ;;  %v8198_v60 = vld [vmem:[#allocation64_spill] sm:$0xff] }
 0x1a1   : > { %5457 = vmatpush3.bf16.msra.mxu0 %v6157_v23 }
 0x1a2   : > { %5458 = vmatprep.subr.bf16.mxu0 %v6158_v3 }
 0x1a3   : > { %5597 = vmatpush3.bf16.msra.mxu1 %v6122_v36  ;;  %v8196_v36 = vld [vmem:[#allocation61_spill] sm:$0xff] }
 0x1a4   : > { %5598 = vmatprep.subr.bf16.mxu1 %v6123_v20  ;;  %5427 = vmatmul.mubr.bf16.gmra.mrb[44].mxu0 %v2055_v9  ;;  %v2037_v61 = vmul.f32 %v7175_v1, %v8196_v36  ;;  %v3017_v23 = vmul.f32 %v8195_v29, %v8196_v36  ;;  %v2041_v9 = vmul.f32 %v7189_v7, %v7201_v10 }
 0x1a5   : > { %5430 = vmatprep.mubr.bf16.mxu0 %v2056_v15  ;;  %5459 = vmatpush3.bf16.msra.mxu0 %v6158_v3  ;;  %v2045_v36 = vmul.f32 %v7224_v56, %v7241_v26 }
 0x1a6   : > { %5567 = vmatmul.mubr.bf16.gmra.mrb[24].mxu1 %v3035_v47  ;;  %5460 = vmatprep.subr.bf16.mxu0 %v6159_v62  ;;  %v2058_v43 = vpack.c.bf16 %v2037_v61, %v7239_v53  ;;  %v6127_v47 = vld [vmem:[%s7935_s5 + $0x1c0] sm:$0xff]   ;;  %v3039_v3 = vpack.c.bf16 %v3017_v23, %v7239_v53  ;;  %v2060_v28 = vpack.c.bf16 %v2041_v9, %v7278_v42  ;;  %v8200_v23 = vld [vmem:[#allocation4_spill] sm:$0xff] }
 0x1a7   : > { %5570 = vmatprep.mubr.bf16.mxu1 %v3036_v33  ;;  %5599 = vmatpush3.bf16.msra.mxu1 %v6123_v20  ;;  %v8197_v20 = vld [vmem:[#allocation62_spill] sm:$0xff]  ;;  %v3023_v61 = vmul.f32 %v7189_v7, %v8198_v60  ;;  %v3025_v7 = vmul.f32 %v7300_v22, %v7241_v26 }
 0x1a8   : > { %5600 = vmatprep.subr.bf16.mxu1 %v6124_v18  ;;  %v2039_v4 = vmul.f32 %v7184_v52, %v8197_v20  ;;  %v3019_v15 = vmul.f32 %v7175_v1, %v8197_v20  ;;  %v2043_v1 = vmul.f32 %v7300_v22, %v8198_v60  ;;  %v3305_v26 = vld [vmem:[#allocation2 + $0x37] sm:$0xff]  ;;  %v8205_v60 = vld [vmem:[#allocation8_spill] sm:$0xff] }
 0x1a9   : > { %5461 = vmatpush3.bf16.msra.mxu0 %v6159_v62  ;;  %v2062_v62 = vpack.c.bf16 %v2045_v36, %v7314_v48 }
 0x1aa   : > { %v2059_v33 = vpack.c.bf16 %v2039_v4, %v7259_v46  ;;  %v3040_v29 = vpack.c.bf16 %v3019_v15, %v7259_v46  ;;  %v8199_v4 = vld [vmem:[#allocation5_spill] sm:$0xff]  ;;  %v8202_v15 = vld [vmem:[#allocation6_spill] sm:$0xff] }
 0x1ab   : > { %5601 = vmatpush3.bf16.msra.mxu1 %v6124_v18  ;;  %v828_v18 = vadd.s32 248, %v6561_v0  ;;  %v3021_v0 = vmul.f32 %v7184_v52, %v7201_v10  ;;  %v3027_v10 = vmul.f32 %v7224_v56, %v7261_v45  ;;  %v8201_v9 = vpack.c.bf16 %v8199_v4, %v8200_v23 }
 0x1ac   : > { %5602 = vmatprep.subr.bf16.mxu1 %v6125_v12  ;;  %5431 = vmatmul.mubr.bf16.gmra.mrb[48].mxu0 %v2057_v63 }
 0x1ad   : > { %5434 = vmatprep.mubr.bf16.mxu0 %v2058_v43  ;;  %v1050_v59 = vand.u32 15, %v828_v18  ;;  %v3041_v25 = vpack.c.bf16 %v3021_v0, %v7278_v42  ;;  %v3044_v20 = vpack.c.bf16 %v3027_v10, %v7325_v16  ;;  %v8207_v0 = vld [vmem:[#allocation14_spill] sm:$0xff] }
 0x1ae   : > { %5571 = vmatmul.mubr.bf16.gmra.mrb[28].mxu1 %v3037_v13  ;;  %v3042_v13 = vpack.c.bf16 %v3023_v61, %v7280_v17  ;;  %v2329_v61 = vld [vmem:[#allocation2 + $0x57] sm:$0xff] }
 0x1af   : > { %5574 = vmatprep.mubr.bf16.mxu1 %v3038_v14  ;;  %5603 = vmatpush3.bf16.msra.mxu1 %v6125_v12  ;;  %vm1340_vm15 = vcmp.lt.s32.totalorder %v1050_v59, 15  ;;  %v2061_v12 = vpack.c.bf16 %v2043_v1, %v7280_v17  ;;  %v3304_v14 = vld [vmem:[#allocation2 + $0x2f] sm:$0xff]  ;;  %v8204_v59 = vld [vmem:[#allocation7_spill] sm:$0xff]  ;;  %v8213_v10 = vld [vmem:[#allocation10_spill] sm:$0xff] }
 0x1b0   : > { %5604 = vmatprep.subr.bf16.mxu1 %v6126_v37  ;;  %v7544_v63 = vsel %vm1340_vm15, 1.0, %v7295_v39  ;;  %v2356_v18 = vmul.f32 %v8202_v15, %v3304_v14  ;;  %v8206_v1 = vpack.c.bf16 %v8204_v59, %v8205_v60 }
 0x1b1   : > { %v2047_v52 = vmul.f32 %v7544_v63, %v7261_v45  ;;  %v3029_v22 = vmul.f32 %v7544_v63, %v7263_v24  ;;  %v8203_v45 = vld [vmem:[#allocation3_spill] sm:$0xff]  ;;  %v6128_v24 = vld [vmem:[%s7935_s5 + $0x1c8] sm:$0xff]  }
 0x1b2   : > { %v3336_v56 = vmul.f32 %v8203_v45, %v3304_v14  ;;  %v6130_v14 = vld [vmem:[%s7935_s5 + $0x1d8] sm:$0xff]   ;;  %v6131_v45 = vld [vmem:[%s7935_s5 + $0x1e0] sm:$0xff]  }
 0x1b3   : > { %5605 = vmatpush3.bf16.msra.mxu1 %v6126_v37  ;;  %v2063_v43 = vpack.c.bf16 %v2047_v52, %v7325_v16  ;;  %v3043_v37 = vpack.c.bf16 %v3025_v7, %v7314_v48  ;;  %v8212_v7 = vld [vmem:[#allocation11_spill] sm:$0xff] }
 0x1b4   : > { %5638 = vmatprep.subr.bf16.mxu1 %v6127_v47  ;;  %5435 = vmatmul.mubr.bf16.gmra.mrb[52].mxu0 %v2059_v33  ;;  %v2387_v33 = vpack.c.bf16 %v3305_v26, %v2356_v18  ;;  %v8221_v18 = vld [vmem:[#allocation16_spill] sm:$0xff] }
 0x1b5   : > { %5438 = vmatprep.mubr.bf16.mxu0 %v2060_v28  ;;  %v2328_v28 = vld [vmem:[#allocation2 + $0x4f] sm:$0xff] }
 0x1b6   : > { %5575 = vmatmul.mubr.bf16.gmra.mrb[0].mxu1 %v3039_v3  ;;  %v3045_v3 = vpack.c.bf16 %v3029_v22, %v7327_v30  ;;  %v2360_v36 = vmul.f32 %v8207_v0, %v2328_v28  ;;  %v8222_v22 = vpack.c.bf16 %v6747_v11, %v8221_v18  ;;  %v3320_v28 = vld [vmem:[#allocation2 + $0xaf] sm:$0xff]  ;;  %v3319_v0 = vld [vmem:[#allocation2 + $0xa7] sm:$0xff] }
 0x1b7   : > { %5578 = vmatprep.mubr.bf16.mxu1 %v3040_v29  ;;  %v3368_v29 = vpack.c.bf16 %v3305_v26, %v3336_v56  ;;  %v8223_v56 = vld [vmem:[#allocation24_spill] sm:$0xff] }
 0x1b8   : > { %v8224_v26 = vpack.c.bf16 %v6826_v32, %v8223_v56  ;;  %v3331_v18 = vld [vmem:[#allocation2 + $0x107] sm:$0xff] }
 0x1bc   : > { %5439 = vmatmul.mubr.bf16.gmra.mrb[56].mxu0 %v2061_v12  ;;  %v2389_v12 = vpack.c.bf16 %v2329_v61, %v2360_v36  ;;  %v3352_v36 = vmul.f32 %v6813_v44, %v3320_v28  ;;  %v6135_v44 = vld [vmem:[%s7935_s5 + $0x200] sm:$0xff]  }
 0x1bd   : > { %5442 = vmatprep.mubr.bf16.mxu0 %v2062_v62 }
 0x1be   : > { %5579 = vmatmul.mubr.bf16.gmra.mrb[4].mxu1 %v3041_v25  ;;  %v8208_v25 = vld [vmem:[#allocation9_spill] sm:$0xff] }
 0x1bf   : > { %5582 = vmatprep.mubr.bf16.mxu1 %v3042_v13  ;;  %v8209_v62 = vpack.c.bf16 %v8204_v59, %v8208_v25  ;;  %v8210_v13 = vld [vmem:[#allocation13_spill] sm:$0xff] }
 0x1c0   : > { %v8211_v52 = vpack.c.bf16 %v6681_v2, %v8210_v13 }
 0x1c4   : > { %5443 = vmatmul.mubr.bf16.gmra.mrb[60].mxu0 %v2063_v43  ;;  %v8214_v43 = vpack.c.bf16 %v8212_v7, %v8213_v10  ;;  %v3325_v7 = vld [vmem:[#allocation2 + $0xd7] sm:$0xff] }
 0x1c5   : > { %5462 = vmatprep.mubr.bf16.mxu0 %v8201_v9  ;;  %v8219_v9 = vld [vmem:[#allocation19_spill] sm:$0xff] }
 0x1c6   : > { %5583 = vmatmul.mubr.bf16.gmra.mrb[8].mxu1 %v3043_v37  ;;  %v6129_v37 = vld [vmem:[%s7935_s5 + $0x1d0] sm:$0xff]   ;;  %v8220_v15 = vpack.c.bf16 %v6755_v35, %v8219_v9  ;;  %v3330_v9 = vld [vmem:[#allocation2 + $0xff] sm:$0xff] }
 0x1c7   : > { %5586 = vmatprep.mubr.bf16.mxu1 %v3044_v20  ;;  %v8215_v20 = vld [vmem:[#allocation17_spill] sm:$0xff] }
 0x1c8   : > { %v8216_v4 = vpack.c.bf16 %v6747_v11, %v8215_v20  ;;  %v8225_v11 = vld [vmem:[#allocation21_spill] sm:$0xff] }
 0x1cc   : > { %5463 = vmatmul.mubr.bf16.vlgmr.msra.gmra.mrb[32].mxu0 %v2387_v33  ;;  %v3318_v33 = vld [vmem:[#allocation2 + $0x9f] sm:$0xff] }
 0x1cd   : > { %5466 = vmatprep.mubr.bf16.mxu0 %v8206_v1  ;;  %v3350_v60 = vmul.f32 %v6780_v34, %v3318_v33  ;;  %v6133_v1 = vld [vmem:[%s7935_s5 + $0x1f0] sm:$0xff]   ;;  %v3643_v33 = vld [vmem:[#allocation2 + $0x38] sm:$0xff] }
 0x1ce   : > { %5587 = vmatmul.mubr.bf16.gmra.mrb[12].mxu1 %v3045_v3  ;;  %v8226_v3 = vpack.c.bf16 %v6755_v35, %v8225_v11  ;;  %v3321_v35 = vld [vmem:[#allocation2 + $0xb7] sm:$0xff]  ;;  %v3324_v34 = vld [vmem:[#allocation2 + $0xcf] sm:$0xff] }
 0x1cf   : > { %5606 = vmatprep.mubr.bf16.mxu1 %v3368_v29  ;;  %v8227_v29 = vld [vmem:[#allocation22_spill] sm:$0xff]  ;;  %v3375_v61 = vpack.c.bf16 %v3319_v0, %v3350_v60  ;;  %v3356_v13 = vmul.f32 %v8161_v6, %v3324_v34  ;;  %v3332_v6 = vld [vmem:[#allocation2 + $0x10f] sm:$0xff] }
 0x1d0   : > { %v8228_v59 = vpack.c.bf16 %v6826_v32, %v8227_v29  ;;  %v6134_v32 = vld [vmem:[%s7935_s5 + $0x1f8] sm:$0xff]   ;;  %v3645_v29 = vld [vmem:[#allocation2 + $0x48] sm:$0xff] }
 0x1d1   : > { %v3378_v10 = vpack.c.bf16 %v3325_v7, %v3356_v13  ;;  %v3652_v13 = vld [vmem:[#allocation2 + $0x80] sm:$0xff]  ;;  %v3654_v7 = vld [vmem:[#allocation2 + $0x90] sm:$0xff] }
 0x1d4   : > { %5467 = vmatmul.mubr.bf16.gmra.mrb[36].mxu0 %v2389_v12  ;;  %v3376_v12 = vpack.c.bf16 %v3321_v35, %v3352_v36  ;;  %v3649_v36 = vld [vmem:[#allocation2 + $0x68] sm:$0xff]  ;;  %v3648_v35 = vld [vmem:[#allocation2 + $0x60] sm:$0xff] }
 0x1d5   : > { %5470 = vmatprep.mubr.bf16.mxu0 %v8211_v52 }
 0x1d6   : > { %5607 = vmatmul.mubr.bf16.vlgmr.msra.gmra.mrb[16].mxu1 %v8209_v62  ;;  %v3323_v62 = vld [vmem:[#allocation2 + $0xc7] sm:$0xff] }
 0x1d7   : > { %5639 = vmatpush3.bf16.msra.mxu1 %v6127_v47  ;;  %5610 = vmatprep.mubr.bf16.mxu1 %v8214_v43  ;;  %v8217_v47 = vld [vmem:[#allocation15_spill] sm:$0xff] }
 0x1d8   : > { %5640 = vmatprep.subr.bf16.mxu1 %v6128_v24  ;;  %v8218_v23 = vpack.c.bf16 %v6681_v2, %v8217_v47  ;;  %v6132_v2 = vld [vmem:[%s7935_s5 + $0x1e8] sm:$0xff]   ;;  %v3326_v43 = vld [vmem:[#allocation2 + $0xdf] sm:$0xff]  ;;  %v3329_v47 = vld [vmem:[#allocation2 + $0xf7] sm:$0xff] }
 0x1db   : > { %5641 = vmatpush3.bf16.msra.mxu1 %v6128_v24  ;;  %v3322_v24 = vld [vmem:[#allocation2 + $0xbf] sm:$0xff] }
 0x1dc   : > { %5642 = vmatprep.subr.bf16.mxu1 %v6129_v37  ;;  %5471 = vmatmul.mubr.bf16.gmra.mrb[40].mxu0 %v8216_v4  ;;  %v3354_v25 = vmul.f32 %v8159_v40, %v3322_v24  ;;  %v3327_v40 = vld [vmem:[#allocation2 + $0xe7] sm:$0xff]  ;;  %v6138_v24 = vld [vmem:[%s7935_s5 + $0x218] sm:$0xff]  }
 0x1dd   : > { %5474 = vmatprep.mubr.bf16.mxu0 %v8220_v15  ;;  %v3362_v15 = vmul.f32 %v6988_v55, %v3330_v9  ;;  %v3647_v55 = vld [vmem:[#allocation2 + $0x58] sm:$0xff] }
 0x1de   : > { %5611 = vmatmul.mubr.bf16.gmra.mrb[20].mxu1 %v8218_v23  ;;  %v3377_v52 = vpack.c.bf16 %v3323_v62, %v3354_v25  ;;  %v6139_v25 = vld [vmem:[%s7935_s5 + $0x220] sm:$0xff]   ;;  %v3655_v62 = vld [vmem:[#allocation2 + $0x98] sm:$0xff] }
 0x1df   : > { %5614 = vmatprep.mubr.bf16.mxu1 %v8222_v22  ;;  %5643 = vmatpush3.bf16.msra.mxu1 %v6129_v37  ;;  %v3328_v37 = vld [vmem:[#allocation2 + $0xef] sm:$0xff]  ;;  %v3364_v22 = vmul.f32 %v7064_v31, %v3332_v6 }
 0x1e0   : > { %5644 = vmatprep.subr.bf16.mxu1 %v6130_v14  ;;  %v3360_v20 = vmul.f32 %v8169_v50, %v3328_v37  ;;  %v3335_v50 = vld [vmem:[#allocation2 + $0x127] sm:$0xff]  ;;  %v3646_v31 = vld [vmem:[#allocation2 + $0x50] sm:$0xff] }
 0x1e1   : > { %v3676_v0 = vpack.c.bf16 %v3647_v55, %v3646_v31  ;;  %v6141_v37 = vld [vmem:[%s7935_s5 + $0x230] sm:$0xff]   ;;  %v3661_v6 = vld [vmem:[#allocation2 + $0xc8] sm:$0xff]  ;;  %v6146_v31 = vld [vmem:[%s7937_s7 + $0x18] sm:$0xff]  }
 0x1e2   : > { %v3380_v23 = vpack.c.bf16 %v3329_v47, %v3360_v20  ;;  %v3656_v20 = vld [vmem:[#allocation2 + $0xa0] sm:$0xff]  ;;  %v3658_v47 = vld [vmem:[#allocation2 + $0xb0] sm:$0xff]  ;;  %v3669_v55 = vld [vmem:[#allocation2 + $0x108] sm:$0xff] }
 0x1e3   : > { %5645 = vmatpush3.bf16.msra.mxu1 %v6130_v14  ;;  %v3358_v14 = vmul.f32 %v8167_v38, %v3326_v43  ;;  %v3680_v43 = vpack.c.bf16 %v3655_v62, %v3654_v7  ;;  %v8237_v7 = vld [vmem:[#allocation66_spill] sm:$0xff] }
 0x1e4   : > { %5646 = vmatprep.subr.bf16.mxu1 %v6131_v45  ;;  %5475 = vmatmul.mubr.bf16.gmra.mrb[44].mxu0 %v8224_v26  ;;  %v3334_v26 = vld [vmem:[#allocation2 + $0x11f] sm:$0xff] }
 0x1e5   : > { %v3379_v4 = vpack.c.bf16 %v3327_v40, %v3358_v14  ;;  %v3366_v38 = vmul.f32 %v7086_v41, %v3334_v26  ;;  %v6137_v41 = vld [vmem:[%s7935_s5 + $0x210] sm:$0xff]   ;;  %v3657_v14 = vld [vmem:[#allocation2 + $0xa8] sm:$0xff]  ;;  %v3659_v40 = vld [vmem:[#allocation2 + $0xb8] sm:$0xff] }
 0x1e6   : > { %5615 = vmatmul.mubr.bf16.gmra.mrb[24].mxu1 %v8226_v3  ;;  %v3642_v3 = vld [vmem:[#allocation2 + $0x30] sm:$0xff]  ;;  %v3682_v9 = vpack.c.bf16 %v3659_v40, %v3658_v47  ;;  %v3667_v26 = vld [vmem:[#allocation2 + $0xf8] sm:$0xff]  ;;  %v8251_v47 = vld [vmem:[#allocation72_spill] sm:$0xff] }
 0x1e7   : > { %5618 = vmatprep.mubr.bf16.mxu1 %v8228_v59  ;;  %5647 = vmatpush3.bf16.msra.mxu1 %v6131_v45  ;;  %v3381_v45 = vpack.c.bf16 %v3331_v18, %v3362_v15  ;;  %v3383_v11 = vpack.c.bf16 %v3335_v50, %v3366_v38  ;;  %v3674_v28 = vpack.c.bf16 %v3643_v33, %v3642_v3  ;;  %v3644_v59 = vld [vmem:[#allocation2 + $0x40] sm:$0xff]  ;;  %v3663_v15 = vld [vmem:[#allocation2 + $0xd8] sm:$0xff]  ;;  %v6144_v33 = vld [vmem:[%s7937_s7 + $0x8] sm:$0xff]  }
 0x1e8   : > { %5648 = vmatprep.subr.bf16.mxu1 %v6132_v2  ;;  %v3675_v60 = vpack.c.bf16 %v3645_v29, %v3644_v59  ;;  %v3660_v18 = vld [vmem:[#allocation2 + $0xc0] sm:$0xff]  ;;  %v3666_v3 = vld [vmem:[#allocation2 + $0xf0] sm:$0xff]  ;;  %v3671_v59 = vld [vmem:[#allocation2 + $0x118] sm:$0xff] }
 0x1e9   : > { %v3664_v38 = vld [vmem:[#allocation2 + $0xe0] sm:$0xff]  ;;  %v6145_v29 = vld [vmem:[%s7937_s7 + $0x10] sm:$0xff]   ;;  %v8247_v40 = vld [vmem:[#allocation70_spill] sm:$0xff] }
 0x1ea   : > { %v6143_v50 = vld [vmem:[%s7937_s7] sm:$0xff]  }
 0x1eb   : > { %5649 = vmatpush3.bf16.msra.mxu1 %v6132_v2  ;;  %v3333_v2 = vld [vmem:[#allocation2 + $0x117] sm:$0xff]  ;;  %5734 = vmatprep.subr.bf16.mxu0 %v6143_v50 }
 0x1ec   : > { %5650 = vmatprep.subr.bf16.mxu1 %v6133_v1  ;;  %v3382_v56 = vpack.c.bf16 %v3333_v2, %v3364_v22  ;;  %v3683_v22 = vpack.c.bf16 %v3661_v6, %v3660_v18  ;;  %5735 = vmatpush3.bf16.msra.mxu0 %v6143_v50 }
 0x1ed   : > { %5736 = vmatprep.subr.bf16.mxu0 %v6144_v33 }
 0x1ee   : > { %5619 = vmatmul.mubr.bf16.gmra.mrb[28].mxu1 %v3375_v61  ;;  %v3651_v61 = vld [vmem:[#allocation2 + $0x78] sm:$0xff] }
 0x1ef   : > { %5622 = vmatprep.mubr.bf16.mxu1 %v3376_v12  ;;  %5651 = vmatpush3.bf16.msra.mxu1 %v6133_v1  ;;  %v6136_v1 = vld [vmem:[%s7935_s5 + $0x208] sm:$0xff]   ;;  %v3650_v12 = vld [vmem:[#allocation2 + $0x70] sm:$0xff] }
 0x1f0   : > { %5652 = vmatprep.subr.bf16.mxu1 %v6134_v32  ;;  %v3678_v34 = vpack.c.bf16 %v3651_v61, %v3650_v12  ;;  %5737 = vmatpush3.bf16.msra.mxu0 %v6144_v33  ;;  %v6147_v61 = vld [vmem:[%s7937_s7 + $0x20] sm:$0xff]   ;;  %v3948_v12 = vld [vmem:[#allocation2 + $0x31] sm:$0xff] }
 0x1f1   : > { %5738 = vmatprep.subr.bf16.mxu0 %v6145_v29 }
 0x1f3   : > { %5653 = vmatpush3.bf16.msra.mxu1 %v6134_v32  ;;  %v3677_v32 = vpack.c.bf16 %v3649_v36, %v3648_v35  ;;  %v3949_v36 = vld [vmem:[#allocation2 + $0x39] sm:$0xff] }
 0x1f4   : > { %5686 = vmatprep.subr.bf16.mxu1 %v6135_v44  ;;  %5739 = vmatpush3.bf16.msra.mxu0 %v6145_v29  ;;  %v3981_v35 = vmul.f32 %v7414_v27, %v3949_v36  ;;  %v6149_v36 = vld [vmem:[%s7937_s7 + $0x30] sm:$0xff]  }
 0x1f5   : > { %5740 = vmatprep.subr.bf16.mxu0 %v6146_v31 }
 0x1f6   : > { %5623 = vmatmul.mubr.bf16.gmra.mrb[0].mxu1 %v3377_v52 }
 0x1f7   : > { %5626 = vmatprep.mubr.bf16.mxu1 %v3378_v10  ;;  %v6140_v10 = vld [vmem:[%s7935_s5 + $0x228] sm:$0xff]  }
 0x1f8   : > { %5741 = vmatpush3.bf16.msra.mxu0 %v6146_v31  ;;  %v6148_v31 = vld [vmem:[%s7937_s7 + $0x28] sm:$0xff]  }
 0x1f9   : > { %5742 = vmatprep.subr.bf16.mxu0 %v6147_v61 }
 0x1fc   : > { %5743 = vmatpush3.bf16.msra.mxu0 %v6147_v61 }
 0x1fd   : > { %5744 = vmatprep.subr.bf16.mxu0 %v6148_v31 }
 0x1fe   : > { %5627 = vmatmul.mubr.bf16.gmra.mrb[4].mxu1 %v3379_v4  ;;  %v3681_v4 = vpack.c.bf16 %v3657_v14, %v3656_v20  ;;  %v8245_v14 = vld [vmem:[#allocation69_spill] sm:$0xff] }
 0x1ff   : > { %5630 = vmatprep.mubr.bf16.mxu1 %v3380_v23  ;;  %v6142_v23 = vld [vmem:[%s7935_s5 + $0x238] sm:$0xff]  }
 0x200   : > { %5745 = vmatpush3.bf16.msra.mxu0 %v6148_v31 }
 0x201   : > { %5746 = vmatprep.subr.bf16.mxu0 %v6149_v36 }
 0x204   : > { %5747 = vmatpush3.bf16.msra.mxu0 %v6149_v36 }
 0x206   : > { %5631 = vmatmul.mubr.bf16.gmra.mrb[8].mxu1 %v3381_v45  ;;  %v3662_v45 = vld [vmem:[#allocation2 + $0xd0] sm:$0xff] }
 0x207   : > { %5634 = vmatprep.mubr.bf16.mxu1 %v3382_v56  ;;  %v3684_v2 = vpack.c.bf16 %v3663_v15, %v3662_v45  ;;  %v3665_v56 = vld [vmem:[#allocation2 + $0xe8] sm:$0xff] }
 0x20e   : > { %5635 = vmatmul.mubr.bf16.gmra.mrb[12].mxu1 %v3383_v11  ;;  %v3685_v11 = vpack.c.bf16 %v3665_v56, %v3664_v38 }
 0x20f   : > { %5654 = vmatprep.mubr.bf16.mxu1 %v3674_v28  ;;  %v3686_v28 = vpack.c.bf16 %v3667_v26, %v3666_v3 }
 0x216   : > { %5655 = vmatmul.mubr.bf16.vlgmr.msra.gmra.mrb[16].mxu1 %v3675_v60  ;;  %v3668_v60 = vld [vmem:[#allocation2 + $0x100] sm:$0xff] }
 0x217   : > { %5687 = vmatpush3.bf16.msra.mxu1 %v6135_v44  ;;  %5658 = vmatprep.mubr.bf16.mxu1 %v3676_v0  ;;  %v3653_v44 = vld [vmem:[#allocation2 + $0x88] sm:$0xff]  ;;  %v3670_v0 = vld [vmem:[#allocation2 + $0x110] sm:$0xff] }
 0x218   : > { %5688 = vmatprep.subr.bf16.mxu1 %v6136_v1  ;;  %v3679_v52 = vpack.c.bf16 %v3653_v44, %v3652_v13  ;;  %v8231_v44 = vld [vmem:[#allocation53_spill] sm:$0xff]  ;;  %v8233_v13 = vld [vmem:[#allocation54_spill] sm:$0xff] }
 0x219   : > { %v8232_v62 = vpack.c.bf16 %v8231_v44, %v7131_v49  ;;  %v8234_v27 = vpack.c.bf16 %v8233_v13, %v8190_v8  ;;  %v8240_v49 = vpack.c.bf16 %v7249_v21, %v7237_v54  ;;  %v7765_v44 = vld [vmem:[%s7936_s6] ss:$0 sm:$0xff] }
 0x21b   : > { %5689 = vmatpush3.bf16.msra.mxu1 %v6136_v1  ;;  %v3687_v1 = vpack.c.bf16 %v3669_v55, %v3668_v60 }
 0x21c   : > { %5690 = vmatprep.subr.bf16.mxu1 %v6137_v41 }
 0x21e   : > { %5659 = vmatmul.mubr.bf16.gmra.mrb[20].mxu1 %v3677_v32  ;;  %v3689_v32 = vpack.c.bf16 %v7295_v39, %v7295_v39  ;;  %v8235_v39 = vld [vmem:[#allocation65_spill] sm:$0xff] }
 0x21f   : > { %5662 = vmatprep.mubr.bf16.mxu1 %v3678_v34  ;;  %5691 = vmatpush3.bf16.msra.mxu1 %v6137_v41  ;;  %v3688_v41 = vpack.c.bf16 %v3671_v59, %v3670_v0  ;;  %v8229_v34 = vld [vmem:[#allocation52_spill] sm:$0xff] }
 0x220   : > { %5692 = vmatprep.subr.bf16.mxu1 %v6138_v24 }
 0x223   : > { %5693 = vmatpush3.bf16.msra.mxu1 %v6138_v24  ;;  %v4012_v24 = vpack.c.bf16 %v3981_v35, %v3948_v12  ;;  %v6150_v35 = vld [vmem:[%s7937_s7 + $0x38] sm:$0xff]  }
 0x224   : > { %5694 = vmatprep.subr.bf16.mxu1 %v6139_v25  ;;  %5748 = vmatprep.subr.bf16.mxu0 %v6150_v35 }
 0x225   : > { %5749 = vmatpush3.bf16.msra.mxu0 %v6150_v35 }
 0x226   : > { %5663 = vmatmul.mubr.bf16.gmra.mrb[24].mxu1 %v3679_v52  ;;  %v8236_v52 = vpack.c.bf16 %v8235_v39, %v7215_v19 }
 0x227   : > { %5666 = vmatprep.mubr.bf16.mxu1 %v3680_v43  ;;  %5695 = vmatpush3.bf16.msra.mxu1 %v6139_v25  ;;  %v8230_v25 = vpack.c.bf16 %v8229_v34, %v7129_v58  ;;  %v8239_v58 = vpack.c.bf16 %v7245_v5, %v7219_v57  ;;  %v8241_v43 = vld [vmem:[#allocation67_spill] sm:$0xff]  ;;  %v8248_v57 = vpack.c.bf16 %v8247_v40, %v7280_v17 }
 0x228   : > { %5696 = vmatprep.subr.bf16.mxu1 %v6140_v10  ;;  %v8242_v8 = vpack.c.bf16 %v8241_v43, %v7239_v53  ;;  %v8249_v5 = vld [vmem:[#allocation71_spill] sm:$0xff] }
 0x229   : > { %v8250_v54 = vpack.c.bf16 %v8249_v5, %v7314_v48  ;;  %v3978_v48 = vld [vmem:[#allocation2 + $0x121] sm:$0xff] }
 0x22b   : > { %5697 = vmatpush3.bf16.msra.mxu1 %v6140_v10  ;;  %v8238_v10 = vpack.c.bf16 %v8237_v7, %v7217_v51  ;;  %v8246_v51 = vpack.c.bf16 %v8245_v14, %v7278_v42  ;;  %v8252_v42 = vpack.c.bf16 %v8251_v47, %v7325_v16 }
 0x22c   : > { %5698 = vmatprep.subr.bf16.mxu1 %v6141_v37 }
 0x22e   : > { %5667 = vmatmul.mubr.bf16.gmra.mrb[28].mxu1 %v3681_v4  ;;  %v3979_v4 = vld [vmem:[#allocation2 + $0x129] sm:$0xff] }
 0x22f   : > { %5670 = vmatprep.mubr.bf16.mxu1 %v3682_v9  ;;  %5699 = vmatpush3.bf16.msra.mxu1 %v6141_v37  ;;  %v8243_v37 = vld [vmem:[#allocation68_spill] sm:$0xff]  ;;  %v4011_v17 = vmul.f32 %v7544_v63, %v3979_v4 }
 0x230   : > { %5700 = vmatprep.subr.bf16.mxu1 %v6142_v23  ;;  %v8244_v19 = vpack.c.bf16 %v8243_v37, %v7259_v46 }
 0x231   : > { %v4027_v18 = vpack.c.bf16 %v4011_v17, %v3978_v48 }
 0x233   : > { %5701 = vmatpush3.bf16.msra.mxu1 %v6142_v23  ;;  %v8253_v23 = vld [vmem:[#allocation73_spill] sm:$0xff] }
 0x234   : > { %v8254_v9 = vpack.c.bf16 %v8253_v23, %v7327_v30 }
 0x236   : > { %5671 = vmatmul.mubr.bf16.gmra.mrb[0].mxu1 %v3683_v22 }
 0x237   : > { %5674 = vmatprep.mubr.bf16.mxu1 %v3684_v2 }
 0x23e   : > { %5675 = vmatmul.mubr.bf16.gmra.mrb[4].mxu1 %v3685_v11 }
 0x23f   : > { %5678 = vmatprep.mubr.bf16.mxu1 %v3686_v28 }
 0x246   : > { %5679 = vmatmul.mubr.bf16.gmra.mrb[8].mxu1 %v3687_v1 }
 0x247   : > { %5682 = vmatprep.mubr.bf16.mxu1 %v3688_v41 }
 0x24e   : > { %5683 = vmatmul.mubr.bf16.gmra.mrb[12].mxu1 %v3689_v32 }
 0x24f   : > { %5702 = vmatprep.mubr.bf16.mxu1 %v4012_v24 }
 0x256   : > { %5703 = vmatmul.mubr.bf16.vlgmr.msra.gmra.mrb[16].mxu1 %v8230_v25 }
 0x257   : > { %5706 = vmatprep.mubr.bf16.mxu1 %v8232_v62 }
 0x25e   : > { %5707 = vmatmul.mubr.bf16.gmra.mrb[20].mxu1 %v8234_v27 }
 0x25f   : > { %5710 = vmatprep.mubr.bf16.mxu1 %v8236_v52 }
 0x266   : > { %5711 = vmatmul.mubr.bf16.gmra.mrb[24].mxu1 %v8238_v10 }
 0x267   : > { %5714 = vmatprep.mubr.bf16.mxu1 %v8239_v58 }
 0x26e   : > { %5715 = vmatmul.mubr.bf16.gmra.mrb[28].mxu1 %v8240_v49 }
 0x26f   : > { %5718 = vmatprep.mubr.bf16.mxu1 %v8242_v8 }
 0x276   : > { %5719 = vmatmul.mubr.bf16.gmra.mrb[0].mxu1 %v8244_v19 }
 0x277   : > { %5722 = vmatprep.mubr.bf16.mxu1 %v8246_v51 }
 0x27e   : > { %5723 = vmatmul.mubr.bf16.gmra.mrb[4].mxu1 %v8248_v57 }
 0x27f   : > { %5726 = vmatprep.mubr.bf16.mxu1 %v8250_v54  ;;  %v7706_v21 = vpop.f32.mrb[48].mxu0 }
 0x280   : > { %v7708_v53 = vpop.f32.mrb[49].mxu0 }
 0x281   : > { %v7710_v20 = vpop.f32.mrb[50].mxu0 }
 0x282   : > { %v7712_v46 = vpop.f32.mrb[51].mxu0 }
 0x286   : > { %5727 = vmatmul.mubr.bf16.gmra.mrb[8].mxu1 %v8252_v42 }
 0x287   : > { %5730 = vmatprep.mubr.bf16.mxu1 %v8254_v9  ;;  %v7721_v6 = vpop.f32.mrb[52].mxu0 }
 0x288   : > { %v7723_v15 = vpop.f32.mrb[53].mxu0 }
 0x289   : > { %v7725_v22 = vpop.f32.mrb[54].mxu0 }
 0x28a   : > { %v7727_v45 = vpop.f32.mrb[55].mxu0 }
 0x28e   : > { %5731 = vmatmul.mubr.bf16.gmra.mrb[12].mxu1 %v4027_v18 }
 0x28f   : > { %v7729_v2 = vpop.f32.mrb[56].mxu0 }
 0x290   : > { %v7731_v16 = vpop.f32.mrb[57].mxu0 }
 0x291   : > { %v7733_v63 = vpop.f32.mrb[58].mxu0 }
 0x292   : > { %v7735_v56 = vpop.f32.mrb[59].mxu0 }
 0x297   : > { %v7737_v30 = vpop.f32.mrb[60].mxu0 }
 0x298   : > { %v7739_v26 = vpop.f32.mrb[61].mxu0 }
 0x299   : > { %v7741_v38 = vpop.f32.mrb[62].mxu0 }
 0x29a   : > { %v7743_v50 = vpop.f32.mrb[63].mxu0 }
 0x29f   : > { %v5464_v33 = vpop.f32.mrb[32].mxu0 }
 0x2a0   : > { %v2501_v11 = vpop.f32.mrb[33].mxu0 }
 0x2a1   : > { %v5465_v3 = vpop.f32.mrb[34].mxu0 }
 0x2a2   : > { %v2504_v28 = vpop.f32.mrb[35].mxu0 }
 0x2a7   : > { %v5468_v29 = vpop.f32.mrb[36].mxu0 }
 0x2a8   : > { %v2517_v55 = vpop.f32.mrb[37].mxu0 }
 0x2a9   : > { %v5469_v59 = vpop.f32.mrb[38].mxu0 }
 0x2aa   : > { %v2520_v60 = vpop.f32.mrb[39].mxu0 }
 0x2af   : > { %v5472_v1 = vpop.f32.mrb[40].mxu0 }
 0x2b0   : > { %v2533_v0 = vpop.f32.mrb[41].mxu0 }
 0x2b1   : > { %v5473_v41 = vpop.f32.mrb[42].mxu0 }
 0x2b2   : > { %v2536_v61 = vpop.f32.mrb[43].mxu0 }
 0x2b7   : > { %v7754_v32 = vpop.f32.mrb[44].mxu0 }
 0x2b8   : > { %v7756_v12 = vpop.f32.mrb[45].mxu0 }
 0x2b9   : > { %v7758_v24 = vpop.f32.mrb[46].mxu0 }
 0x2ba   : > { %v7760_v34 = vpop.f32.mrb[47].mxu0 }
 0x329   : > { %v5704_v25 = vpop.f32.mrb[16].mxu1 }
 0x32a   : > { %v5798_v62 = vadd.f32 %v5704_v25, %v5464_v33  ;;  %v4127_v13 = vpop.f32.mrb[17].mxu1 }
 0x32b   : > { %v5799_v27 = vadd.f32 %v4127_v13, %v2501_v11  ;;  %v5705_v39 = vpop.f32.mrb[18].mxu1 }
 0x32c   : > { %v4295_v52 = vadd.f32 %v5798_v62, %v7765_v44  ;;  %v5800_v7 = vadd.f32 %v5705_v39, %v5465_v3  ;;  %v4130_v10 = vpop.f32.mrb[19].mxu1 }
 0x32d   : > { %v4293_v58 = vadd.f32 %v5799_v27, %v7765_v44  ;;  %v5801_v49 = vadd.f32 %v4130_v10, %v2504_v28 }
 0x32e   : > { %v4296_v43 = vadd.f32 %v5800_v7, %v7765_v44  ;;  %v4327_v37 = vmax.f32 %v4295_v52, 0.0 }
 0x32f   : > { %v4294_v8 = vadd.f32 %v5801_v49, %v7765_v44  ;;  %v4325_v14 = vmax.f32 %v4293_v58, 0.0 }
 0x330   : > { %v4328_v19 = vmax.f32 %v4296_v43, 0.0 }
 0x331   : > { %v4326_v51 = vmax.f32 %v4294_v8, 0.0  ;;  %v5708_v40 = vpop.f32.mrb[20].mxu1 }
 0x332   : > { %v4358_v57 = vpack.c.bf16 %v4328_v19, %v4327_v37  ;;  %v5802_v5 = vadd.f32 %v5708_v40, %v5468_v29  ;;  %v4143_v54 = vpop.f32.mrb[21].mxu1 }
 0x333   : > { %v5803_v4 = vadd.f32 %v4143_v54, %v2517_v55  ;;  %v5709_v47 = vpop.f32.mrb[22].mxu1  ;;  %v4357_v42 = vpack.c.bf16 %v4326_v51, %v4325_v14 }
 0x334   : > { %v4299_v17 = vadd.f32 %v5802_v5, %v7765_v44  ;;  %v5804_v23 = vadd.f32 %v5709_v47, %v5469_v59  ;;  %v4146_v9 = vpop.f32.mrb[23].mxu1 }
 0x335   : > { %v4297_v48 = vadd.f32 %v5803_v4, %v7765_v44  ;;  %v5805_v18 = vadd.f32 %v4146_v9, %v2520_v60  ;;  %5750 = vmatprep.mubr.bf16.mxu0 %v4357_v42 }
 0x336   : > { %v4300_v33 = vadd.f32 %v5804_v23, %v7765_v44  ;;  %5751 = vmatmul.mubr.bf16.vlgmr.msra.gmra.mrb[64].mxu0 %v4358_v57  ;;  %v4331_v3 = vmax.f32 %v4299_v17, 0.0 }
 0x337   : > { %v4298_v11 = vadd.f32 %v5805_v18, %v7765_v44  ;;  %v4329_v29 = vmax.f32 %v4297_v48, 0.0 }
 0x338   : > { %v4332_v28 = vmax.f32 %v4300_v33, 0.0 }
 0x339   : > { %v4330_v31 = vmax.f32 %v4298_v11, 0.0  ;;  %v5712_v55 = vpop.f32.mrb[24].mxu1 }
 0x33a   : > { %v5806_v36 = vadd.f32 %v5712_v55, %v5472_v1  ;;  %v4159_v35 = vpop.f32.mrb[25].mxu1  ;;  %v4360_v25 = vpack.c.bf16 %v4332_v28, %v4331_v3 }
 0x33b   : > { %v5807_v62 = vadd.f32 %v4159_v35, %v2533_v0  ;;  %v5713_v59 = vpop.f32.mrb[26].mxu1  ;;  %v4359_v13 = vpack.c.bf16 %v4330_v31, %v4329_v29 }
 0x33c   : > { %v4303_v27 = vadd.f32 %v5806_v36, %v7765_v44  ;;  %v5808_v60 = vadd.f32 %v5713_v59, %v5473_v41  ;;  %v4162_v39 = vpop.f32.mrb[27].mxu1 }
 0x33d   : > { %v4301_v52 = vadd.f32 %v5807_v62, %v7765_v44  ;;  %v5809_v7 = vadd.f32 %v4162_v39, %v2536_v61  ;;  %5754 = vmatprep.mubr.bf16.mxu0 %v4359_v13 }
 0x33e   : > { %v4304_v10 = vadd.f32 %v5808_v60, %v7765_v44  ;;  %5755 = vmatmul.mubr.bf16.gmra.mrb[68].mxu0 %v4360_v25  ;;  %v4335_v49 = vmax.f32 %v4303_v27, 0.0 }
 0x33f   : > { %v4302_v58 = vadd.f32 %v5809_v7, %v7765_v44  ;;  %v4333_v43 = vmax.f32 %v4301_v52, 0.0 }
 0x340   : > { %v4336_v1 = vmax.f32 %v4304_v10, 0.0 }
 0x341   : > { %v4334_v8 = vmax.f32 %v4302_v58, 0.0  ;;  %v5716_v0 = vpop.f32.mrb[28].mxu1 }
 0x342   : > { %v5810_v37 = vadd.f32 %v5716_v0, %v7754_v32  ;;  %v4175_v19 = vpop.f32.mrb[29].mxu1  ;;  %v4362_v14 = vpack.c.bf16 %v4336_v1, %v4335_v49 }
 0x343   : > { %v5811_v41 = vadd.f32 %v4175_v19, %v7756_v12  ;;  %v5717_v51 = vpop.f32.mrb[30].mxu1  ;;  %v4361_v40 = vpack.c.bf16 %v4334_v8, %v4333_v43 }
 0x344   : > { %v4307_v61 = vadd.f32 %v5810_v37, %v7765_v44  ;;  %v5812_v57 = vadd.f32 %v5717_v51, %v7758_v24  ;;  %v4178_v5 = vpop.f32.mrb[31].mxu1 }
 0x345   : > { %v4305_v54 = vadd.f32 %v5811_v41, %v7765_v44  ;;  %v5813_v4 = vadd.f32 %v4178_v5, %v7760_v34  ;;  %5758 = vmatprep.mubr.bf16.mxu0 %v4361_v40 }
 0x346   : > { %v4308_v47 = vadd.f32 %v5812_v57, %v7765_v44  ;;  %5759 = vmatmul.mubr.bf16.gmra.mrb[72].mxu0 %v4362_v14  ;;  %v4339_v42 = vmax.f32 %v4307_v61, 0.0 }
 0x347   : > { %v4306_v32 = vadd.f32 %v5813_v4, %v7765_v44  ;;  %v4337_v12 = vmax.f32 %v4305_v54, 0.0 }
 0x348   : > { %v4340_v17 = vmax.f32 %v4308_v47, 0.0 }
 0x349   : > { %v4338_v23 = vmax.f32 %v4306_v32, 0.0  ;;  %v5720_v9 = vpop.f32.mrb[0].mxu1 }
 0x34a   : > { %v5814_v48 = vadd.f32 %v5720_v9, %v7706_v21  ;;  %v4191_v18 = vpop.f32.mrb[1].mxu1  ;;  %v4364_v24 = vpack.c.bf16 %v4340_v17, %v4339_v42 }
 0x34b   : > { %v5815_v33 = vadd.f32 %v4191_v18, %v7708_v53  ;;  %v5721_v11 = vpop.f32.mrb[2].mxu1  ;;  %v4363_v3 = vpack.c.bf16 %v4338_v23, %v4337_v12 }
 0x34c   : > { %v4311_v34 = vadd.f32 %v5814_v48, %v7765_v44  ;;  %v5816_v28 = vadd.f32 %v5721_v11, %v7710_v20  ;;  %v4194_v29 = vpop.f32.mrb[3].mxu1 }
 0x34d   : > { %v4309_v31 = vadd.f32 %v5815_v33, %v7765_v44  ;;  %v5817_v55 = vadd.f32 %v4194_v29, %v7712_v46  ;;  %5762 = vmatprep.mubr.bf16.mxu0 %v4363_v3 }
 0x34e   : > { %v4312_v36 = vadd.f32 %v5816_v28, %v7765_v44  ;;  %5763 = vmatmul.mubr.bf16.gmra.mrb[76].mxu0 %v4364_v24  ;;  %v4343_v35 = vmax.f32 %v4311_v34, 0.0 }
 0x34f   : > { %v4310_v21 = vadd.f32 %v5817_v55, %v7765_v44  ;;  %v4341_v53 = vmax.f32 %v4309_v31, 0.0 }
 0x350   : > { %v4344_v25 = vmax.f32 %v4312_v36, 0.0 }
 0x351   : > { %v4342_v62 = vmax.f32 %v4310_v21, 0.0  ;;  %v5724_v59 = vpop.f32.mrb[4].mxu1 }
 0x352   : > { %v5818_v13 = vadd.f32 %v5724_v59, %v7721_v6  ;;  %v4207_v27 = vpop.f32.mrb[5].mxu1  ;;  %v4366_v20 = vpack.c.bf16 %v4344_v25, %v4343_v35 }
 0x353   : > { %v5819_v60 = vadd.f32 %v4207_v27, %v7723_v15  ;;  %v5725_v39 = vpop.f32.mrb[6].mxu1  ;;  %v4365_v52 = vpack.c.bf16 %v4342_v62, %v4341_v53  ;;  %v6160_v53 = vld [vmem:[%s6277_s20 + $0x10] sm:$0xff]  ;;  %v6161_v27 = vld [vmem:[%s6277_s20] sm:$0xff] }
 0x354   : > { %v4315_v46 = vadd.f32 %v5818_v13, %v7765_v44  ;;  %v5820_v7 = vadd.f32 %v5725_v39, %v7725_v22  ;;  %v4210_v10 = vpop.f32.mrb[7].mxu1  ;;  %v6162_v39 = vld [vmem:[%s6277_s20 + $0x18] sm:$0xff] }
 0x355   : > { %v4313_v58 = vadd.f32 %v5819_v60, %v7765_v44  ;;  %v5821_v49 = vadd.f32 %v4210_v10, %v7727_v45  ;;  %5766 = vmatprep.mubr.bf16.mxu0 %v4365_v52 }
 0x356   : > { %v4316_v1 = vadd.f32 %v5820_v7, %v7765_v44  ;;  %5767 = vmatmul.mubr.bf16.gmra.mrb[80].mxu0 %v4366_v20  ;;  %v4347_v43 = vmax.f32 %v4315_v46, 0.0  ;;  %v6163_v46 = vld [vmem:[%s6277_s20 + $0x8] sm:$0xff] }
 0x357   : > { %v4314_v6 = vadd.f32 %v5821_v49, %v7765_v44  ;;  %v4345_v15 = vmax.f32 %v4313_v58, 0.0 }
 0x358   : > { %v4348_v8 = vmax.f32 %v4316_v1, 0.0 }
 0x359   : > { %v4346_v0 = vmax.f32 %v4314_v6, 0.0  ;;  %v5728_v37 = vpop.f32.mrb[8].mxu1 }
 0x35a   : > { %v5822_v19 = vadd.f32 %v5728_v37, %v7729_v2  ;;  %v4223_v14 = vpop.f32.mrb[9].mxu1  ;;  %v4368_v22 = vpack.c.bf16 %v4348_v8, %v4347_v43  ;;  %v6164_v43 = vld [vmem:[%s6277_s20 + $0x30] sm:$0xff]  ;;  %v6165_v37 = vld [vmem:[%s6277_s20 + $0x20] sm:$0xff] }
 0x35b   : > { %v5823_v41 = vadd.f32 %v4223_v14, %v7731_v16  ;;  %v5729_v51 = vpop.f32.mrb[10].mxu1  ;;  %v4367_v40 = vpack.c.bf16 %v4346_v0, %v4345_v15 }
 0x35c   : > { %v4319_v45 = vadd.f32 %v5822_v19, %v7765_v44  ;;  %v5824_v61 = vadd.f32 %v5729_v51, %v7733_v63  ;;  %v4226_v57 = vpop.f32.mrb[11].mxu1  ;;  %v6167_v51 = vld [vmem:[%s6277_s20 + $0x28] sm:$0xff] }
 0x35d   : > { %v4317_v5 = vadd.f32 %v5823_v41, %v7765_v44  ;;  %v5825_v54 = vadd.f32 %v4226_v57, %v7735_v56  ;;  %5770 = vmatprep.mubr.bf16.mxu0 %v4367_v40 }
 0x35e   : > { %v4320_v4 = vadd.f32 %v5824_v61, %v7765_v44  ;;  %5771 = vmatmul.mubr.bf16.gmra.mrb[84].mxu0 %v4368_v22  ;;  %v4351_v47 = vmax.f32 %v4319_v45, 0.0  ;;  %v6166_v22 = vld [vmem:[%s6277_s20 + $0x38] sm:$0xff] }
 0x35f   : > { %v4318_v2 = vadd.f32 %v5825_v54, %v7765_v44  ;;  %v4349_v16 = vmax.f32 %v4317_v5, 0.0 }
 0x360   : > { %v4352_v32 = vmax.f32 %v4320_v4, 0.0  ;;  %v6168_v4 = vld [vmem:[%s6277_s20 + $0x50] sm:$0xff] }
 0x361   : > { %v4350_v42 = vmax.f32 %v4318_v2, 0.0  ;;  %v5732_v17 = vpop.f32.mrb[12].mxu1 }
 0x362   : > { %v5826_v12 = vadd.f32 %v5732_v17, %v7737_v30  ;;  %v4239_v23 = vpop.f32.mrb[13].mxu1  ;;  %v4370_v63 = vpack.c.bf16 %v4352_v32, %v4351_v47 }
 0x363   : > { %v5827_v9 = vadd.f32 %v4239_v23, %v7739_v26  ;;  %v5733_v48 = vpop.f32.mrb[14].mxu1  ;;  %v4369_v18 = vpack.c.bf16 %v4350_v42, %v4349_v16  ;;  %v6169_v16 = vld [vmem:[%s6277_s20 + $0x40] sm:$0xff] }
 0x364   : > { %v4323_v56 = vadd.f32 %v5826_v12, %v7765_v44  ;;  %v5828_v24 = vadd.f32 %v5733_v48, %v7741_v38  ;;  %v4242_v33 = vpop.f32.mrb[15].mxu1  ;;  %v6170_v12 = vld [vmem:[%s6277_s20 + $0x58] sm:$0xff] }
 0x365   : > { %v4321_v11 = vadd.f32 %v5827_v9, %v7765_v44  ;;  %v5829_v3 = vadd.f32 %v4242_v33, %v7743_v50  ;;  %5774 = vmatprep.mubr.bf16.mxu0 %v4369_v18  ;;  %v7822_v50 = vld [vmem:[%s7938_s8] ss:$0 sm:$0xff] }
 0x366   : > { %v4324_v34 = vadd.f32 %v5828_v24, %v7765_v44  ;;  %5775 = vmatmul.mubr.bf16.gmra.mrb[88].mxu0 %v4370_v63  ;;  %v4355_v26 = vmax.f32 %v4323_v56, 0.0  ;;  %v6171_v63 = vld [vmem:[%s6277_s20 + $0x48] sm:$0xff] }
 0x367   : > { %v4322_v30 = vadd.f32 %v5829_v3, %v7765_v44  ;;  %v4353_v29 = vmax.f32 %v4321_v11, 0.0  ;;  %v6172_v11 = vld [vmem:[%s6277_s20 + $0x70] sm:$0xff] }
 0x368   : > { %v4356_v28 = vmax.f32 %v4324_v34, 0.0 }
 0x369   : > { %v4354_v31 = vmax.f32 %v4322_v30, 0.0 }
 0x36a   : > { %v4372_v55 = vpack.c.bf16 %v4356_v28, %v4355_v26  ;;  %v6173_v26 = vld [vmem:[%s6277_s20 + $0x60] sm:$0xff] }
 0x36b   : > { %v4371_v38 = vpack.c.bf16 %v4354_v31, %v4353_v29  ;;  %v6174_v31 = vld [vmem:[%s6277_s20 + $0x78] sm:$0xff] }
 0x36d   : > { %5778 = vmatprep.mubr.bf16.mxu0 %v4371_v38  ;;  %v6175_v38 = vld [vmem:[%s6277_s20 + $0x68] sm:$0xff] }
 0x36e   : > { %5779 = vmatmul.mubr.bf16.gmra.mrb[92].mxu0 %v4372_v55 }
 0x409   : > { %v5752_v36 = vpop.f32.mrb[64].mxu0 }
 0x40a   : > { %v4487_v21 = vadd.f32 %v5752_v36, %v7822_v50  ;;  %v4478_v44 = vpop.f32.mrb[65].mxu0 }
 0x40b   : > { %v4479_v35 = vadd.f32 %v7822_v50, %v4478_v44  ;;  %v5753_v25 = vpop.f32.mrb[66].mxu0 }
 0x40c   : > { %v4607_v62 = vadd.f32 %v6160_v53, %v4487_v21  ;;  %v4490_v59 = vadd.f32 %v5753_v25, %v7822_v50  ;;  %v4481_v13 = vpop.f32.mrb[67].mxu0 }
 0x40d   : > { %v4605_v20 = vadd.f32 %v6161_v27, %v4479_v35  ;;  %v4482_v60 = vadd.f32 %v7822_v50, %v4481_v13 }
 0x40e   : > { %4639 = vst [vmem:[%s7830_s13 + $0x10] sm:$0xff] %v4607_v62  ;;  %v4608_v52 = vadd.f32 %v6162_v39, %v4490_v59  ;;  %v6176_v62 = vld [vmem:[%s6277_s20 + $0x90] sm:$0xff] }
 0x40f   : > { %4637 = vst [vmem:[%s7830_s13] sm:$0xff] %v4605_v20  ;;  %v4606_v7 = vadd.f32 %v6163_v46, %v4482_v60  ;;  %v6177_v20 = vld [vmem:[%s6277_s20 + $0x80] sm:$0xff] }
 0x410   : > { %4640 = vst [vmem:[%s7830_s13 + $0x18] sm:$0xff] %v4608_v52  ;;  %v6178_v52 = vld [vmem:[%s6277_s20 + $0x98] sm:$0xff] }
 0x411   : > { %4638 = vst [vmem:[%s7830_s13 + $0x8] sm:$0xff] %v4606_v7  ;;  %v5756_v10 = vpop.f32.mrb[68].mxu0  ;;  %v6179_v7 = vld [vmem:[%s6277_s20 + $0x88] sm:$0xff] }
 0x412   : > { %v4503_v58 = vadd.f32 %v5756_v10, %v7822_v50  ;;  %v4494_v49 = vpop.f32.mrb[69].mxu0 }
 0x413   : > { %v4495_v1 = vadd.f32 %v7822_v50, %v4494_v49  ;;  %v5757_v6 = vpop.f32.mrb[70].mxu0 }
 0x414   : > { %v4611_v8 = vadd.f32 %v6164_v43, %v4503_v58  ;;  %v4506_v15 = vadd.f32 %v5757_v6, %v7822_v50  ;;  %v4497_v0 = vpop.f32.mrb[71].mxu0 }
 0x415   : > { %v4609_v19 = vadd.f32 %v6165_v37, %v4495_v1  ;;  %v4498_v14 = vadd.f32 %v7822_v50, %v4497_v0 }
 0x416   : > { %4643 = vst [vmem:[%s7830_s13 + $0x30] sm:$0xff] %v4611_v8  ;;  %v4612_v41 = vadd.f32 %v6166_v22, %v4506_v15  ;;  %v6180_v8 = vld [vmem:[%s6277_s20 + $0xb0] sm:$0xff] }
 0x417   : > { %4641 = vst [vmem:[%s7830_s13 + $0x20] sm:$0xff] %v4609_v19  ;;  %v4610_v40 = vadd.f32 %v6167_v51, %v4498_v14  ;;  %v6181_v19 = vld [vmem:[%s6277_s20 + $0xa0] sm:$0xff] }
 0x418   : > { %4644 = vst [vmem:[%s7830_s13 + $0x38] sm:$0xff] %v4612_v41  ;;  %v6182_v41 = vld [vmem:[%s6277_s20 + $0xb8] sm:$0xff] }
 0x419   : > { %4642 = vst [vmem:[%s7830_s13 + $0x28] sm:$0xff] %v4610_v40  ;;  %v5760_v45 = vpop.f32.mrb[72].mxu0  ;;  %v6183_v40 = vld [vmem:[%s6277_s20 + $0xa8] sm:$0xff] }
 0x41a   : > { %v4519_v61 = vadd.f32 %v5760_v45, %v7822_v50  ;;  %v4510_v57 = vpop.f32.mrb[73].mxu0 }
 0x41b   : > { %v4511_v5 = vadd.f32 %v7822_v50, %v4510_v57  ;;  %v5761_v54 = vpop.f32.mrb[74].mxu0 }
 0x41c   : > { %v4615_v2 = vadd.f32 %v6168_v4, %v4519_v61  ;;  %v4522_v47 = vadd.f32 %v5761_v54, %v7822_v50  ;;  %v4513_v32 = vpop.f32.mrb[75].mxu0 }
 0x41d   : > { %v4613_v42 = vadd.f32 %v6169_v16, %v4511_v5  ;;  %v4514_v17 = vadd.f32 %v7822_v50, %v4513_v32 }
 0x41e   : > { %4647 = vst [vmem:[%s7830_s13 + $0x50] sm:$0xff] %v4615_v2  ;;  %v4616_v23 = vadd.f32 %v6170_v12, %v4522_v47  ;;  %v6184_v2 = vld [vmem:[%s6277_s20 + $0xd0] sm:$0xff] }
 0x41f   : > { %4645 = vst [vmem:[%s7830_s13 + $0x40] sm:$0xff] %v4613_v42  ;;  %v4614_v9 = vadd.f32 %v6171_v63, %v4514_v17  ;;  %v6185_v42 = vld [vmem:[%s6277_s20 + $0xc0] sm:$0xff] }
 0x420   : > { %4648 = vst [vmem:[%s7830_s13 + $0x58] sm:$0xff] %v4616_v23  ;;  %v6186_v23 = vld [vmem:[%s6277_s20 + $0xd8] sm:$0xff] }
 0x421   : > { %4646 = vst [vmem:[%s7830_s13 + $0x48] sm:$0xff] %v4614_v9  ;;  %v5764_v48 = vpop.f32.mrb[76].mxu0  ;;  %v6187_v9 = vld [vmem:[%s6277_s20 + $0xc8] sm:$0xff] }
 0x422   : > { %v4535_v18 = vadd.f32 %v5764_v48, %v7822_v50  ;;  %v4526_v56 = vpop.f32.mrb[77].mxu0 }
 0x423   : > { %v4527_v24 = vadd.f32 %v7822_v50, %v4526_v56  ;;  %v5765_v33 = vpop.f32.mrb[78].mxu0 }
 0x424   : > { %v4619_v3 = vadd.f32 %v6172_v11, %v4535_v18  ;;  %v4538_v34 = vadd.f32 %v5765_v33, %v7822_v50  ;;  %v4529_v30 = vpop.f32.mrb[79].mxu0 }
 0x425   : > { %v4617_v28 = vadd.f32 %v6173_v26, %v4527_v24  ;;  %v4530_v29 = vadd.f32 %v7822_v50, %v4529_v30 }
 0x426   : > { %4651 = vst [vmem:[%s7830_s13 + $0x70] sm:$0xff] %v4619_v3  ;;  %v4620_v55 = vadd.f32 %v6174_v31, %v4538_v34  ;;  %v6188_v3 = vld [vmem:[%s6277_s20 + $0xf0] sm:$0xff] }
 0x427   : > { %4649 = vst [vmem:[%s7830_s13 + $0x60] sm:$0xff] %v4617_v28  ;;  %v4618_v36 = vadd.f32 %v6175_v38, %v4530_v29  ;;  %v6189_v28 = vld [vmem:[%s6277_s20 + $0xe0] sm:$0xff] }
 0x428   : > { %4652 = vst [vmem:[%s7830_s13 + $0x78] sm:$0xff] %v4620_v55  ;;  %v6190_v55 = vld [vmem:[%s6277_s20 + $0xf8] sm:$0xff] }
 0x429   : > { %4650 = vst [vmem:[%s7830_s13 + $0x68] sm:$0xff] %v4618_v36  ;;  %v5768_v21 = vpop.f32.mrb[80].mxu0  ;;  %v6191_v36 = vld [vmem:[%s6277_s20 + $0xe8] sm:$0xff] }
 0x42a   : > { %v4551_v44 = vadd.f32 %v5768_v21, %v7822_v50  ;;  %v4542_v35 = vpop.f32.mrb[81].mxu0 }
 0x42b   : > { %v4543_v25 = vadd.f32 %v7822_v50, %v4542_v35  ;;  %v5769_v53 = vpop.f32.mrb[82].mxu0 }
 0x42c   : > { %v4623_v59 = vadd.f32 %v6176_v62, %v4551_v44  ;;  %v4554_v13 = vadd.f32 %v5769_v53, %v7822_v50  ;;  %v4545_v27 = vpop.f32.mrb[83].mxu0 }
 0x42d   : > { %v4621_v60 = vadd.f32 %v6177_v20, %v4543_v25  ;;  %v4546_v39 = vadd.f32 %v7822_v50, %v4545_v27 }
 0x42e   : > { %4655 = vst [vmem:[%s7830_s13 + $0x90] sm:$0xff] %v4623_v59  ;;  %v4624_v46 = vadd.f32 %v6178_v52, %v4554_v13 }
 0x42f   : > { %4653 = vst [vmem:[%s7830_s13 + $0x80] sm:$0xff] %v4621_v60  ;;  %v4622_v10 = vadd.f32 %v6179_v7, %v4546_v39 }
 0x430   : > { %4656 = vst [vmem:[%s7830_s13 + $0x98] sm:$0xff] %v4624_v46 }
 0x431   : > { %4654 = vst [vmem:[%s7830_s13 + $0x88] sm:$0xff] %v4622_v10  ;;  %v5772_v58 = vpop.f32.mrb[84].mxu0 }
 0x432   : > { %v4567_v49 = vadd.f32 %v5772_v58, %v7822_v50  ;;  %v4558_v1 = vpop.f32.mrb[85].mxu0 }
 0x433   : > { %v4559_v6 = vadd.f32 %v7822_v50, %v4558_v1  ;;  %v5773_v43 = vpop.f32.mrb[86].mxu0 }
 0x434   : > { %v4627_v15 = vadd.f32 %v6180_v8, %v4567_v49  ;;  %v4570_v0 = vadd.f32 %v5773_v43, %v7822_v50  ;;  %v4561_v37 = vpop.f32.mrb[87].mxu0 }
 0x435   : > { %v4625_v14 = vadd.f32 %v6181_v19, %v4559_v6  ;;  %v4562_v22 = vadd.f32 %v7822_v50, %v4561_v37 }
 0x436   : > { %4659 = vst [vmem:[%s7830_s13 + $0xb0] sm:$0xff] %v4627_v15  ;;  %v4628_v51 = vadd.f32 %v6182_v41, %v4570_v0 }
 0x437   : > { %4657 = vst [vmem:[%s7830_s13 + $0xa0] sm:$0xff] %v4625_v14  ;;  %v4626_v45 = vadd.f32 %v6183_v40, %v4562_v22 }
 0x438   : > { %4660 = vst [vmem:[%s7830_s13 + $0xb8] sm:$0xff] %v4628_v51 }
 0x439   : > { %4658 = vst [vmem:[%s7830_s13 + $0xa8] sm:$0xff] %v4626_v45  ;;  %v5776_v61 = vpop.f32.mrb[88].mxu0 }
 0x43a   : > { %v4583_v57 = vadd.f32 %v5776_v61, %v7822_v50  ;;  %v4574_v5 = vpop.f32.mrb[89].mxu0 }
 0x43b   : > { %v4575_v54 = vadd.f32 %v7822_v50, %v4574_v5  ;;  %v5777_v4 = vpop.f32.mrb[90].mxu0 }
 0x43c   : > { %v4631_v47 = vadd.f32 %v6184_v2, %v4583_v57  ;;  %v4586_v32 = vadd.f32 %v5777_v4, %v7822_v50  ;;  %v4577_v16 = vpop.f32.mrb[91].mxu0 }
 0x43d   : > { %v4629_v17 = vadd.f32 %v6185_v42, %v4575_v54  ;;  %v4578_v12 = vadd.f32 %v7822_v50, %v4577_v16 }
 0x43e   : > { %4663 = vst [vmem:[%s7830_s13 + $0xd0] sm:$0xff] %v4631_v47  ;;  %v4632_v63 = vadd.f32 %v6186_v23, %v4586_v32 }
 0x43f   : > { %4661 = vst [vmem:[%s7830_s13 + $0xc0] sm:$0xff] %v4629_v17  ;;  %v4630_v48 = vadd.f32 %v6187_v9, %v4578_v12 }
 0x440   : > { %4664 = vst [vmem:[%s7830_s13 + $0xd8] sm:$0xff] %v4632_v63 }
 0x441   : > { %4662 = vst [vmem:[%s7830_s13 + $0xc8] sm:$0xff] %v4630_v48  ;;  %v5780_v18 = vpop.f32.mrb[92].mxu0 }
 0x442   : > { %v4599_v56 = vadd.f32 %v5780_v18, %v7822_v50  ;;  %v4590_v24 = vpop.f32.mrb[93].mxu0 }
 0x443   : > { %v4591_v33 = vadd.f32 %v7822_v50, %v4590_v24  ;;  %v5781_v11 = vpop.f32.mrb[94].mxu0 }
 0x444   : > { %v4635_v34 = vadd.f32 %v6188_v3, %v4599_v56  ;;  %v4602_v30 = vadd.f32 %v5781_v11, %v7822_v50  ;;  %v4593_v26 = vpop.f32.mrb[95].mxu0 }
 0x445   : > { %v4633_v29 = vadd.f32 %v6189_v28, %v4591_v33  ;;  %v4594_v31 = vadd.f32 %v7822_v50, %v4593_v26 }
 0x446   : > { %4667 = vst [vmem:[%s7830_s13 + $0xf0] sm:$0xff] %v4635_v34  ;;  %v4636_v38 = vadd.f32 %v6190_v55, %v4602_v30 }
 0x447   : > { %4665 = vst [vmem:[%s7830_s13 + $0xe0] sm:$0xff] %v4633_v29  ;;  %v4634_v21 = vadd.f32 %v6191_v36, %v4594_v31 }
 0x448   : > { %4668 = vst [vmem:[%s7830_s13 + $0xf8] sm:$0xff] %v4636_v38 }
 0x449   : > { %4666 = vst [vmem:[%s7830_s13 + $0xe8] sm:$0xff] %v4634_v21 }
 0x44a PF: > { %s19_s30 = sadd.s32 1, %s6198_s30  }
 0x44b   : > { %p16_p4 = scmp.ge.s32.totalorder %s19_s30, 4  }
 0x44d   :  { %18 = sbr.rel (!%p16_p4) target bundleno = 1 (0x1), region = 94 }

</bundles_post_ra>
